<compile_context>
chip_gen: v5e
topology: v5e:2x2
jax: 0.10.0
libtpu: 0.0.40
codegen_flags: <defaults>
</compile_context>

<pallas_src>
import functools

import jax
import jax.numpy as jnp
from jax.experimental import pallas as pl
from jax.experimental.pallas import tpu as pltpu

LANE = 128


def _round_up(x, m):
    return (x + m - 1) // m * m


# ----------------------------------------------------------------------------
# Kernel: conv1x1 -> BN -> ReLU -> conv3x3(pad=1) -> BN -> ReLU ->
#         conv1x1 -> BN -> (+identity) -> ReLU          (stride=1)
# Grid iterates over the batch dimension; one image per grid step.
# ----------------------------------------------------------------------------
def _bottleneck_kernel(x_ref, w1_ref, b1_ref, w2_ref, b2_ref, w3_ref, b3_ref,
                       o_ref, col_ref, *, H, W):
    HW = H * W
    Pp = w1_ref.shape[1]          # padded planes (multiple of 128)
    KB = 3 * Pp                   # K of each conv2 matmul pass

    # --- conv1 (1x1) + bn1 + relu: bf16 MXU operands, f32 accumulate ---------
    h1 = jnp.dot(x_ref[0], w1_ref[...], preferred_element_type=jnp.float32)
    h1 = jnp.maximum(h1 + b1_ref[...], 0.0)            # (HW, Pp) f32
    h1_3d = h1.reshape(H, W, Pp)

    # --- conv2 (3x3, padding=1, stride=1) ------------------------------------
    # col layout: row (h'+1)*W + w holds, in column block j (=kw), the value
    # h1[h', w + (j-1)]; rows 0..W-1 and (H+1)*W..(H+2)*W-1 are the zero halo
    # rows for h' = -1 and h' = H.  Scratch persists across grid steps, so the
    # halo rows are re-zeroed every step (cheap) and the interior is fully
    # overwritten every step.
    zero_col = jnp.zeros((H, 1, Pp), jnp.float32)       # width halo column
    col_ref[0:W, :] = jnp.zeros((W, KB), jnp.bfloat16)              # top halo
    col_ref[(H + 1) * W:(H + 2) * W, :] = jnp.zeros((W, KB), jnp.bfloat16)

    def shift_w(dw):              # y[h, w] = h1[h, w + dw], zero outside [0, W)
        if dw == 0:
            return h1
        if dw > 0:
            g = jnp.concatenate([h1_3d[:, dw:, :], zero_col], axis=1)
        else:
            g = jnp.concatenate([zero_col, h1_3d[:, :dw, :]], axis=1)
        return g.reshape(HW, Pp)

    for j, dw in enumerate((-1, 0, 1)):                 # j == kw
        col_ref[W:(H + 1) * W, j * Pp:(j + 1) * Pp] = (
            shift_w(dw).astype(jnp.bfloat16))

    # 3 accumulating MXU passes, one per kernel row kh; the dh shift is just a
    # sublane-aligned row offset (kh*W) into the halo'd buffer.
    h2 = jnp.dot(col_ref[0:HW, :], w2_ref[0:KB, :],
                 preferred_element_type=jnp.float32)
    h2 = h2 + jnp.dot(col_ref[W:W + HW, :], w2_ref[KB:2 * KB, :],
                      preferred_element_type=jnp.float32)
    h2 = h2 + jnp.dot(col_ref[2 * W:2 * W + HW, :], w2_ref[2 * KB:3 * KB, :],
                      preferred_element_type=jnp.float32)
    h2 = jnp.maximum(h2 + b2_ref[...], 0.0)             # (HW, Pp) f32

    # --- conv3 (1x1) + bn3 + residual add + relu -----------------------------
    h3 = jnp.dot(h2.astype(jnp.bfloat16), w3_ref[...],
                 preferred_element_type=jnp.float32) + b3_ref[...]
    # identity re-read here (bf16 -> f32) rather than held live across kernel
    o_ref[0] = jnp.maximum(h3 + x_ref[0].astype(jnp.float32),
                           0.0).astype(o_ref.dtype)


def bottleneck_pallas(x_nhwc, w1f, b1, w2f, b2, w3f, b3):
    """x_nhwc: (N, H, W, Cin).  Weights already have BN scale folded in.
    w1f: (Cin, P), w2f: (3, 3, P, P) [HWIO], w3f: (P, Cout), biases: (1, C).
    Returns bf16 (N, H, W, Cout)."""
    N, H, W, Cin = x_nhwc.shape
    P = w1f.shape[1]
    Cout = w3f.shape[1]
    assert Cout == Cin, "downsample is None => inplanes must equal planes*4"
    assert W % 8 == 0, "W must be a sublane multiple for aligned halo slices"

    Cp = _round_up(Cin, LANE)     # padded in/out channels
    Pp = _round_up(P, LANE)       # padded planes
    HW = H * W

    # Channel-pad + flatten spatial dims; activations move as bf16.
    xp = jnp.pad(x_nhwc, ((0, 0), (0, 0), (0, 0), (0, Cp - Cin)))
    xp = xp.reshape(N, HW, Cp).astype(jnp.bfloat16)

    # Weights: bf16 MXU operands; biases stay f32.
    w1p = jnp.pad(w1f, ((0, Cp - Cin), (0, Pp - P))).astype(jnp.bfloat16)
    b1p = jnp.pad(b1, ((0, 0), (0, Pp - P))).astype(jnp.float32)
    w2p = jnp.pad(w2f, ((0, 0), (0, 0), (0, Pp - P), (0, Pp - P)))
    w2col = w2p.reshape(9 * Pp, Pp).astype(jnp.bfloat16)   # (kh,kw,cin) major
    b2p = jnp.pad(b2, ((0, 0), (0, Pp - P))).astype(jnp.float32)
    w3p = jnp.pad(w3f, ((0, Pp - P), (0, Cp - Cout))).astype(jnp.bfloat16)
    b3p = jnp.pad(b3, ((0, 0), (0, Cp - Cout))).astype(jnp.float32)

    kernel = functools.partial(_bottleneck_kernel, H=H, W=W)

    # Explicit VMEM budget: 2x double-buffered x/out blocks, weights (x2 for
    # default double-buffering), im2col scratch, f32 intermediates; 2x headroom.
    x_blk = HW * Cp * 2
    col_bytes = (H + 2) * W * 3 * Pp * 2
    wt_bytes = (Cp * Pp + 9 * Pp * Pp + Pp * Cp) * 2 + (2 * Pp + Cp) * 4
    interm = 4 * HW * max(Pp, Cp) * 4
    est = 2 * (x_blk + x_blk) + 2 * wt_bytes + col_bytes + interm
    vmem_limit = min(64 * 1024 * 1024, max(2 * est, 16 * 1024 * 1024))

    grid_spec = pltpu.PrefetchScalarGridSpec(
        num_scalar_prefetch=0,
        grid=(N,),
        in_specs=[
            pl.BlockSpec((1, HW, Cp), lambda n: (n, 0, 0)),
            pl.BlockSpec((Cp, Pp), lambda n: (0, 0)),
            pl.BlockSpec((1, Pp), lambda n: (0, 0)),
            pl.BlockSpec((9 * Pp, Pp), lambda n: (0, 0)),
            pl.BlockSpec((1, Pp), lambda n: (0, 0)),
            pl.BlockSpec((Pp, Cp), lambda n: (0, 0)),
            pl.BlockSpec((1, Cp), lambda n: (0, 0)),
        ],
        out_specs=pl.BlockSpec((1, HW, Cp), lambda n: (n, 0, 0)),
        scratch_shapes=[pltpu.VMEM(((H + 2) * W, 3 * Pp), jnp.bfloat16)],
    )
    out = pl.pallas_call(
        kernel,
        out_shape=jax.ShapeDtypeStruct((N, HW, Cp), jnp.bfloat16),
        grid_spec=grid_spec,
        compiler_params=pltpu.CompilerParams(
            dimension_semantics=("parallel",),
            vmem_limit_bytes=int(vmem_limit)),
    )(xp, w1p, b1p, w2col, b2p, w3p, b3p)
    return out.reshape(N, H, W, Cp)[..., :Cout]


# ----------------------------------------------------------------------------
# Parameter construction (deterministic) + BN folding (plain-JAX glue)
# ----------------------------------------------------------------------------
def make_params(key, inplanes, planes, dtype=jnp.float32):
    exp = 4
    ks = jax.random.split(key, 15)
    eps = 1e-5

    def bn(kg, kb, km, kv, c):
        gamma = 1.0 + 0.1 * jax.random.normal(kg, (c,), dtype)
        beta = 0.1 * jax.random.normal(kb, (c,), dtype)
        mean = 0.1 * jax.random.normal(km, (c,), dtype)
        var = jnp.abs(jax.random.normal(kv, (c,), dtype)) + 0.5
        scale = gamma / jnp.sqrt(var + eps)
        bias = beta - mean * scale
        return scale, bias

    # conv weights (PyTorch OIHW) -> kernel-friendly shapes
    w1 = 0.1 * jax.random.normal(ks[0], (planes, inplanes, 1, 1), dtype)
    w2 = 0.1 * jax.random.normal(ks[1], (planes, planes, 3, 3), dtype)
    w3 = 0.1 * jax.random.normal(ks[2], (planes * exp, planes, 1, 1), dtype)

    s1, b1 = bn(ks[3], ks[4], ks[5], ks[6], planes)
    s2, b2 = bn(ks[7], ks[8], ks[9], ks[10], planes)
    s3, b3 = bn(ks[11], ks[12], ks[13], ks[14], planes * exp)

    # fold BN scale into conv weights
    w1f = (w1[:, :, 0, 0] * s1[:, None]).T                           # (Cin, P)
    w2f = jnp.transpose(w2 * s2[:, None, None, None], (2, 3, 1, 0))  # HWIO
    w3f = (w3[:, :, 0, 0] * s3[:, None]).T                           # (P, Cout)

    return (w1f, b1.reshape(1, -1), w2f, b2.reshape(1, -1),
            w3f, b3.reshape(1, -1))


def bottleneck_ref(x_nhwc, w1f, b1, w2f, b2, w3f, b3):
    """Pure-JAX reference with the same bf16-operand / f32-accumulate math."""
    def conv(x, w, pad):
        return jax.lax.conv_general_dilated(
            x.astype(jnp.bfloat16), w.astype(jnp.bfloat16),
            window_strides=(1, 1), padding=pad,
            dimension_numbers=('NHWC', 'HWIO', 'NHWC'),
            preferred_element_type=jnp.float32)
    h1 = jax.nn.relu(conv(x_nhwc, w1f[None, None], 'VALID') + b1[0])
    h2 = jax.nn.relu(conv(h1, w2f, ((1, 1), (1, 1))) + b2[0])
    h3 = conv(h2, w3f[None, None], 'VALID') + b3[0]
    return jax.nn.relu(h3 + x_nhwc.astype(jnp.float32))


if __name__ == "__main__":
    # Small shapes: batch=2, inplanes=16, planes=4 (expansion 4 => out=16),
    # spatial 16x16, stride=1, downsample=None (identity residual).
    N, inplanes, H, W = 2, 16, 16, 16
    planes = 4

    key = jax.random.PRNGKey(0)
    kx, kp = jax.random.split(key)
    x_nchw = jax.random.normal(kx, (N, inplanes, H, W), jnp.float32)

    params = make_params(kp, inplanes, planes)

    # NCHW -> NHWC for the kernel, back to NCHW at the end.
    x_nhwc = jnp.transpose(x_nchw, (0, 2, 3, 1))
    out_nhwc = bottleneck_pallas(x_nhwc, *params)          # bf16 activations
    out_nchw = jnp.transpose(out_nhwc, (0, 3, 1, 2)).astype(jnp.float32)
    jax.block_until_ready(out_nchw)

    # Reference sees the same bf16-rounded identity; tolerance covers the
    # bf16 output rounding of the kernel.
    ref = jnp.transpose(
        bottleneck_ref(x_nhwc.astype(jnp.bfloat16), *params), (0, 3, 1, 2))
    assert out_nchw.shape == (N, planes * 4, H, W)
    assert jnp.allclose(out_nchw, ref, rtol=2e-2, atol=2e-2), (
        float(jnp.max(jnp.abs(out_nchw - ref))))

    print("KERNEL_OK")
</pallas_src>

<mosaic_0001>
module attributes {stable_mosaic.version = 11 : i64} {
  func.func @_bottleneck_kernel(%arg0: i32, %arg1: memref<1x256x128xbf16, #tpu.memory_space<vmem>>, %arg2: memref<128x128xbf16, #tpu.memory_space<vmem>>, %arg3: memref<1x128xf32, #tpu.memory_space<vmem>>, %arg4: memref<1152x128xbf16, #tpu.memory_space<vmem>>, %arg5: memref<1x128xf32, #tpu.memory_space<vmem>>, %arg6: memref<128x128xbf16, #tpu.memory_space<vmem>>, %arg7: memref<1x128xf32, #tpu.memory_space<vmem>>, %arg8: memref<1x256x128xbf16, #tpu.memory_space<vmem>>, %arg9: memref<288x384xbf16, #tpu.memory_space<vmem>>) attributes {dimension_semantics = [#tpu.dimension_semantics<parallel>], iteration_bounds = array<i64: 2>, scalar_prefetch = 0 : i64, scratch_operands = 1 : i64, tpu.core_type = #tpu.core_type<tc>, window_params = [{transform_indices = @transform_0, window_bounds = array<i64: 1, 256, 128>}, {pipeline_mode = #tpu.pipeline_mode<synchronous>, transform_indices = @transform_1, window_bounds = array<i64: 128, 128>}, {pipeline_mode = #tpu.pipeline_mode<synchronous>, transform_indices = @transform_2, window_bounds = array<i64: 1, 128>}, {pipeline_mode = #tpu.pipeline_mode<synchronous>, transform_indices = @transform_3, window_bounds = array<i64: 1152, 128>}, {pipeline_mode = #tpu.pipeline_mode<synchronous>, transform_indices = @transform_4, window_bounds = array<i64: 1, 128>}, {pipeline_mode = #tpu.pipeline_mode<synchronous>, transform_indices = @transform_5, window_bounds = array<i64: 128, 128>}, {pipeline_mode = #tpu.pipeline_mode<synchronous>, transform_indices = @transform_6, window_bounds = array<i64: 1, 128>}, {transform_indices = @transform_7, window_bounds = array<i64: 1, 256, 128>}]} {
    %c0 = arith.constant 0 : index
    %c0_0 = arith.constant 0 : index
    %c0_1 = arith.constant 0 : index
    %0 = vector.load %arg1[%c0, %c0_0, %c0_1] : memref<1x256x128xbf16, #tpu.memory_space<vmem>>, vector<1x256x128xbf16>
    %1 = vector.shape_cast %0 : vector<1x256x128xbf16> to vector<256x128xbf16>
    %c0_2 = arith.constant 0 : index
    %c0_3 = arith.constant 0 : index
    %2 = vector.load %arg2[%c0_2, %c0_3] : memref<128x128xbf16, #tpu.memory_space<vmem>>, vector<128x128xbf16>
    %cst = arith.constant dense<0.000000e+00> : vector<256x128xf32>
    %3 = tpu.matmul %1, %2, %cst {dimension_numbers = #tpu.dot_dimension_numbers<[1], [0], [0], [1], [0, 0, 1, 1], [], []>} : vector<256x128xbf16>, vector<128x128xbf16>, vector<256x128xf32> -> vector<256x128xf32>
    %c0_4 = arith.constant 0 : index
    %c0_5 = arith.constant 0 : index
    %4 = vector.load %arg3[%c0_4, %c0_5] : memref<1x128xf32, #tpu.memory_space<vmem>>, vector<1x128xf32>
    %5 = vector.broadcast %4 : vector<1x128xf32> to vector<256x128xf32>
    %6 = arith.addf %3, %5 : vector<256x128xf32>
    %cst_6 = arith.constant 0.000000e+00 : f32
    %7 = vector.broadcast %cst_6 : f32 to vector<256x128xf32>
    %8 = arith.maximumf %6, %7 : vector<256x128xf32>
    %9 = vector.shape_cast %8 : vector<256x128xf32> to vector<16x16x128xf32>
    %cst_7 = arith.constant 0.000000e+00 : f32
    %10 = vector.broadcast %cst_7 : f32 to vector<16x1x128xf32>
    %cst_8 = arith.constant 0.000000e+00 : bf16
    %11 = vector.broadcast %cst_8 : bf16 to vector<16x384xbf16>
    %c0_9 = arith.constant 0 : index
    %c0_10 = arith.constant 0 : index
    %12 = vector.load %arg9[%c0_9, %c0_10] : memref<288x384xbf16, #tpu.memory_space<vmem>>, vector<16x384xbf16>
    tpu.vector_store %arg9[%c0_9, %c0_10], %11 {strides = array<i32>} : memref<288x384xbf16, #tpu.memory_space<vmem>>, vector<16x384xbf16>,
    %cst_11 = arith.constant 0.000000e+00 : bf16
    %13 = vector.broadcast %cst_11 : bf16 to vector<16x384xbf16>
    %c272 = arith.constant 272 : index
    %c0_12 = arith.constant 0 : index
    %14 = vector.load %arg9[%c272, %c0_12] : memref<288x384xbf16, #tpu.memory_space<vmem>>, vector<16x384xbf16>
    tpu.vector_store %arg9[%c272, %c0_12], %13 {strides = array<i32>} : memref<288x384xbf16, #tpu.memory_space<vmem>>, vector<16x384xbf16>,
    %15 = vector.extract_strided_slice %9 {offsets = [0, 0, 0], sizes = [16, 15, 128], strides = [1, 1, 1]} : vector<16x16x128xf32> to vector<16x15x128xf32>
    %16 = tpu.concatenate %10, %15 in 1 : vector<16x1x128xf32>, vector<16x15x128xf32> -> vector<16x16x128xf32>
    %17 = vector.shape_cast %16 : vector<16x16x128xf32> to vector<256x128xf32>
    %18 = arith.truncf %17 : vector<256x128xf32> to vector<256x128xbf16>
    %c16 = arith.constant 16 : index
    %c0_13 = arith.constant 0 : index
    %19 = vector.load %arg9[%c16, %c0_13] : memref<288x384xbf16, #tpu.memory_space<vmem>>, vector<256x128xbf16>
    tpu.vector_store %arg9[%c16, %c0_13], %18 {strides = array<i32>} : memref<288x384xbf16, #tpu.memory_space<vmem>>, vector<256x128xbf16>,
    %20 = arith.truncf %8 : vector<256x128xf32> to vector<256x128xbf16>
    %c16_14 = arith.constant 16 : index
    %c128 = arith.constant 128 : index
    %21 = vector.load %arg9[%c16_14, %c128] : memref<288x384xbf16, #tpu.memory_space<vmem>>, vector<256x128xbf16>
    tpu.vector_store %arg9[%c16_14, %c128], %20 {strides = array<i32>} : memref<288x384xbf16, #tpu.memory_space<vmem>>, vector<256x128xbf16>,
    %22 = vector.extract_strided_slice %9 {offsets = [0, 1, 0], sizes = [16, 15, 128], strides = [1, 1, 1]} : vector<16x16x128xf32> to vector<16x15x128xf32>
    %23 = tpu.concatenate %22, %10 in 1 : vector<16x15x128xf32>, vector<16x1x128xf32> -> vector<16x16x128xf32>
    %24 = vector.shape_cast %23 : vector<16x16x128xf32> to vector<256x128xf32>
    %25 = arith.truncf %24 : vector<256x128xf32> to vector<256x128xbf16>
    %c16_15 = arith.constant 16 : index
    %c256 = arith.constant 256 : index
    %26 = vector.load %arg9[%c16_15, %c256] : memref<288x384xbf16, #tpu.memory_space<vmem>>, vector<256x128xbf16>
    tpu.vector_store %arg9[%c16_15, %c256], %25 {strides = array<i32>} : memref<288x384xbf16, #tpu.memory_space<vmem>>, vector<256x128xbf16>,
    %c0_16 = arith.constant 0 : index
    %c0_17 = arith.constant 0 : index
    %27 = vector.load %arg9[%c0_16, %c0_17] : memref<288x384xbf16, #tpu.memory_space<vmem>>, vector<256x384xbf16>
    %c0_18 = arith.constant 0 : index
    %c0_19 = arith.constant 0 : index
    %28 = vector.load %arg4[%c0_18, %c0_19] : memref<1152x128xbf16, #tpu.memory_space<vmem>>, vector<384x128xbf16>
    %cst_20 = arith.constant dense<0.000000e+00> : vector<256x128xf32>
    %29 = tpu.matmul %27, %28, %cst_20 {dimension_numbers = #tpu.dot_dimension_numbers<[1], [0], [0], [1], [0, 0, 1, 1], [], []>} : vector<256x384xbf16>, vector<384x128xbf16>, vector<256x128xf32> -> vector<256x128xf32>
    %c16_21 = arith.constant 16 : index
    %c0_22 = arith.constant 0 : index
    %30 = vector.load %arg9[%c16_21, %c0_22] : memref<288x384xbf16, #tpu.memory_space<vmem>>, vector<256x384xbf16>
    %c384 = arith.constant 384 : index
    %c0_23 = arith.constant 0 : index
    %31 = vector.load %arg4[%c384, %c0_23] : memref<1152x128xbf16, #tpu.memory_space<vmem>>, vector<384x128xbf16>
    %cst_24 = arith.constant dense<0.000000e+00> : vector<256x128xf32>
    %32 = tpu.matmul %30, %31, %cst_24 {dimension_numbers = #tpu.dot_dimension_numbers<[1], [0], [0], [1], [0, 0, 1, 1], [], []>} : vector<256x384xbf16>, vector<384x128xbf16>, vector<256x128xf32> -> vector<256x128xf32>
    %33 = arith.addf %29, %32 : vector<256x128xf32>
    %c32 = arith.constant 32 : index
    %c0_25 = arith.constant 0 : index
    %34 = vector.load %arg9[%c32, %c0_25] : memref<288x384xbf16, #tpu.memory_space<vmem>>, vector<256x384xbf16>
    %c768 = arith.constant 768 : index
    %c0_26 = arith.constant 0 : index
    %35 = vector.load %arg4[%c768, %c0_26] : memref<1152x128xbf16, #tpu.memory_space<vmem>>, vector<384x128xbf16>
    %cst_27 = arith.constant dense<0.000000e+00> : vector<256x128xf32>
    %36 = tpu.matmul %34, %35, %cst_27 {dimension_numbers = #tpu.dot_dimension_numbers<[1], [0], [0], [1], [0, 0, 1, 1], [], []>} : vector<256x384xbf16>, vector<384x128xbf16>, vector<256x128xf32> -> vector<256x128xf32>
    %37 = arith.addf %33, %36 : vector<256x128xf32>
    %c0_28 = arith.constant 0 : index
    %c0_29 = arith.constant 0 : index
    %38 = vector.load %arg5[%c0_28, %c0_29] : memref<1x128xf32, #tpu.memory_space<vmem>>, vector<1x128xf32>
    %39 = vector.broadcast %38 : vector<1x128xf32> to vector<256x128xf32>
    %40 = arith.addf %37, %39 : vector<256x128xf32>
    %cst_30 = arith.constant 0.000000e+00 : f32
    %41 = vector.broadcast %cst_30 : f32 to vector<256x128xf32>
    %42 = arith.maximumf %40, %41 : vector<256x128xf32>
    %43 = arith.truncf %42 : vector<256x128xf32> to vector<256x128xbf16>
    %c0_31 = arith.constant 0 : index
    %c0_32 = arith.constant 0 : index
    %44 = vector.load %arg6[%c0_31, %c0_32] : memref<128x128xbf16, #tpu.memory_space<vmem>>, vector<128x128xbf16>
    %cst_33 = arith.constant dense<0.000000e+00> : vector<256x128xf32>
    %45 = tpu.matmul %43, %44, %cst_33 {dimension_numbers = #tpu.dot_dimension_numbers<[1], [0], [0], [1], [0, 0, 1, 1], [], []>} : vector<256x128xbf16>, vector<128x128xbf16>, vector<256x128xf32> -> vector<256x128xf32>
    %c0_34 = arith.constant 0 : index
    %c0_35 = arith.constant 0 : index
    %46 = vector.load %arg7[%c0_34, %c0_35] : memref<1x128xf32, #tpu.memory_space<vmem>>, vector<1x128xf32>
    %47 = vector.broadcast %46 : vector<1x128xf32> to vector<256x128xf32>
    %48 = arith.addf %45, %47 : vector<256x128xf32>
    %c0_36 = arith.constant 0 : index
    %c0_37 = arith.constant 0 : index
    %c0_38 = arith.constant 0 : index
    %49 = vector.load %arg1[%c0_36, %c0_37, %c0_38] : memref<1x256x128xbf16, #tpu.memory_space<vmem>>, vector<1x256x128xbf16>
    %50 = vector.shape_cast %49 : vector<1x256x128xbf16> to vector<256x128xbf16>
    %51 = arith.extf %50 : vector<256x128xbf16> to vector<256x128xf32>
    %52 = arith.addf %48, %51 : vector<256x128xf32>
    %cst_39 = arith.constant 0.000000e+00 : f32
    %53 = vector.broadcast %cst_39 : f32 to vector<256x128xf32>
    %54 = arith.maximumf %52, %53 : vector<256x128xf32>
    %55 = arith.truncf %54 : vector<256x128xf32> to vector<256x128xbf16>
    %c0_40 = arith.constant 0 : index
    %c0_41 = arith.constant 0 : index
    %c0_42 = arith.constant 0 : index
    %56 = vector.load %arg8[%c0_40, %c0_41, %c0_42] : memref<1x256x128xbf16, #tpu.memory_space<vmem>>, vector<1x256x128xbf16>
    %57 = vector.shape_cast %56 : vector<1x256x128xbf16> to vector<256x128xbf16>
    %58 = vector.shape_cast %55 : vector<256x128xbf16> to vector<1x256x128xbf16>
    tpu.vector_store %arg8[%c0_40, %c0_41, %c0_42], %58 {strides = array<i32>} : memref<1x256x128xbf16, #tpu.memory_space<vmem>>, vector<1x256x128xbf16>,
    return
  }
  func.func @transform_0(%arg0: i32) -> (i32, i32, i32) {
    %c0_i32 = arith.constant 0 : i32
    %c0_i32_0 = arith.constant 0 : i32
    %c0_i32_1 = arith.constant 0 : i32
    return %arg0, %c0_i32, %c0_i32_0 : i32, i32, i32
  }
  func.func @transform_1(%arg0: i32) -> (i32, i32) {
    %c0_i32 = arith.constant 0 : i32
    %c0_i32_0 = arith.constant 0 : i32
    %c0_i32_1 = arith.constant 0 : i32
    return %c0_i32, %c0_i32_0 : i32, i32
  }
  func.func @transform_2(%arg0: i32) -> (i32, i32) {
    %c0_i32 = arith.constant 0 : i32
    %c0_i32_0 = arith.constant 0 : i32
    %c0_i32_1 = arith.constant 0 : i32
    return %c0_i32, %c0_i32_0 : i32, i32
  }
  func.func @transform_3(%arg0: i32) -> (i32, i32) {
    %c0_i32 = arith.constant 0 : i32
    %c0_i32_0 = arith.constant 0 : i32
    %c0_i32_1 = arith.constant 0 : i32
    return %c0_i32, %c0_i32_0 : i32, i32
  }
  func.func @transform_4(%arg0: i32) -> (i32, i32) {
    %c0_i32 = arith.constant 0 : i32
    %c0_i32_0 = arith.constant 0 : i32
    %c0_i32_1 = arith.constant 0 : i32
    return %c0_i32, %c0_i32_0 : i32, i32
  }
  func.func @transform_5(%arg0: i32) -> (i32, i32) {
    %c0_i32 = arith.constant 0 : i32
    %c0_i32_0 = arith.constant 0 : i32
    %c0_i32_1 = arith.constant 0 : i32
    return %c0_i32, %c0_i32_0 : i32, i32
  }
  func.func @transform_6(%arg0: i32) -> (i32, i32) {
    %c0_i32 = arith.constant 0 : i32
    %c0_i32_0 = arith.constant 0 : i32
    %c0_i32_1 = arith.constant 0 : i32
    return %c0_i32, %c0_i32_0 : i32, i32
  }
  func.func @transform_7(%arg0: i32) -> (i32, i32, i32) {
    %c0_i32 = arith.constant 0 : i32
    %c0_i32_0 = arith.constant 0 : i32
    %c0_i32_1 = arith.constant 0 : i32
    return %arg0, %c0_i32, %c0_i32_0 : i32, i32, i32
  }
}

</mosaic_0001>

<bundles_post_ra>
// kernel: tpu_custom_call.1
= control target key start
LH: loop header
LB: loop body
LE: loop exit
PB: predicated region body
PF: predicated region fallthrough
CT: control target
= control target key end

     0   :  { %s6408_s0 = inlined_call_operand.hbm [shape: bf16[2,256,128], index: 0, kind: input, shape index: {}]   ;;  %s6409_s1 = inlined_call_operand.hbm [shape: bf16[128,128], index: 1, kind: input, shape index: {}]   ;;  %s6410_s2 = inlined_call_operand.vmem [shape: f32[1,128], index: 2, kind: input, shape index: {}]   ;;  %s6411_s3 = inlined_call_operand.hbm [shape: bf16[1152,128], index: 3, kind: input, shape index: {}]   ;;  %s6412_s4 = inlined_call_operand.vmem [shape: f32[1,128], index: 4, kind: input, shape index: {}]   ;;  %s6413_s5 = inlined_call_operand.hbm [shape: bf16[128,128], index: 5, kind: input, shape index: {}]   ;;  %s6414_s6 = inlined_call_operand.vmem [shape: f32[1,128], index: 6, kind: input, shape index: {}]   ;;  %s6415_s7 = inlined_call_operand.hbm [shape: bf16[2,256,128], index: 7, kind: output, shape index: {}]  }
   0x1   :  { %6418 = sst [smem:[#allocation27_spill]] %s6409_s1 }
   0x2   :  { %12 = vsyncpa [#allocation4], 0 }
   0x3   :  { %14 = vsyncpa [#allocation4 + $0x1], 0 }
   0x4   :  { %15 = vsyncpa [#allocation7], 0 }
   0x5   :  { %16 = vsyncpa [#allocation10], 0 }
   0x6   :  { %17 = vsyncpa [#allocation5], 0 }
   0x7   :  { %19 = vsyncpa [#allocation5 + $0x1], 0  ;;  %s5278_s24 = smov 0   ;;  %s5280_s25 = smov 0  }
   0x8   :  { %s5282_s26 = smov 0   ;;  %s5284_s27 = smov 0  }
   0x9 LB: > { %s5299_s28 = sadd.s32 4294967295, %s5228_s27   ;;  %s3713_s29 = sadd.s32 4294967294, %s5228_s27   ;;  %s5228_s27 = sphi %s5284_s27, %s6474_s27   ;;  %s5224_s26 = sphi %s5282_s26, %s6473_s26   ;;  %s5220_s25 = sphi %s5280_s25, %s6472_s25   ;;  %s5216_s24 = sphi %s5278_s24, %s6471_s24  }
   0xa   : > { %p45_p0 = scmp.ne.s32.totalorder %s5220_s25, %s5216_s24  ;;  %p46_p1 = scmp.eq.s32.totalorder %s5299_s28, 0 }
   0xb   : > { %p195_p2 = scmp.eq.s32.totalorder %s5299_s28, 1  ;;  %p201_p3 = scmp.eq.s32.totalorder %s3713_s29, 1 }
   0xc   : > { %p5308_p4 = por %p46_p1, %p45_p0  ;;  %p3714_p5 = scmp.ge.s32.totalorder %s5228_s27, 1 }
   0xd   : > { %p5313_p6 = por %p201_p3, %p45_p0  ;;  %p208_p7 = scmp.lt.s32.totalorder %s5228_s27, 3 }
   0xe   : > { %s6421_s1 = sld [smem:[#allocation27_spill]]  ;;  %s5230_s13 = smov [#allocation6]  }
   0xf   : > { %p5321_p8 = pnand %p3714_p5, %p208_p7  ;;  %s221_s14 = sshll.u32 %s5230_s13, 4  ;;  %s222_s14 = int_to_ptr.vmem [resolvable:$true] %s221_s14 }
  0x10   : > { %s236_s18 = sshll.u32 %s6411_s3, 4  ;;  %s6416_s19 = smov 64   ;;  %s237_s18 = int_to_ptr.hbm [resolvable:$true] %s236_s18 }
  0x11   : > { %p4964_p9 = pneg %p5321_p8  ;;  %s6417_s20 = smov 4  }
  0x12   : > { %s5233_s21 = smov [#allocation8]   ;;  %s253_s9 = sshll.u32 %s6413_s5, 4  ;;  %s254_s9 = int_to_ptr.hbm [resolvable:$true] %s253_s9 }
  0x13   : > { %p5329_p10 = pnand %p4964_p9, %p46_p1  ;;  %s238_s22 = sshll.u32 %s5233_s21, 4  ;;  %s239_s22 = int_to_ptr.vmem [resolvable:$true] %s238_s22 }
  0x14   : > { %s219_s11 = sshll.u32 %s6421_s1, 4  ;;  %s5234_s10 = smov [#allocation9]   ;;  %s220_s11 = int_to_ptr.hbm [resolvable:$true] %s219_s11 }
  0x15   : > { %4967 = dma.hbm_to_vmem [thread:$0]  (!%p5329_p10), %s220_s11, 1024, %s222_s14, [#allocation7], %s6416_s19, %s6416_s19, %s6417_s20  }
  0x16   : > { %4970 = dma.hbm_to_vmem [thread:$0]  (!%p5329_p10), %s237_s18, 9216, %s239_s22, [#allocation7], %s6416_s19, %s6416_s19, %s6417_s20  }
  0x17   : > { %s255_s11 = sshll.u32 %s5234_s10, 4  ;;  %s5351_s13 = sadd.s32 1, %s5228_s27   ;;  %s256_s11 = int_to_ptr.vmem [resolvable:$true] %s255_s11 }
  0x18   : > { %4973 = dma.hbm_to_vmem [thread:$0]  (!%p5329_p10), %s254_s9, 1024, %s256_s11, [#allocation10], %s6416_s19, %s6416_s19, %s6417_s20  }
  0x19   : > { %s29_s14 = ssub.s32 %s5228_s27, %s5351_s13  ;;  %s32_s16 = sadd.s32 1, %s5224_s26 }
  0x1a   : > { %p30_p12 = scmp.eq.s32.totalorder %s29_s14, 0  ;;  %p39_p13 = scmp.ne.s32.totalorder %s5224_s26, %s5220_s25 }
  0x1b   : > { %p40_p0 = scmp.eq.s32.totalorder %s5228_s27, 0  ;;  %p4985_p5 = scmp.lt.s32.totalorder %s5228_s27, 2 }
  0x1c   : > { %s5365_s17 = scalar_select %p30_p12, %s5224_s26, %s32_s16  }
  0x1d   : > { %p5369_p3 = por %p195_p2, %p39_p13  ;;  %s272_s21 = sand.u32 1, %s5224_s26  }
  0x1e   : > { %s4545_s15 = sshll.u32 %s5228_s27, 7  ;;  %p41_p7 = por %p40_p0, %p39_p13 }
  0x1f   : > { %s3719_s22 = sshll.u32 %s272_s21, 7  ;;  %s281_s9 = scalar_lea.hbm %s6408_s0, %s4545_s15 }
  0x20   : > { %s282_s10 = sshll.u32 %s281_s9, 4  ;;  %s276_s11 = scalar_lea.vmem [#allocation3], %s3719_s22  ;;  %s283_s10 = int_to_ptr.hbm [resolvable:$true] %s282_s10 }
  0x21   : > { %s284_s14 = sshll.u32 %s276_s11, 4  ;;  %p5379_p9 = pnand %p4985_p5, %p41_p7  ;;  %s285_s14 = int_to_ptr.vmem [resolvable:$true] %s284_s14 }
  0x22   : > { %s273_s19 = scalar_lea.sflag [#allocation4], %s272_s21  ;;  %s5124_s20 = sshra.s32 %s283_s10, 4  ;;  %s5125_s20 = int_to_ptr.hbm [resolvable:$true] %s5124_s20 }
  0x23   : > { %s5126_s1 = scalar_lea.hbm %s5125_s20, 128  ;;  %p5128_p10 = pneg %p5379_p9 }
  0x24   : > { %p5127_p2 = scmp.ne.s32.totalorder %s5125_s20, %s5126_s1  ;;  %s5131_s22 = scalar_lea.hbm %s6408_s0, 256 }
  0x25   : > { %p5132_p0 = scmp.lt.s32.totalorder %s5125_s20, %s6408_s0  ;;  %p5133_p5 = scmp.lt.s32.totalorder %s5131_s22, %s5126_s1 }
  0x26   : > { %p5129_p12 = pnand %p5128_p10, %p5127_p2 }
  0x27   : > { %p5134_p7 = por %p5133_p5, %p5132_p0 }
  0x28   : > { %p5130_p13 = pneg %p5129_p12 }
  0x2a   : > { %p5135_p11 = pnand %p5134_p7, %p5130_p13 }
  0x2c   : > { %5138 = shalt.err (!%p5135_p11)
}
  0x2d   : > { %s6426_s21 = smov 4   ;;  %s6427_s11 = smov 64  }
  0x2e   : > { %4977 = dma.hbm_to_vmem [thread:$0]  (!%p5379_p9), %s283_s10, 2048, %s285_s14, %s273_s19, %s6427_s11, %s6427_s11, %s6426_s21  }
  0x2f   : > { %296 = sbr.rel (%p5321_p8) target bundleno = 1229 (0x4cd), region = 48 }
  0x34   : > { %s5399_s15 = sand.u32 1, %s5220_s25  }
  0x35   : > { %s3723_s1 = sshll.u32 %s5399_s15, 7  ;;  %s299_s20 = scalar_lea.sflag [#allocation4], %s5399_s15 }
  0x36   : > { %s5405_s23 = scalar_lea.vmem [#allocation3], %s3723_s1 }
  0x37   : > { %5199 = dma.done.wait (%p5308_p4), %s299_s20, 2048  }
  0x38   : > { %5201 = vsyncadd (%p5308_p4), %s299_s20, 4294965248 }
  0x39   : > { %5203 = dma.done.wait (%p46_p1), [#allocation7], 10240  }
  0x3a   : > { %5205 = vsyncadd (%p46_p1), [#allocation7], 4294957056 }
  0x3b   : > { %5207 = dma.done.wait (%p46_p1), [#allocation10], 1024  }
  0x3c   : > { %5209 = vsyncadd (%p46_p1), [#allocation10], 4294966272  ;;  %v4569_v0 = vld [vmem:[#allocation6 + $0x38] sm:$0xff]  ;;  %v4568_v1 = vld [vmem:[#allocation6 + $0x30] sm:$0xff]  ;;  %vm707_vm0 = vcmask 1040384   ;;  %vm932_vm1 = vcmask 1046528  }
  0x3d   : > { %546 = vmatpush.bf16.msra.mxu0 %v4569_v0  ;;  %4924 = vmatpush.bf16.msra.mxu3 %v4569_v0  ;;  %v4567_v2 = vld [vmem:[#allocation6 + $0x28] sm:$0xff]  ;;  %v4566_v3 = vld [vmem:[#allocation6 + $0x20] sm:$0xff]  ;;  %v4565_v4 = vld [vmem:[#allocation6 + $0x18] sm:$0xff]  ;;  %s6281_s9 = scalar_lea.vmem [#allocation11], %s3723_s1  ;;  %s4749_s21 = sshll.u32 %s5299_s28, 7 }
  0x3e   : > { %v4564_v5 = vld [vmem:[#allocation6 + $0x10] sm:$0xff]  ;;  %v4563_v6 = vld [vmem:[#allocation6 + $0x8] sm:$0xff]  ;;  %v4562_v7 = vld [vmem:[#allocation6] sm:$0xff]  ;;  %s3607_s20 = scalar_lea.hbm %s6415_s7, %s4749_s21  ;;  %s3608_s30 = sshll.u32 %s6281_s9, 4  ;;  %s3609_s30 = int_to_ptr.vmem [resolvable:$true] %s3608_s30 }
  0x3f   : > { %v4546_v8 = vld [vmem:[%s5405_s23] sm:$0xff]  ;;  %v4547_v10 = vld [vmem:[%s5405_s23 + $0x8] sm:$0xff]  ;;  %v4548_v12 = vld [vmem:[%s5405_s23 + $0x10] sm:$0xff]  ;;  %s3610_s12 = sshll.u32 %s3607_s20, 4  ;;  %s3596_s28 = scalar_lea.sflag [#allocation5], %s5399_s15  ;;  %s3611_s12 = int_to_ptr.hbm [resolvable:$true] %s3610_s12 }
  0x40   : > { %v4558_v9 = vld [vmem:[%s5405_s23 + $0x60] sm:$0xff]  ;;  %v4559_v11 = vld [vmem:[%s5405_s23 + $0x68] sm:$0xff]  ;;  %v4560_v13 = vld [vmem:[%s5405_s23 + $0x70] sm:$0xff]  ;;  %s5174_s16 = scalar_lea.hbm %s6415_s7, 256 }
  0x41   : > { %547 = vmatpush.bf16.msra.mxu0 %v4568_v1  ;;  %4925 = vmatpush.bf16.msra.mxu3 %v4568_v1  ;;  %v4549_v14 = vld [vmem:[%s5405_s23 + $0x18] sm:$0xff]  ;;  %v4550_v16 = vld [vmem:[%s5405_s23 + $0x20] sm:$0xff]  ;;  %v4551_v17 = vld [vmem:[%s5405_s23 + $0x28] sm:$0xff] }
  0x42   : > { %v4561_v15 = vld [vmem:[%s5405_s23 + $0x78] sm:$0xff]  ;;  %v4659_v20 = vld [vmem:[#allocation8 + $0x130] sm:$0xff]  ;;  %v4658_v23 = vld [vmem:[#allocation8 + $0x128] sm:$0xff] }
  0x43   : > { %v4660_v18 = vld [vmem:[#allocation8 + $0x138] sm:$0xff]  ;;  %v4552_v21 = vld [vmem:[%s5405_s23 + $0x30] sm:$0xff]  ;;  %v4650_v24 = vld [vmem:[#allocation8 + $0xe8] sm:$0xff] }
  0x44   : > { %v4652_v19 = vld [vmem:[#allocation8 + $0xf8] sm:$0xff]  ;;  %1746 = vmatpush.bf16.msra.mxu2 %v4660_v18  ;;  %v4651_v22 = vld [vmem:[#allocation8 + $0xf0] sm:$0xff]  ;;  %v4657_v25 = vld [vmem:[#allocation8 + $0x120] sm:$0xff] }
  0x45   : > { %548 = vmatpush.bf16.msra.mxu0 %v4567_v2  ;;  %4926 = vmatpush.bf16.msra.mxu3 %v4567_v2  ;;  %v4649_v26 = vld [vmem:[#allocation8 + $0xe0] sm:$0xff]  ;;  %v5430_v27 = vld [vmem:[#allocation8 + $0x118] sm:$0xff]  ;;  %v5433_v29 = vld [vmem:[#allocation8 + $0x110] sm:$0xff] }
  0x46   : > { %1657 = vmatpush.bf16.msra.mxu1 %v4652_v19  ;;  %v4648_v28 = vld [vmem:[#allocation8 + $0xd8] sm:$0xff]  ;;  %v4647_v31 = vld [vmem:[#allocation8 + $0xd0] sm:$0xff]  ;;  %v5437_v32 = vld [vmem:[#allocation8 + $0x108] sm:$0xff] }
  0x47   : > { %v4553_v30 = vld [vmem:[%s5405_s23 + $0x38] sm:$0xff]  ;;  %v4646_v33 = vld [vmem:[#allocation8 + $0xc8] sm:$0xff]  ;;  %v5440_v34 = vld [vmem:[#allocation8 + $0x100] sm:$0xff] }
  0x48   : > { %1747 = vmatpush.bf16.msra.mxu2 %v4659_v20  ;;  %v4645_v35 = vld [vmem:[#allocation8 + $0xc0] sm:$0xff]  ;;  %v5446_v36 = vld [vmem:[%s6410_s2] ss:$0 sm:$0xff]  ;;  %v4625_v41 = vld [vmem:[#allocation8 + $0x38] sm:$0xff] }
  0x49   : > { %549 = vmatpush.bf16.msra.mxu0 %v4566_v3  ;;  %4927 = vmatpush.bf16.msra.mxu3 %v4566_v3  ;;  %v4554_v37 = vld [vmem:[%s5405_s23 + $0x40] sm:$0xff]  ;;  %v4633_v42 = vld [vmem:[#allocation8 + $0x78] sm:$0xff]  ;;  %v4624_v55 = vld [vmem:[#allocation8 + $0x30] sm:$0xff] }
  0x4a   : > { %1658 = vmatpush.bf16.msra.mxu1 %v4651_v22  ;;  %v4555_v3 = vld [vmem:[%s5405_s23 + $0x48] sm:$0xff] }
  0x4c   : > { %1748 = vmatpush.bf16.msra.mxu2 %v4658_v23 }
  0x4d   : > { %550 = vmatpush.bf16.msra.mxu0 %v4565_v4  ;;  %4928 = vmatpush.bf16.msra.mxu3 %v4565_v4 }
  0x4e   : > { %1659 = vmatpush.bf16.msra.mxu1 %v4650_v24 }
  0x50   : > { %1749 = vmatpush.bf16.msra.mxu2 %v4657_v25 }
  0x51   : > { %551 = vmatpush.bf16.msra.mxu0 %v4564_v5  ;;  %4929 = vmatpush.bf16.msra.mxu3 %v4564_v5 }
  0x52   : > { %1660 = vmatpush.bf16.msra.mxu1 %v4649_v26 }
  0x54   : > { %1750 = vmatpush.bf16.msra.mxu2 %v5430_v27 }
  0x55   : > { %552 = vmatpush.bf16.msra.mxu0 %v4563_v6  ;;  %4930 = vmatpush.bf16.msra.mxu3 %v4563_v6 }
  0x56   : > { %1661 = vmatpush.bf16.msra.mxu1 %v4648_v28 }
  0x58   : > { %1751 = vmatpush.bf16.msra.mxu2 %v5433_v29 }
  0x59   : > { %553 = vmatpush.bf16.msra.mxu0 %v4562_v7  ;;  %4931 = vmatpush.bf16.msra.mxu3 %v4562_v7 }
  0x5a   : > { %1662 = vmatpush.bf16.msra.mxu1 %v4647_v31 }
  0x5c   : > { %554 = vmatmul.bf16.vlgmr.msra.gmra.mxu0 %v4546_v8  ;;  %614 = vmatmul.bf16.vlgmr.msra.gmra.mxu3 %v4558_v9  ;;  %v4623_v8 = vld [vmem:[#allocation8 + $0x28] sm:$0xff] }
  0x5d   : > { %4932 = vmatpush.bf16.msrb.mxu3 %v4652_v19  ;;  %1752 = vmatpush.bf16.msra.mxu2 %v5437_v32 }
  0x5e   : > { %1663 = vmatpush.bf16.msra.mxu1 %v4646_v33  ;;  %2084 = vmatpush.bf16.msrb.mxu0 %v4625_v41 }
  0x61   : > { %4933 = vmatpush.bf16.msrb.mxu3 %v4651_v22  ;;  %1753 = vmatpush.bf16.msra.mxu2 %v5440_v34 }
  0x62   : > { %1664 = vmatpush.bf16.msra.mxu1 %v4645_v35  ;;  %2085 = vmatpush.bf16.msrb.mxu0 %v4624_v55 }
  0x65   : > { %4934 = vmatpush.bf16.msrb.mxu3 %v4650_v24 }
  0x66   : > { %2173 = vmatpush.bf16.msrb.mxu1 %v4633_v42  ;;  %2086 = vmatpush.bf16.msrb.mxu0 %v4623_v8 }
  0x69   : > { %4935 = vmatpush.bf16.msrb.mxu3 %v4649_v26 }
  0x6c   : > { %559 = vmatmul.bf16.gmra.mxu0 %v4547_v10  ;;  %619 = vmatmul.bf16.gmra.mxu3 %v4559_v11 }
  0x6d   : > { %4936 = vmatpush.bf16.msrb.mxu3 %v4648_v28 }
  0x71   : > { %4937 = vmatpush.bf16.msrb.mxu3 %v4647_v31 }
  0x75   : > { %4938 = vmatpush.bf16.msrb.mxu3 %v4646_v33 }
  0x79   : > { %4939 = vmatpush.bf16.msrb.mxu3 %v4645_v35 }
  0x7c   : > { %564 = vmatmul.bf16.gmra.mxu0 %v4548_v12  ;;  %624 = vmatmul.bf16.gmra.mxu3 %v4560_v13 }
  0x7d   : > { %4940 = vmatpush.bf16.msra.mxu3 %v4660_v18 }
  0x81   : > { %4941 = vmatpush.bf16.msra.mxu3 %v4659_v20 }
  0x85   : > { %4942 = vmatpush.bf16.msra.mxu3 %v4658_v23 }
  0x89   : > { %4943 = vmatpush.bf16.msra.mxu3 %v4657_v25 }
  0x8c   : > { %569 = vmatmul.bf16.gmra.mxu0 %v4549_v14  ;;  %629 = vmatmul.bf16.gmra.mxu3 %v4561_v15 }
  0x8d   : > { %4944 = vmatpush.bf16.msra.mxu3 %v5430_v27 }
  0x91   : > { %4945 = vmatpush.bf16.msra.mxu3 %v5433_v29 }
  0x95   : > { %4946 = vmatpush.bf16.msra.mxu3 %v5437_v32 }
  0x99   : > { %4947 = vmatpush.bf16.msra.mxu3 %v5440_v34 }
  0x9c   : > { %574 = vmatmul.bf16.gmra.mxu0 %v4550_v16  ;;  %v4622_v16 = vld [vmem:[#allocation8 + $0x20] sm:$0xff] }
  0x9d   : > { %2087 = vmatpush.bf16.msrb.mxu0 %v4622_v16 }
  0xac   : > { %579 = vmatmul.bf16.gmra.mxu0 %v4551_v17 }
  0xbc   : > { %584 = vmatmul.bf16.gmra.mxu0 %v4552_v21 }
  0xcc   : > { %589 = vmatmul.bf16.gmra.mxu0 %v4553_v30 }
  0xd9   : > { %v555_v38 = vpop.f32.mrf.mxu0 }
  0xda   : > { %v556_v39 = vadd.f32 %v5446_v36, %v555_v38 }
  0xdc   : > { %v635_v40 = vmax.f32 %v556_v39, 0.0  ;;  %594 = vmatmul.bf16.gmra.mxu0 %v4554_v37  ;;  %v4621_v37 = vld [vmem:[#allocation8 + $0x18] sm:$0xff] }
  0xdd   : > { %2088 = vmatpush.bf16.msrb.mxu0 %v4621_v37 }
  0xde   : > { %v708_v43 = vrot.slane %v635_v40, 7  ;;  %v868_v44 = vpack.c.bf16 %v635_v40, %v635_v40  ;;  %v933_v56 = vrot.slane %v635_v40, 1 }
  0xdf   : > { %v615_v45 = vpop.f32.mrf.mxu3 }
  0xe0   : > { %v788_v46 = vsel %vm707_vm0, 0.0, %v708_v43  ;;  %900 = vst [vmem:[#allocation2 + $0x1c] sm:$0xf] %v868_v44  ;;  %v616_v47 = vadd.f32 %v5446_v36, %v615_v45 }
  0xe1   : > { %v804_v48 = vpack.c.bf16 %v788_v46, %v788_v46  ;;  %v557_v49 = vpop.f32.mrf.mxu0  ;;  %v4632_v46 = vld [vmem:[#allocation8 + $0x70] sm:$0xff] }
  0xe2   : > { %v659_v50 = vmax.f32 %v616_v47, 0.0  ;;  %v558_v51 = vadd.f32 %v5446_v36, %v557_v49  ;;  %v4620_v47 = vld [vmem:[#allocation8 + $0x10] sm:$0xff]  ;;  %2174 = vmatpush.bf16.msrb.mxu1 %v4632_v46 }
  0xe3   : > { %836 = vst [vmem:[#allocation2 + $0x18] sm:$0xf] %v804_v48  ;;  %2089 = vmatpush.bf16.msrb.mxu0 %v4620_v47 }
  0xe4   : > { %v744_v52 = vrot.slane %v659_v50, 7  ;;  %v892_v53 = vpack.c.bf16 %v659_v50, %v659_v50  ;;  %v636_v54 = vmax.f32 %v558_v51, 0.0  ;;  %v969_v9 = vrot.slane %v659_v50, 1 }
  0xe6   : > { %v800_v57 = vsel %vm707_vm0, 0.0, %v744_v52  ;;  %924 = vst [vmem:[#allocation2 + $0x13c] sm:$0xf] %v892_v53  ;;  %v709_v58 = vrot.slane %v636_v54, 7  ;;  %v869_v59 = vpack.c.bf16 %v636_v54, %v636_v54  ;;  %v934_v60 = vrot.slane %v636_v54, 1 }
  0xe7   : > { %v828_v61 = vpack.c.bf16 %v800_v57, %v800_v57  ;;  %v617_v62 = vpop.f32.mrf.mxu3  ;;  %v4573_v25 = vld [vmem:[#allocation2 + $0x1c] sm:$0xf] }
  0xe8   : > { %v710_v63 = vsel %vm707_vm0, %v708_v43, %v709_v58  ;;  %901 = vst [vmem:[#allocation2 + $0x28] sm:$0xf] %v869_v59  ;;  %v935_v0 = vsel %vm932_vm1, %v933_v56, %v934_v60  ;;  %v1013_v1 = vsel %vm932_vm1, %v934_v60, 0.0  ;;  %v618_v2 = vadd.f32 %v5446_v36, %v617_v62  ;;  %v4556_v58 = vld [vmem:[%s5405_s23 + $0x50] sm:$0xff] }
  0xe9   : > { %860 = vst [vmem:[#allocation2 + $0x138] sm:$0xf] %v828_v61  ;;  %v805_v4 = vpack.c.bf16 %v710_v63, %v710_v63  ;;  %v1029_v5 = vpack.c.bf16 %v935_v0, %v935_v0  ;;  %v1030_v6 = vpack.c.bf16 %v1013_v1, %v1013_v1  ;;  %v560_v7 = vpop.f32.mrf.mxu0  ;;  %v4619_v0 = vld [vmem:[#allocation8 + $0x8] sm:$0xff] }
  0xea   : > { %v660_v10 = vmax.f32 %v618_v2, 0.0  ;;  %v561_v11 = vadd.f32 %v5446_v36, %v560_v7  ;;  %v3826_v35 = vld [vmem:[#allocation2 + $0x18] sm:$0xf]  ;;  %2090 = vmatpush.bf16.msrb.mxu0 %v4619_v0 }
  0xeb   : > { %837 = vst [vmem:[#allocation2 + $0x24] sm:$0xf] %v805_v4  ;;  %v5235_v4 = vmov 0   ;;  %v4631_v0 = vld [vmem:[#allocation8 + $0x68] sm:$0xff] }
  0xec   : > { %1061 = vst [vmem:[#allocation2 + $0x20] sm:$0xf] %v1029_v5  ;;  %v745_v12 = vrot.slane %v660_v10, 7  ;;  %v893_v13 = vpack.c.bf16 %v660_v10, %v660_v10  ;;  %v970_v14 = vrot.slane %v660_v10, 1  ;;  %v637_v15 = vmax.f32 %v561_v11, 0.0  ;;  %599 = vmatmul.bf16.gmra.mxu0 %v4555_v3  ;;  %2175 = vmatpush.bf16.msrb.mxu1 %v4631_v0 }
  0xed   : > { %1062 = vst [vmem:[#allocation2 + $0x2c] sm:$0xf] %v1030_v6 }
  0xee   : > { %v746_v17 = vsel %vm707_vm0, %v744_v52, %v745_v12  ;;  %925 = vst [vmem:[#allocation2 + $0x148] sm:$0xf] %v893_v13  ;;  %v971_v18 = vsel %vm932_vm1, %v969_v9, %v970_v14  ;;  %v1025_v19 = vsel %vm932_vm1, %v970_v14, 0.0  ;;  %v711_v20 = vrot.slane %v637_v15, 7  ;;  %v4618_v9 = vld [vmem:[#allocation8] sm:$0xff] }
  0xef   : > { %v829_v21 = vpack.c.bf16 %v746_v17, %v746_v17  ;;  %v1053_v22 = vpack.c.bf16 %v971_v18, %v971_v18  ;;  %v1054_v23 = vpack.c.bf16 %v1025_v19, %v1025_v19  ;;  %v620_v24 = vpop.f32.mrf.mxu3  ;;  %v3828_v26 = vld [vmem:[#allocation2 + $0x24] sm:$0xf0]  ;;  %v870_v31 = vpack.c.bf16 %v637_v15, %v637_v15  ;;  %667 = vst [vmem:[#allocation2] sm:$0xff] %v5235_v4 }
  0xf0   : > { %v789_v27 = vsel %vm707_vm0, 0.0, %v711_v20  ;;  %v621_v28 = vadd.f32 %v5446_v36, %v620_v24  ;;  %v5467_v29 = vor.u32 %v4573_v25, %v3828_v26  ;;  %v936_v42 = vrot.slane %v637_v15, 1  ;;  %v3970_v45 = vld [vmem:[#allocation2 + $0x138] sm:$0xf]  ;;  %2091 = vmatpush.bf16.msrb.mxu0 %v4618_v9  ;;  %669 = vst [vmem:[#allocation2 + $0xc] sm:$0xff] %v5235_v4 }
  0xf1   : > { %861 = vst [vmem:[#allocation2 + $0x144] sm:$0xf] %v829_v21  ;;  %v806_v30 = vpack.c.bf16 %v789_v27, %v789_v27  ;;  %v562_v33 = vpop.f32.mrf.mxu0 }
  0xf2   : > { %1085 = vst [vmem:[#allocation2 + $0x140] sm:$0xf] %v1053_v22  ;;  %v661_v38 = vmax.f32 %v621_v28, 0.0  ;;  %v563_v39 = vadd.f32 %v5446_v36, %v562_v33  ;;  %1754 = vmatmul.bf16.vlgmr.msra.gmra.mxu2 %v5467_v29  ;;  %v4574_v40 = vld [vmem:[#allocation2 + $0x20] sm:$0xf0] }
  0xf3   : > { %1086 = vst [vmem:[#allocation2 + $0x14c] sm:$0xf] %v1054_v23  ;;  %v5472_v41 = vor.u32 %v4574_v40, %v3826_v35 }
  0xf4   : > { %838 = vst [vmem:[#allocation2 + $0x30] sm:$0xf] %v806_v30  ;;  %v747_v32 = vrot.slane %v661_v38, 7  ;;  %v894_v43 = vpack.c.bf16 %v661_v38, %v661_v38  ;;  %v638_v44 = vmax.f32 %v563_v39, 0.0  ;;  %v972_v1 = vrot.slane %v661_v38, 1 }
  0xf5   : > { %902 = vst [vmem:[#allocation2 + $0x34] sm:$0xf] %v870_v31  ;;  %1665 = vmatmul.bf16.vlgmr.msra.gmra.mxu1 %v5472_v41 }
  0xf6   : > { %v801_v48 = vsel %vm707_vm0, 0.0, %v747_v32  ;;  %926 = vst [vmem:[#allocation2 + $0x154] sm:$0xf] %v894_v43  ;;  %v712_v49 = vrot.slane %v638_v44, 7  ;;  %v871_v50 = vpack.c.bf16 %v638_v44, %v638_v44  ;;  %v937_v51 = vrot.slane %v638_v44, 1 }
  0xf7   : > { %v830_v52 = vpack.c.bf16 %v801_v48, %v801_v48  ;;  %v622_v53 = vpop.f32.mrf.mxu3  ;;  %668 = vst [vmem:[#allocation2 + $0x8] sm:$0xf] %v5235_v4 }
  0xf8   : > { %v713_v54 = vsel %vm707_vm0, %v711_v20, %v712_v49  ;;  %903 = vst [vmem:[#allocation2 + $0x40] sm:$0xf] %v871_v50  ;;  %v938_v34 = vsel %vm932_vm1, %v936_v42, %v937_v51  ;;  %v1014_v55 = vsel %vm932_vm1, %v937_v51, 0.0  ;;  %v623_v56 = vadd.f32 %v5446_v36, %v622_v53  ;;  %v4610_v57 = vld [vmem:[#allocation2 + $0x140] sm:$0xf0]  ;;  %v4557_v51 = vld [vmem:[%s5405_s23 + $0x58] sm:$0xff] }
  0xf9   : > { %862 = vst [vmem:[#allocation2 + $0x150] sm:$0xf] %v830_v52  ;;  %v807_v59 = vpack.c.bf16 %v713_v54, %v713_v54  ;;  %v1031_v60 = vpack.c.bf16 %v938_v34, %v938_v34  ;;  %v1032_v61 = vpack.c.bf16 %v1014_v55, %v1014_v55  ;;  %v565_v62 = vpop.f32.mrf.mxu0  ;;  %v5482_v63 = vor.u32 %v4610_v57, %v3970_v45 }
  0xfa   : > { %v662_v2 = vmax.f32 %v623_v56, 0.0  ;;  %v566_v3 = vadd.f32 %v5446_v36, %v565_v62  ;;  %670 = vst [vmem:[#allocation2 + $0x14] sm:$0xf] %v5235_v4 }
  0xfb   : > { %839 = vst [vmem:[#allocation2 + $0x3c] sm:$0xf] %v807_v59  ;;  %1725 = vmatmul.bf16.vlgmr.msrb.gmra.mxu3 %v5482_v63  ;;  %v3838_v26 = vld [vmem:[#allocation2 + $0x30] sm:$0xf] }
  0xfc   : > { %1063 = vst [vmem:[#allocation2 + $0x38] sm:$0xf] %v1031_v60  ;;  %v748_v5 = vrot.slane %v662_v2, 7  ;;  %v895_v6 = vpack.c.bf16 %v662_v2, %v662_v2  ;;  %v973_v7 = vrot.slane %v662_v2, 1  ;;  %v639_v8 = vmax.f32 %v566_v3, 0.0  ;;  %604 = vmatmul.bf16.gmra.mxu0 %v4556_v58 }
  0xfd   : > { %1064 = vst [vmem:[#allocation2 + $0x44] sm:$0xf] %v1032_v61  ;;  %v4576_v18 = vld [vmem:[#allocation2 + $0x34] sm:$0xf] }
  0xfe   : > { %v749_v10 = vsel %vm707_vm0, %v747_v32, %v748_v5  ;;  %927 = vst [vmem:[#allocation2 + $0x160] sm:$0xf] %v895_v6  ;;  %v974_v11 = vsel %vm932_vm1, %v972_v1, %v973_v7  ;;  %v1026_v12 = vsel %vm932_vm1, %v973_v7, 0.0  ;;  %v714_v13 = vrot.slane %v639_v8, 7 }
  0xff   : > { %v831_v14 = vpack.c.bf16 %v749_v10, %v749_v10  ;;  %v1055_v15 = vpack.c.bf16 %v974_v11, %v974_v11  ;;  %v1056_v16 = vpack.c.bf16 %v1026_v12, %v1026_v12  ;;  %v625_v17 = vpop.f32.mrf.mxu3  ;;  %v3840_v19 = vld [vmem:[#allocation2 + $0x3c] sm:$0xf0]  ;;  %v872_v24 = vpack.c.bf16 %v639_v8, %v639_v8  ;;  %671 = vst [vmem:[#allocation2 + $0x198] sm:$0xff] %v5235_v4 }
 0x100   : > { %v790_v20 = vsel %vm707_vm0, 0.0, %v714_v13  ;;  %v626_v21 = vadd.f32 %v5446_v36, %v625_v17  ;;  %v5492_v22 = vor.u32 %v4576_v18, %v3840_v19  ;;  %v939_v38 = vrot.slane %v639_v8, 1  ;;  %v3982_v39 = vld [vmem:[#allocation2 + $0x150] sm:$0xf]  ;;  %672 = vst [vmem:[#allocation2 + $0x1a0] sm:$0xf] %v5235_v4 }
 0x101   : > { %863 = vst [vmem:[#allocation2 + $0x15c] sm:$0xf] %v831_v14  ;;  %v808_v23 = vpack.c.bf16 %v790_v20, %v790_v20  ;;  %v567_v25 = vpop.f32.mrf.mxu0 }
 0x102   : > { %1087 = vst [vmem:[#allocation2 + $0x158] sm:$0xf] %v1055_v15  ;;  %v663_v27 = vmax.f32 %v626_v21, 0.0  ;;  %v568_v28 = vadd.f32 %v5446_v36, %v567_v25  ;;  %1759 = vmatmul.bf16.gmra.mxu2 %v5492_v22  ;;  %v4577_v30 = vld [vmem:[#allocation2 + $0x38] sm:$0xf0] }
 0x103   : > { %1088 = vst [vmem:[#allocation2 + $0x164] sm:$0xf] %v1056_v16  ;;  %v5497_v31 = vor.u32 %v4577_v30, %v3838_v26 }
 0x104   : > { %840 = vst [vmem:[#allocation2 + $0x48] sm:$0xf] %v808_v23  ;;  %v750_v33 = vrot.slane %v663_v27, 7  ;;  %v896_v35 = vpack.c.bf16 %v663_v27, %v663_v27  ;;  %v640_v37 = vmax.f32 %v568_v28, 0.0  ;;  %v975_v56 = vrot.slane %v663_v27, 1 }
 0x105   : > { %904 = vst [vmem:[#allocation2 + $0x4c] sm:$0xf] %v872_v24  ;;  %1670 = vmatmul.bf16.gmra.mxu1 %v5497_v31  ;;  %v4114_v24 = vld [vmem:[#allocation2] sm:$0xf]  ;;  %v4571_v28 = vld [vmem:[#allocation2 + $0x8] sm:$0xf0] }
 0x106   : > { %v802_v40 = vsel %vm707_vm0, 0.0, %v750_v33  ;;  %928 = vst [vmem:[#allocation2 + $0x16c] sm:$0xf] %v896_v35  ;;  %v715_v42 = vrot.slane %v640_v37, 7  ;;  %v873_v32 = vpack.c.bf16 %v640_v37, %v640_v37  ;;  %v940_v43 = vrot.slane %v640_v37, 1 }
 0x107   : > { %v832_v44 = vpack.c.bf16 %v802_v40, %v802_v40  ;;  %v627_v45 = vpop.f32.mrf.mxu3  ;;  %673 = vst [vmem:[#allocation2 + $0x1a4] sm:$0xff] %v5235_v4 }
 0x108   : > { %v716_v46 = vsel %vm707_vm0, %v714_v13, %v715_v42  ;;  %905 = vst [vmem:[#allocation2 + $0x58] sm:$0xf] %v873_v32  ;;  %v941_v47 = vsel %vm932_vm1, %v939_v38, %v940_v43  ;;  %v1015_v48 = vsel %vm932_vm1, %v940_v43, 0.0  ;;  %v628_v49 = vadd.f32 %v5446_v36, %v627_v45  ;;  %v4613_v50 = vld [vmem:[#allocation2 + $0x158] sm:$0xf0] }
 0x109   : > { %864 = vst [vmem:[#allocation2 + $0x168] sm:$0xf] %v832_v44  ;;  %v809_v52 = vpack.c.bf16 %v716_v46, %v716_v46  ;;  %v1033_v53 = vpack.c.bf16 %v941_v47, %v941_v47  ;;  %v1034_v54 = vpack.c.bf16 %v1015_v48, %v1015_v48  ;;  %v570_v34 = vpop.f32.mrf.mxu0  ;;  %v5507_v55 = vor.u32 %v4613_v50, %v3982_v39 }
 0x10a   : > { %v664_v57 = vmax.f32 %v628_v49, 0.0  ;;  %v571_v58 = vadd.f32 %v5446_v36, %v570_v34  ;;  %v4115_v32 = vor.u32 %v4571_v28, %v4114_v24  ;;  %674 = vst [vmem:[#allocation2 + $0x1ac] sm:$0xf] %v5235_v4 }
 0x10b   : > { %841 = vst [vmem:[#allocation2 + $0x54] sm:$0xf] %v809_v52  ;;  %1730 = vmatmul.bf16.gmra.mxu3 %v5507_v55  ;;  %v3850_v18 = vld [vmem:[#allocation2 + $0x48] sm:$0xf] }
 0x10c   : > { %1065 = vst [vmem:[#allocation2 + $0x50] sm:$0xf] %v1033_v53  ;;  %v751_v59 = vrot.slane %v664_v57, 7  ;;  %v897_v60 = vpack.c.bf16 %v664_v57, %v664_v57  ;;  %v976_v61 = vrot.slane %v664_v57, 1  ;;  %v641_v62 = vmax.f32 %v571_v58, 0.0  ;;  %609 = vmatmul.bf16.gmra.mxu0 %v4557_v51 }
 0x10d   : > { %1066 = vst [vmem:[#allocation2 + $0x5c] sm:$0xf] %v1034_v54  ;;  %v4579_v10 = vld [vmem:[#allocation2 + $0x4c] sm:$0xf] }
 0x10e   : > { %v752_v1 = vsel %vm707_vm0, %v750_v33, %v751_v59  ;;  %929 = vst [vmem:[#allocation2 + $0x178] sm:$0xf] %v897_v60  ;;  %v977_v2 = vsel %vm932_vm1, %v975_v56, %v976_v61  ;;  %v1027_v3 = vsel %vm932_vm1, %v976_v61, 0.0  ;;  %v717_v5 = vrot.slane %v641_v62, 7 }
 0x10f   : > { %v833_v6 = vpack.c.bf16 %v752_v1, %v752_v1  ;;  %v1057_v7 = vpack.c.bf16 %v977_v2, %v977_v2  ;;  %v1058_v8 = vpack.c.bf16 %v1027_v3, %v1027_v3  ;;  %v630_v9 = vpop.f32.mrf.mxu3  ;;  %v3852_v11 = vld [vmem:[#allocation2 + $0x54] sm:$0xf0]  ;;  %v874_v16 = vpack.c.bf16 %v641_v62, %v641_v62 }
 0x110   : > { %v791_v12 = vsel %vm707_vm0, 0.0, %v717_v5  ;;  %v631_v13 = vadd.f32 %v5446_v36, %v630_v9  ;;  %v5518_v14 = vor.u32 %v4579_v10, %v3852_v11  ;;  %v942_v30 = vrot.slane %v641_v62, 1  ;;  %v3994_v33 = vld [vmem:[#allocation2 + $0x168] sm:$0xf] }
 0x111   : > { %865 = vst [vmem:[#allocation2 + $0x174] sm:$0xf] %v833_v6  ;;  %v810_v15 = vpack.c.bf16 %v791_v12, %v791_v12  ;;  %v572_v17 = vpop.f32.mrf.mxu0 }
 0x112   : > { %1089 = vst [vmem:[#allocation2 + $0x170] sm:$0xf] %v1057_v7  ;;  %v665_v19 = vmax.f32 %v631_v13, 0.0  ;;  %v573_v20 = vadd.f32 %v5446_v36, %v572_v17  ;;  %1764 = vmatmul.bf16.gmra.mxu2 %v5518_v14  ;;  %v4580_v21 = vld [vmem:[#allocation2 + $0x50] sm:$0xf0] }
 0x113   : > { %1090 = vst [vmem:[#allocation2 + $0x17c] sm:$0xf] %v1058_v8  ;;  %v5523_v23 = vor.u32 %v4580_v21, %v3850_v18 }
 0x114   : > { %842 = vst [vmem:[#allocation2 + $0x60] sm:$0xf] %v810_v15  ;;  %v753_v25 = vrot.slane %v665_v19, 7  ;;  %v898_v26 = vpack.c.bf16 %v665_v19, %v665_v19  ;;  %v642_v27 = vmax.f32 %v573_v20, 0.0  ;;  %v978_v53 = vrot.slane %v665_v19, 1 }
 0x115   : > { %906 = vst [vmem:[#allocation2 + $0x64] sm:$0xf] %v874_v16  ;;  %1675 = vmatmul.bf16.gmra.mxu1 %v5523_v23  ;;  %v4630_v16 = vld [vmem:[#allocation8 + $0x60] sm:$0xff] }
 0x116   : > { %v803_v35 = vsel %vm707_vm0, 0.0, %v753_v25  ;;  %930 = vst [vmem:[#allocation2 + $0x184] sm:$0xf] %v898_v26  ;;  %v718_v37 = vrot.slane %v642_v27, 7  ;;  %v875_v38 = vpack.c.bf16 %v642_v27, %v642_v27  ;;  %v943_v39 = vrot.slane %v642_v27, 1  ;;  %2176 = vmatpush.bf16.msrb.mxu1 %v4630_v16 }
 0x117   : > { %v834_v40 = vpack.c.bf16 %v803_v35, %v803_v35  ;;  %v632_v42 = vpop.f32.mrf.mxu3 }
 0x118   : > { %v719_v43 = vsel %vm707_vm0, %v717_v5, %v718_v37  ;;  %907 = vst [vmem:[#allocation2 + $0x70] sm:$0xf] %v875_v38  ;;  %v944_v44 = vsel %vm932_vm1, %v942_v30, %v943_v39  ;;  %v1016_v45 = vsel %vm932_vm1, %v943_v39, 0.0  ;;  %v633_v46 = vadd.f32 %v5446_v36, %v632_v42  ;;  %v4616_v47 = vld [vmem:[#allocation2 + $0x170] sm:$0xf0] }
 0x119   : > { %866 = vst [vmem:[#allocation2 + $0x180] sm:$0xf] %v834_v40  ;;  %v811_v48 = vpack.c.bf16 %v719_v43, %v719_v43  ;;  %v1035_v49 = vpack.c.bf16 %v944_v44, %v944_v44  ;;  %v1036_v50 = vpack.c.bf16 %v1016_v45, %v1016_v45  ;;  %v575_v51 = vpop.f32.mrf.mxu0  ;;  %v5532_v52 = vor.u32 %v4616_v47, %v3994_v33 }
 0x11a   : > { %v666_v54 = vmax.f32 %v633_v46, 0.0  ;;  %v576_v34 = vadd.f32 %v5446_v36, %v575_v51 }
 0x11b   : > { %843 = vst [vmem:[#allocation2 + $0x6c] sm:$0xf] %v811_v48  ;;  %1735 = vmatmul.bf16.gmra.mxu3 %v5532_v52  ;;  %v3862_v12 = vld [vmem:[#allocation2 + $0x60] sm:$0xf] }
 0x11c   : > { %1067 = vst [vmem:[#allocation2 + $0x68] sm:$0xf] %v1035_v49  ;;  %v754_v56 = vrot.slane %v666_v54, 7  ;;  %v899_v57 = vpack.c.bf16 %v666_v54, %v666_v54  ;;  %v979_v58 = vrot.slane %v666_v54, 1  ;;  %v643_v59 = vmax.f32 %v576_v34, 0.0  ;;  %2092 = vmatmul.bf16.vlgmr.msrb.gmra.mxu0 %v4115_v32 }
 0x11d   : > { %1068 = vst [vmem:[#allocation2 + $0x74] sm:$0xf] %v1036_v50  ;;  %v4582_v3 = vld [vmem:[#allocation2 + $0x64] sm:$0xf]  ;;  %v4609_v54 = vld [vmem:[#allocation2 + $0x13c] sm:$0xf] }
 0x11e   : > { %v755_v60 = vsel %vm707_vm0, %v753_v25, %v754_v56  ;;  %931 = vst [vmem:[#allocation2 + $0x190] sm:$0xf] %v899_v57  ;;  %v980_v61 = vsel %vm932_vm1, %v978_v53, %v979_v58  ;;  %v1028_v62 = vsel %vm932_vm1, %v979_v58, 0.0  ;;  %v720_v0 = vrot.slane %v643_v59, 7 }
 0x11f   : > { %v835_v1 = vpack.c.bf16 %v755_v60, %v755_v60  ;;  %v1059_v4 = vpack.c.bf16 %v980_v61, %v980_v61  ;;  %v1060_v2 = vpack.c.bf16 %v1028_v62, %v1028_v62  ;;  %v3864_v5 = vld [vmem:[#allocation2 + $0x6c] sm:$0xf0]  ;;  %v876_v9 = vpack.c.bf16 %v643_v59, %v643_v59 }
 0x120   : > { %v792_v6 = vsel %vm707_vm0, 0.0, %v720_v0  ;;  %v5541_v7 = vor.u32 %v4582_v3, %v3864_v5  ;;  %v945_v18 = vrot.slane %v643_v59, 1  ;;  %v4006_v24 = vld [vmem:[#allocation2 + $0x180] sm:$0xf]  ;;  %v3972_v59 = vld [vmem:[#allocation2 + $0x144] sm:$0xf0] }
 0x121   : > { %867 = vst [vmem:[#allocation2 + $0x18c] sm:$0xf] %v835_v1  ;;  %v812_v8 = vpack.c.bf16 %v792_v6, %v792_v6  ;;  %v577_v10 = vpop.f32.mrf.mxu0  ;;  %v5564_v3 = vor.u32 %v4609_v54, %v3972_v59 }
 0x122   : > { %1091 = vst [vmem:[#allocation2 + $0x188] sm:$0xf] %v1059_v4  ;;  %v578_v11 = vadd.f32 %v5446_v36, %v577_v10  ;;  %1769 = vmatmul.bf16.gmra.mxu2 %v5541_v7  ;;  %v4583_v13 = vld [vmem:[#allocation2 + $0x68] sm:$0xf0] }
 0x123   : > { %1092 = vst [vmem:[#allocation2 + $0x194] sm:$0xf] %v1060_v2  ;;  %v5545_v15 = vor.u32 %v4583_v13, %v3862_v12 }
 0x124   : > { %844 = vst [vmem:[#allocation2 + $0x78] sm:$0xf] %v812_v8  ;;  %v644_v17 = vmax.f32 %v578_v11, 0.0  ;;  %v4629_v8 = vld [vmem:[#allocation8 + $0x58] sm:$0xff] }
 0x125   : > { %908 = vst [vmem:[#allocation2 + $0x7c] sm:$0xf] %v876_v9  ;;  %1680 = vmatmul.bf16.gmra.mxu1 %v5545_v15 }
 0x126   : > { %v721_v19 = vrot.slane %v644_v17, 7  ;;  %v877_v20 = vpack.c.bf16 %v644_v17, %v644_v17  ;;  %v946_v21 = vrot.slane %v644_v17, 1  ;;  %2177 = vmatpush.bf16.msrb.mxu1 %v4629_v8  ;;  %v4668_v17 = vld [vmem:[#allocation8 + $0x178] sm:$0xff] }
 0x127   : > { %1835 = vmatpush.bf16.msrb.mxu3 %v4668_v17 }
 0x128   : > { %v722_v25 = vsel %vm707_vm0, %v720_v0, %v721_v19  ;;  %909 = vst [vmem:[#allocation2 + $0x88] sm:$0xf] %v877_v20  ;;  %v947_v26 = vsel %vm932_vm1, %v945_v18, %v946_v21  ;;  %v1017_v27 = vsel %vm932_vm1, %v946_v21, 0.0  ;;  %v4643_v28 = vld [vmem:[#allocation2 + $0x188] sm:$0xf0] }
 0x129   : > { %v813_v30 = vpack.c.bf16 %v722_v25, %v722_v25  ;;  %v1037_v33 = vpack.c.bf16 %v947_v26, %v947_v26  ;;  %v1038_v35 = vpack.c.bf16 %v1017_v27, %v1017_v27  ;;  %v580_v37 = vpop.f32.mrf.mxu0  ;;  %v4007_v38 = vor.u32 %v4643_v28, %v4006_v24  ;;  %v4667_v25 = vld [vmem:[#allocation8 + $0x170] sm:$0xff]  ;;  %v4612_v27 = vld [vmem:[#allocation2 + $0x154] sm:$0xf] }
 0x12a   : > { %v581_v39 = vadd.f32 %v5446_v36, %v580_v37  ;;  %v3984_v37 = vld [vmem:[#allocation2 + $0x15c] sm:$0xf0] }
 0x12b   : > { %845 = vst [vmem:[#allocation2 + $0x84] sm:$0xf] %v813_v30  ;;  %1740 = vmatmul.bf16.gmra.mxu3 %v4007_v38  ;;  %v3874_v50 = vld [vmem:[#allocation2 + $0x78] sm:$0xf] }
 0x12c   : > { %1069 = vst [vmem:[#allocation2 + $0x80] sm:$0xf] %v1037_v33  ;;  %v645_v40 = vmax.f32 %v581_v39, 0.0  ;;  %2097 = vmatmul.bf16.gmra.mxu0 %v5472_v41  ;;  %v4585_v43 = vld [vmem:[#allocation2 + $0x7c] sm:$0xf]  ;;  %1836 = vmatpush.bf16.msrb.mxu3 %v4667_v25 }
 0x12d   : > { %1070 = vst [vmem:[#allocation2 + $0x8c] sm:$0xf] %v1038_v35 }
 0x12e   : > { %v723_v42 = vrot.slane %v645_v40, 7  ;;  %v878_v32 = vpack.c.bf16 %v645_v40, %v645_v40  ;;  %v948_v34 = vrot.slane %v645_v40, 1 }
 0x12f   : > { %v3876_v44 = vld [vmem:[#allocation2 + $0x84] sm:$0xf0] }
 0x130   : > { %v793_v45 = vsel %vm707_vm0, 0.0, %v723_v42  ;;  %910 = vst [vmem:[#allocation2 + $0x94] sm:$0xf] %v878_v32  ;;  %v5554_v46 = vor.u32 %v4585_v43, %v3876_v44 }
 0x131   : > { %v814_v47 = vpack.c.bf16 %v793_v45, %v793_v45  ;;  %v582_v48 = vpop.f32.mrf.mxu0 }
 0x132   : > { %v583_v49 = vadd.f32 %v5446_v36, %v582_v48  ;;  %1774 = vmatmul.bf16.gmra.mxu2 %v5554_v46  ;;  %v4586_v51 = vld [vmem:[#allocation2 + $0x80] sm:$0xf0] }
 0x133   : > { %846 = vst [vmem:[#allocation2 + $0x90] sm:$0xf] %v814_v47  ;;  %v5558_v41 = vor.u32 %v4586_v51, %v3874_v50  ;;  %v5580_v47 = vor.u32 %v4612_v27, %v3984_v37  ;;  %v4665_v50 = vld [vmem:[#allocation8 + $0x160] sm:$0xff] }
 0x134   : > { %v646_v53 = vmax.f32 %v583_v49, 0.0 }
 0x135   : > { %1685 = vmatmul.bf16.gmra.mxu1 %v5558_v41 }
 0x136   : > { %v724_v56 = vrot.slane %v646_v53, 7  ;;  %v879_v57 = vpack.c.bf16 %v646_v53, %v646_v53  ;;  %v949_v58 = vrot.slane %v646_v53, 1 }
 0x137   : > { %v4588_v11 = vld [vmem:[#allocation2 + $0x94] sm:$0xf] }
 0x138   : > { %v725_v60 = vsel %vm707_vm0, %v723_v42, %v724_v56  ;;  %911 = vst [vmem:[#allocation2 + $0xa0] sm:$0xf] %v879_v57  ;;  %v950_v61 = vsel %vm932_vm1, %v948_v34, %v949_v58  ;;  %v1018_v62 = vsel %vm932_vm1, %v949_v58, 0.0  ;;  %v4666_v42 = vld [vmem:[#allocation8 + $0x168] sm:$0xff]  ;;  %v4664_v58 = vld [vmem:[#allocation8 + $0x158] sm:$0xff] }
 0x139   : > { %v815_v0 = vpack.c.bf16 %v725_v60, %v725_v60  ;;  %v1039_v1 = vpack.c.bf16 %v950_v61, %v950_v61  ;;  %v1040_v4 = vpack.c.bf16 %v1018_v62, %v1018_v62  ;;  %v585_v2 = vpop.f32.mrf.mxu0  ;;  %1837 = vmatpush.bf16.msrb.mxu3 %v4666_v42 }
 0x13a   : > { %v586_v5 = vadd.f32 %v5446_v36, %v585_v2 }
 0x13b   : > { %847 = vst [vmem:[#allocation2 + $0x9c] sm:$0xf] %v815_v0  ;;  %1814 = vmatmul.bf16.vlgmr.msra.gmra.mxu3 %v5564_v3 }
 0x13c   : > { %1071 = vst [vmem:[#allocation2 + $0x98] sm:$0xf] %v1039_v1  ;;  %v647_v6 = vmax.f32 %v586_v5, 0.0  ;;  %2102 = vmatmul.bf16.gmra.mxu0 %v5497_v31  ;;  %v3886_v31 = vld [vmem:[#allocation2 + $0x90] sm:$0xf]  ;;  %v4628_v1 = vld [vmem:[#allocation8 + $0x50] sm:$0xff] }
 0x13d   : > { %1072 = vst [vmem:[#allocation2 + $0xa4] sm:$0xf] %v1040_v4  ;;  %1838 = vmatpush.bf16.msrb.mxu3 %v4665_v50  ;;  %v4663_v4 = vld [vmem:[#allocation8 + $0x150] sm:$0xff]  ;;  %v4615_v5 = vld [vmem:[#allocation2 + $0x16c] sm:$0xf]  ;;  %2178 = vmatpush.bf16.msrb.mxu1 %v4628_v1 }
 0x13e   : > { %v726_v9 = vrot.slane %v647_v6, 7  ;;  %v880_v10 = vpack.c.bf16 %v647_v6, %v647_v6  ;;  %v951_v28 = vrot.slane %v647_v6, 1 }
 0x13f   : > { %v3888_v12 = vld [vmem:[#allocation2 + $0x9c] sm:$0xf0] }
 0x140   : > { %v794_v13 = vsel %vm707_vm0, 0.0, %v726_v9  ;;  %912 = vst [vmem:[#allocation2 + $0xac] sm:$0xf] %v880_v10  ;;  %v5570_v16 = vor.u32 %v4588_v11, %v3888_v12  ;;  %v3996_v11 = vld [vmem:[#allocation2 + $0x174] sm:$0xf0] }
 0x141   : > { %v816_v18 = vpack.c.bf16 %v794_v13, %v794_v13  ;;  %v587_v19 = vpop.f32.mrf.mxu0  ;;  %1839 = vmatpush.bf16.msrb.mxu3 %v4664_v58  ;;  %v5596_v25 = vor.u32 %v4615_v5, %v3996_v11  ;;  %v4641_v5 = vld [vmem:[#allocation8 + $0xb8] sm:$0xff] }
 0x142   : > { %v588_v20 = vadd.f32 %v5446_v36, %v587_v19  ;;  %1779 = vmatmul.bf16.gmra.mxu2 %v5570_v16  ;;  %v4589_v21 = vld [vmem:[#allocation2 + $0x98] sm:$0xf0] }
 0x143   : > { %848 = vst [vmem:[#allocation2 + $0xa8] sm:$0xf] %v816_v18  ;;  %v5574_v24 = vor.u32 %v4589_v21, %v3886_v31  ;;  %v4662_v18 = vld [vmem:[#allocation8 + $0x148] sm:$0xff]  ;;  %2262 = vmatpush.bf16.msrb.mxu2 %v4641_v5 }
 0x144   : > { %v648_v26 = vmax.f32 %v588_v20, 0.0 }
 0x145   : > { %1690 = vmatmul.bf16.gmra.mxu1 %v5574_v24  ;;  %1840 = vmatpush.bf16.msrb.mxu3 %v4663_v4 }
 0x146   : > { %v727_v30 = vrot.slane %v648_v26, 7  ;;  %v881_v33 = vpack.c.bf16 %v648_v26, %v648_v26  ;;  %v952_v35 = vrot.slane %v648_v26, 1 }
 0x147   : > { %v4591_v54 = vld [vmem:[#allocation2 + $0xac] sm:$0xf] }
 0x148   : > { %v728_v38 = vsel %vm707_vm0, %v726_v9, %v727_v30  ;;  %913 = vst [vmem:[#allocation2 + $0xb8] sm:$0xf] %v881_v33  ;;  %v953_v39 = vsel %vm932_vm1, %v951_v28, %v952_v35  ;;  %v1019_v40 = vsel %vm932_vm1, %v952_v35, 0.0  ;;  %v4661_v28 = vld [vmem:[#allocation8 + $0x140] sm:$0xff] }
 0x149   : > { %v817_v32 = vpack.c.bf16 %v728_v38, %v728_v38  ;;  %v1041_v43 = vpack.c.bf16 %v953_v39, %v953_v39  ;;  %v1042_v44 = vpack.c.bf16 %v1019_v40, %v1019_v40  ;;  %v590_v45 = vpop.f32.mrf.mxu0  ;;  %1841 = vmatpush.bf16.msrb.mxu3 %v4662_v18 }
 0x14a   : > { %v591_v48 = vadd.f32 %v5446_v36, %v590_v45 }
 0x14b   : > { %849 = vst [vmem:[#allocation2 + $0xb4] sm:$0xf] %v817_v32  ;;  %1819 = vmatmul.bf16.gmra.mxu3 %v5580_v47 }
 0x14c   : > { %1073 = vst [vmem:[#allocation2 + $0xb0] sm:$0xf] %v1041_v43  ;;  %v649_v49 = vmax.f32 %v591_v48, 0.0  ;;  %2107 = vmatmul.bf16.gmra.mxu0 %v5523_v23  ;;  %v3898_v23 = vld [vmem:[#allocation2 + $0xa8] sm:$0xf] }
 0x14d   : > { %1074 = vst [vmem:[#allocation2 + $0xbc] sm:$0xf] %v1042_v44  ;;  %1842 = vmatpush.bf16.msrb.mxu3 %v4661_v28  ;;  %v4642_v48 = vld [vmem:[#allocation2 + $0x184] sm:$0xf] }
 0x14e   : > { %v729_v51 = vrot.slane %v649_v49, 7  ;;  %v882_v53 = vpack.c.bf16 %v649_v49, %v649_v49  ;;  %v954_v6 = vrot.slane %v649_v49, 1 }
 0x14f   : > { %v3900_v34 = vld [vmem:[#allocation2 + $0xb4] sm:$0xf0] }
 0x150   : > { %v795_v56 = vsel %vm707_vm0, 0.0, %v729_v51  ;;  %914 = vst [vmem:[#allocation2 + $0xc4] sm:$0xf] %v882_v53  ;;  %v5586_v57 = vor.u32 %v4591_v54, %v3900_v34  ;;  %v4008_v54 = vld [vmem:[#allocation2 + $0x18c] sm:$0xf0] }
 0x151   : > { %v818_v59 = vpack.c.bf16 %v795_v56, %v795_v56  ;;  %v592_v60 = vpop.f32.mrf.mxu0 }
 0x152   : > { %v593_v61 = vadd.f32 %v5446_v36, %v592_v60  ;;  %1784 = vmatmul.bf16.gmra.mxu2 %v5586_v57  ;;  %v4592_v62 = vld [vmem:[#allocation2 + $0xb0] sm:$0xf0] }
 0x153   : > { %850 = vst [vmem:[#allocation2 + $0xc0] sm:$0xf] %v818_v59  ;;  %v5590_v0 = vor.u32 %v4592_v62, %v3898_v23  ;;  %v4011_v23 = vor.u32 %v4642_v48, %v4008_v54  ;;  %v5615_v62 = vld [vmem:[%s6410_s2] ss:$0 sm:$0xff] }
 0x154   : > { %v650_v2 = vmax.f32 %v593_v61, 0.0  ;;  %v4640_v54 = vld [vmem:[#allocation8 + $0xb0] sm:$0xff] }
 0x155   : > { %1695 = vmatmul.bf16.gmra.mxu1 %v5590_v0  ;;  %2263 = vmatpush.bf16.msrb.mxu2 %v4640_v54 }
 0x156   : > { %v730_v8 = vrot.slane %v650_v2, 7  ;;  %v883_v9 = vpack.c.bf16 %v650_v2, %v650_v2  ;;  %v955_v10 = vrot.slane %v650_v2, 1  ;;  %v4627_v2 = vld [vmem:[#allocation8 + $0x48] sm:$0xff] }
 0x157   : > { %v4594_v35 = vld [vmem:[#allocation2 + $0xc4] sm:$0xf]  ;;  %2179 = vmatpush.bf16.msrb.mxu1 %v4627_v2 }
 0x158   : > { %v731_v12 = vsel %vm707_vm0, %v729_v51, %v730_v8  ;;  %915 = vst [vmem:[#allocation2 + $0xd0] sm:$0xf] %v883_v9  ;;  %v956_v13 = vsel %vm932_vm1, %v954_v6, %v955_v10  ;;  %v1020_v17 = vsel %vm932_vm1, %v955_v10, 0.0 }
 0x159   : > { %v819_v19 = vpack.c.bf16 %v731_v12, %v731_v12  ;;  %v1043_v20 = vpack.c.bf16 %v956_v13, %v956_v13  ;;  %v1044_v31 = vpack.c.bf16 %v1020_v17, %v1020_v17  ;;  %v595_v21 = vpop.f32.mrf.mxu0 }
 0x15a   : > { %v596_v26 = vadd.f32 %v5446_v36, %v595_v21  ;;  %v3910_v43 = vld [vmem:[#allocation2 + $0xc0] sm:$0xf] }
 0x15b   : > { %851 = vst [vmem:[#allocation2 + $0xcc] sm:$0xf] %v819_v19  ;;  %1824 = vmatmul.bf16.gmra.mxu3 %v5596_v25 }
 0x15c   : > { %1075 = vst [vmem:[#allocation2 + $0xc8] sm:$0xf] %v1043_v20  ;;  %v651_v27 = vmax.f32 %v596_v26, 0.0  ;;  %2112 = vmatmul.bf16.gmra.mxu0 %v5545_v15 }
 0x15d   : > { %1076 = vst [vmem:[#allocation2 + $0xd4] sm:$0xf] %v1044_v31 }
 0x15e   : > { %v732_v30 = vrot.slane %v651_v27, 7  ;;  %v884_v33 = vpack.c.bf16 %v651_v27, %v651_v27  ;;  %v957_v49 = vrot.slane %v651_v27, 1 }
 0x15f   : > { %v3912_v37 = vld [vmem:[#allocation2 + $0xcc] sm:$0xf0] }
 0x160   : > { %v796_v38 = vsel %vm707_vm0, 0.0, %v732_v30  ;;  %916 = vst [vmem:[#allocation2 + $0xdc] sm:$0xf] %v884_v33  ;;  %v5602_v39 = vor.u32 %v4594_v35, %v3912_v37  ;;  %v3834_v37 = vld [vmem:[#allocation2 + $0x20] sm:$0xf] }
 0x161   : > { %v820_v40 = vpack.c.bf16 %v796_v38, %v796_v38  ;;  %v597_v42 = vpop.f32.mrf.mxu0  ;;  %v4575_v38 = vld [vmem:[#allocation2 + $0x28] sm:$0xf0] }
 0x162   : > { %v598_v32 = vadd.f32 %v5446_v36, %v597_v42  ;;  %1789 = vmatmul.bf16.gmra.mxu2 %v5602_v39  ;;  %v4595_v15 = vld [vmem:[#allocation2 + $0xc8] sm:$0xf0] }
 0x163   : > { %852 = vst [vmem:[#allocation2 + $0xd8] sm:$0xf] %v820_v40  ;;  %v5606_v44 = vor.u32 %v4595_v15, %v3910_v43 }
 0x164   : > { %v652_v45 = vmax.f32 %v598_v32, 0.0 }
 0x165   : > { %1700 = vmatmul.bf16.gmra.mxu1 %v5606_v44 }
 0x166   : > { %v733_v50 = vrot.slane %v652_v45, 7  ;;  %v885_v51 = vpack.c.bf16 %v652_v45, %v652_v45  ;;  %v958_v53 = vrot.slane %v652_v45, 1 }
 0x167   : > { %v4597_v9 = vld [vmem:[#allocation2 + $0xdc] sm:$0xf] }
 0x168   : > { %v734_v34 = vsel %vm707_vm0, %v732_v30, %v733_v50  ;;  %917 = vst [vmem:[#allocation2 + $0xe8] sm:$0xf] %v885_v51  ;;  %v959_v36 = vsel %vm932_vm1, %v957_v49, %v958_v53  ;;  %v1021_v56 = vsel %vm932_vm1, %v958_v53, 0.0  ;;  %v5632_v49 = vor.u32 %v4575_v38, %v3834_v37 }
 0x169   : > { %v821_v58 = vpack.c.bf16 %v734_v34, %v734_v34  ;;  %v1045_v59 = vpack.c.bf16 %v959_v36, %v959_v36  ;;  %v1046_v60 = vpack.c.bf16 %v1021_v56, %v1021_v56  ;;  %v600_v61 = vpop.f32.mrf.mxu0 }
 0x16a   : > { %v601_v1 = vadd.f32 %v5615_v62, %v600_v61 }
 0x16b   : > { %853 = vst [vmem:[#allocation2 + $0xe4] sm:$0xf] %v821_v58  ;;  %1829 = vmatmul.bf16.gmra.mxu3 %v4011_v23 }
 0x16c   : > { %1077 = vst [vmem:[#allocation2 + $0xe0] sm:$0xf] %v1045_v59  ;;  %v653_v4 = vmax.f32 %v601_v1, 0.0  ;;  %2117 = vmatmul.bf16.gmra.mxu0 %v5558_v41  ;;  %v3922_v41 = vld [vmem:[#allocation2 + $0xd8] sm:$0xf] }
 0x16d   : > { %1078 = vst [vmem:[#allocation2 + $0xec] sm:$0xf] %v1046_v60  ;;  %v4626_v60 = vld [vmem:[#allocation8 + $0x40] sm:$0xff]  ;;  %v4639_v1 = vld [vmem:[#allocation8 + $0xa8] sm:$0xff] }
 0x16e   : > { %v735_v6 = vrot.slane %v653_v4, 7  ;;  %v886_v8 = vpack.c.bf16 %v653_v4, %v653_v4  ;;  %v960_v26 = vrot.slane %v653_v4, 1  ;;  %2180 = vmatpush.bf16.msrb.mxu1 %v4626_v60  ;;  %2264 = vmatpush.bf16.msrb.mxu2 %v4639_v1 }
 0x16f   : > { %v3924_v10 = vld [vmem:[#allocation2 + $0xe4] sm:$0xf0] }
 0x170   : > { %v797_v11 = vsel %vm707_vm0, 0.0, %v735_v6  ;;  %918 = vst [vmem:[#allocation2 + $0xf4] sm:$0xf] %v886_v8  ;;  %v5620_v12 = vor.u32 %v4597_v9, %v3924_v10 }
 0x171   : > { %v822_v13 = vpack.c.bf16 %v797_v11, %v797_v11  ;;  %v602_v17 = vpop.f32.mrf.mxu0 }
 0x172   : > { %v603_v18 = vadd.f32 %v5615_v62, %v602_v17  ;;  %v1666_v19 = vpop.f32.mrf.mxu1  ;;  %1794 = vmatmul.bf16.gmra.mxu2 %v5620_v12  ;;  %v4598_v20 = vld [vmem:[#allocation2 + $0xe0] sm:$0xf0] }
 0x173   : > { %854 = vst [vmem:[#allocation2 + $0xf0] sm:$0xf] %v822_v13  ;;  %v5624_v31 = vor.u32 %v4598_v20, %v3922_v41  ;;  %v4638_v13 = vld [vmem:[#allocation8 + $0xa0] sm:$0xff] }
 0x174   : > { %v654_v21 = vmax.f32 %v603_v18, 0.0  ;;  %2265 = vmatpush.bf16.msrb.mxu2 %v4638_v13 }
 0x175   : > { %1705 = vmatmul.bf16.gmra.mxu1 %v5624_v31  ;;  %v1755_v27 = vpop.f32.mrf.mxu2 }
 0x176   : > { %v736_v28 = vrot.slane %v654_v21, 7  ;;  %v887_v30 = vpack.c.bf16 %v654_v21, %v654_v21  ;;  %v961_v33 = vrot.slane %v654_v21, 1  ;;  %v5627_v35 = vadd.f32 %v1755_v27, %v1666_v19 }
 0x177   : > { %v4600_v61 = vld [vmem:[#allocation2 + $0xf4] sm:$0xf] }
 0x178   : > { %v737_v40 = vsel %vm707_vm0, %v735_v6, %v736_v28  ;;  %919 = vst [vmem:[#allocation2 + $0x100] sm:$0xf] %v887_v30  ;;  %v962_v42 = vsel %vm932_vm1, %v960_v26, %v961_v33  ;;  %v1022_v32 = vsel %vm932_vm1, %v961_v33, 0.0  ;;  %v3846_v28 = vld [vmem:[#allocation2 + $0x38] sm:$0xf]  ;;  %v4637_v33 = vld [vmem:[#allocation8 + $0x98] sm:$0xff] }
 0x179   : > { %v823_v43 = vpack.c.bf16 %v737_v40, %v737_v40  ;;  %v1047_v15 = vpack.c.bf16 %v962_v42, %v962_v42  ;;  %v1048_v45 = vpack.c.bf16 %v1022_v32, %v1022_v32  ;;  %v605_v48 = vpop.f32.mrf.mxu0  ;;  %v4578_v30 = vld [vmem:[#allocation2 + $0x40] sm:$0xf0]  ;;  %2266 = vmatpush.bf16.msrb.mxu2 %v4637_v33 }
 0x17a   : > { %v606_v50 = vadd.f32 %v5615_v62, %v605_v48  ;;  %v1668_v51 = vpop.f32.mrf.mxu1  ;;  %v3934_v9 = vld [vmem:[#allocation2 + $0xf0] sm:$0xf] }
 0x17b   : > { %855 = vst [vmem:[#allocation2 + $0xfc] sm:$0xf] %v823_v43  ;;  %1843 = vmatmul.bf16.vlgmr.msrb.gmra.mxu3 %v5632_v49 }
 0x17c   : > { %1079 = vst [vmem:[#allocation2 + $0xf8] sm:$0xf] %v1047_v15  ;;  %v655_v53 = vmax.f32 %v606_v50, 0.0  ;;  %2122 = vmatmul.bf16.gmra.mxu0 %v5574_v24 }
 0x17d   : > { %1080 = vst [vmem:[#allocation2 + $0x104] sm:$0xf] %v1048_v45  ;;  %v1757_v34 = vpop.f32.mrf.mxu2  ;;  %v5656_v45 = vor.u32 %v4578_v30, %v3846_v28 }
 0x17e   : > { %v738_v36 = vrot.slane %v655_v53, 7  ;;  %v888_v56 = vpack.c.bf16 %v655_v53, %v655_v53  ;;  %v5637_v58 = vadd.f32 %v1757_v34, %v1668_v51  ;;  %v5639_v59 = vpop.f32.mrf.mxu3  ;;  %v963_v18 = vrot.slane %v655_v53, 1  ;;  %v4636_v51 = vld [vmem:[#allocation8 + $0x90] sm:$0xff] }
 0x17f   : > { %v3936_v23 = vld [vmem:[#allocation2 + $0xfc] sm:$0xf0]  ;;  %2267 = vmatpush.bf16.msrb.mxu2 %v4636_v51 }
 0x180   : > { %v798_v4 = vsel %vm707_vm0, 0.0, %v738_v36  ;;  %920 = vst [vmem:[#allocation2 + $0x10c] sm:$0xf] %v888_v56  ;;  %v5642_v2 = vor.u32 %v4600_v61, %v3936_v23  ;;  %v4724_v61 = vld [vmem:[#allocation8 + $0x1b8] sm:$0xff] }
 0x181   : > { %v824_v24 = vpack.c.bf16 %v798_v4, %v798_v4  ;;  %v607_v5 = vpop.f32.mrf.mxu0  ;;  %v4635_v4 = vld [vmem:[#allocation8 + $0x88] sm:$0xff]  ;;  %2863 = vmatpush.bf16.msra.mxu3 %v4724_v61 }
 0x182   : > { %v608_v6 = vadd.f32 %v5615_v62, %v607_v5  ;;  %v1671_v8 = vpop.f32.mrf.mxu1  ;;  %1799 = vmatmul.bf16.gmra.mxu2 %v5642_v2  ;;  %v4601_v10 = vld [vmem:[#allocation2 + $0xf8] sm:$0xf0] }
 0x183   : > { %856 = vst [vmem:[#allocation2 + $0x108] sm:$0xf] %v824_v24  ;;  %v5646_v11 = vor.u32 %v4601_v10, %v3934_v9  ;;  %2268 = vmatpush.bf16.msrb.mxu2 %v4635_v4 }
 0x184   : > { %v656_v17 = vmax.f32 %v608_v6, 0.0 }
 0x185   : > { %1710 = vmatmul.bf16.gmra.mxu1 %v5646_v11  ;;  %v1760_v19 = vpop.f32.mrf.mxu2 }
 0x186   : > { %v739_v41 = vrot.slane %v656_v17, 7  ;;  %v889_v20 = vpack.c.bf16 %v656_v17, %v656_v17  ;;  %v964_v21 = vrot.slane %v656_v17, 1  ;;  %v5649_v26 = vadd.f32 %v1760_v19, %v1671_v8  ;;  %v5651_v27 = vpop.f32.mrf.mxu3  ;;  %v4732_v19 = vld [vmem:[#allocation8 + $0x1f8] sm:$0xff] }
 0x187   : > { %v4603_v23 = vld [vmem:[#allocation2 + $0x10c] sm:$0xf]  ;;  %2952 = vmatpush.bf16.msra.mxu0 %v4732_v19  ;;  %v3870_v19 = vld [vmem:[#allocation2 + $0x68] sm:$0xf] }
 0x188   : > { %v740_v37 = vsel %vm707_vm0, %v738_v36, %v739_v41  ;;  %921 = vst [vmem:[#allocation2 + $0x118] sm:$0xf] %v889_v20  ;;  %v965_v38 = vsel %vm932_vm1, %v963_v18, %v964_v21  ;;  %v1023_v40 = vsel %vm932_vm1, %v964_v21, 0.0  ;;  %v4634_v18 = vld [vmem:[#allocation8 + $0x80] sm:$0xff] }
 0x189   : > { %v825_v42 = vpack.c.bf16 %v740_v37, %v740_v37  ;;  %v1049_v32 = vpack.c.bf16 %v965_v38, %v965_v38  ;;  %v1050_v43 = vpack.c.bf16 %v1023_v40, %v1023_v40  ;;  %v610_v15 = vpop.f32.mrf.mxu0  ;;  %v3858_v38 = vld [vmem:[#allocation2 + $0x50] sm:$0xf]  ;;  %v4581_v40 = vld [vmem:[#allocation2 + $0x58] sm:$0xf0]  ;;  %2269 = vmatpush.bf16.msrb.mxu2 %v4634_v18 }
 0x18a   : > { %v611_v48 = vadd.f32 %v5615_v62, %v610_v15  ;;  %v1673_v50 = vpop.f32.mrf.mxu1  ;;  %v3946_v10 = vld [vmem:[#allocation2 + $0x108] sm:$0xf] }
 0x18b   : > { %857 = vst [vmem:[#allocation2 + $0x114] sm:$0xf] %v825_v42  ;;  %1848 = vmatmul.bf16.gmra.mxu3 %v5656_v45  ;;  %v4740_v42 = vld [vmem:[#allocation8 + $0x238] sm:$0xff] }
 0x18c   : > { %1081 = vst [vmem:[#allocation2 + $0x110] sm:$0xf] %v1049_v32  ;;  %v657_v53 = vmax.f32 %v611_v48, 0.0  ;;  %2127 = vmatmul.bf16.gmra.mxu0 %v5590_v0  ;;  %3041 = vmatpush.bf16.msra.mxu1 %v4740_v42 }
 0x18d   : > { %1082 = vst [vmem:[#allocation2 + $0x11c] sm:$0xf] %v1050_v43  ;;  %v1762_v54 = vpop.f32.mrf.mxu2 }
 0x18e   : > { %v741_v34 = vrot.slane %v657_v53, 7  ;;  %v890_v36 = vpack.c.bf16 %v657_v53, %v657_v53  ;;  %v5661_v56 = vadd.f32 %v1762_v54, %v1673_v50  ;;  %v5663_v60 = vpop.f32.mrf.mxu3  ;;  %v966_v20 = vrot.slane %v657_v53, 1 }
 0x18f   : > { %v3948_v1 = vld [vmem:[#allocation2 + $0x114] sm:$0xf0]  ;;  %v5682_v54 = vor.u32 %v4581_v40, %v3858_v38 }
 0x190   : > { %v799_v24 = vsel %vm707_vm0, 0.0, %v741_v34  ;;  %922 = vst [vmem:[#allocation2 + $0x124] sm:$0xf] %v890_v36  ;;  %v5666_v5 = vor.u32 %v4603_v23, %v3948_v1 }
 0x191   : > { %v826_v0 = vpack.c.bf16 %v799_v24, %v799_v24  ;;  %v612_v6 = vpop.f32.mrf.mxu0 }
 0x192   : > { %v613_v8 = vadd.f32 %v5615_v62, %v612_v6  ;;  %v1676_v9 = vpop.f32.mrf.mxu1  ;;  %1804 = vmatmul.bf16.gmra.mxu2 %v5666_v5  ;;  %v4604_v13 = vld [vmem:[#allocation2 + $0x110] sm:$0xf0] }
 0x193   : > { %858 = vst [vmem:[#allocation2 + $0x120] sm:$0xf] %v826_v0  ;;  %v5670_v17 = vor.u32 %v4604_v13, %v3946_v10 }
 0x194   : > { %v658_v41 = vmax.f32 %v613_v8, 0.0 }
 0x195   : > { %1715 = vmatmul.bf16.gmra.mxu1 %v5670_v17  ;;  %v1765_v21 = vpop.f32.mrf.mxu2 }
 0x196   : > { %v742_v28 = vrot.slane %v658_v41, 7  ;;  %v891_v30 = vpack.c.bf16 %v658_v41, %v658_v41  ;;  %v967_v62 = vrot.slane %v658_v41, 1  ;;  %v5673_v33 = vadd.f32 %v1765_v21, %v1676_v9  ;;  %v5675_v37 = vpop.f32.mrf.mxu3  ;;  %v4584_v41 = vld [vmem:[#allocation2 + $0x70] sm:$0xf0] }
 0x197   : > { %v4606_v1 = vld [vmem:[#allocation2 + $0x124] sm:$0xf]  ;;  %v5704_v21 = vor.u32 %v4584_v41, %v3870_v19 }
 0x198   : > { %v743_v32 = vsel %vm707_vm0, %v741_v34, %v742_v28  ;;  %923 = vst [vmem:[#allocation2 + $0x130] sm:$0xf] %v891_v30  ;;  %v968_v43 = vsel %vm932_vm1, %v966_v20, %v967_v62  ;;  %v1024_v15 = vsel %vm932_vm1, %v967_v62, 0.0  ;;  %v4122_v30 = vld [vmem:[#allocation2 + $0x8] sm:$0xf] }
 0x199   : > { %v827_v48 = vpack.c.bf16 %v743_v32, %v743_v32  ;;  %v1051_v50 = vpack.c.bf16 %v968_v43, %v968_v43  ;;  %v1052_v51 = vpack.c.bf16 %v1024_v15, %v1024_v15  ;;  %v5680_v53 = vpop.f32.mrf.mxu0  ;;  %v4572_v62 = vld [vmem:[#allocation2 + $0x10] sm:$0xf0]  ;;  %v4570_v43 = vld [vmem:[#allocation2 + $0x4] sm:$0xf]  ;;  %v4116_v15 = vld [vmem:[#allocation2 + $0xc] sm:$0xf0] }
 0x19a   : > { %v1678_v36 = vpop.f32.mrf.mxu1  ;;  %v3958_v8 = vld [vmem:[#allocation2 + $0x120] sm:$0xf]  ;;  %v4123_v32 = vor.u32 %v4572_v62, %v4122_v30 }
 0x19b   : > { %859 = vst [vmem:[#allocation2 + $0x12c] sm:$0xf] %v827_v48  ;;  %1853 = vmatmul.bf16.gmra.mxu3 %v5682_v54  ;;  %v4723_v48 = vld [vmem:[#allocation8 + $0x1b0] sm:$0xff] }
 0x19c   : > { %1083 = vst [vmem:[#allocation2 + $0x128] sm:$0xf] %v1051_v50  ;;  %2132 = vmatmul.bf16.gmra.mxu0 %v5606_v44  ;;  %2864 = vmatpush.bf16.msra.mxu3 %v4723_v48 }
 0x19d   : > { %1084 = vst [vmem:[#allocation2 + $0x134] sm:$0xf] %v1052_v51  ;;  %v1767_v34 = vpop.f32.mrf.mxu2  ;;  %v4119_v51 = vor.u32 %v4570_v43, %v4116_v15 }
 0x19e   : > { %v5686_v61 = vadd.f32 %v1767_v34, %v1678_v36  ;;  %v5688_v23 = vpop.f32.mrf.mxu3  ;;  %v4731_v34 = vld [vmem:[#allocation8 + $0x1f0] sm:$0xff] }
 0x19f   : > { %v3960_v4 = vld [vmem:[#allocation2 + $0x12c] sm:$0xf0]  ;;  %2953 = vmatpush.bf16.msra.mxu0 %v4731_v34 }
 0x1a0   : > { %v5690_v24 = vor.u32 %v4606_v1, %v3960_v4 }
 0x1a1   : > { %v5692_v0 = vpop.f32.mrf.mxu0 }
 0x1a2   : > { %v1681_v6 = vpop.f32.mrf.mxu1  ;;  %1809 = vmatmul.bf16.gmra.mxu2 %v5690_v24  ;;  %v4607_v9 = vld [vmem:[#allocation2 + $0x128] sm:$0xf0] }
 0x1a3   : > { %v5695_v10 = vor.u32 %v4607_v9, %v3958_v8  ;;  %v4587_v8 = vld [vmem:[#allocation2 + $0x88] sm:$0xf0]  ;;  %v4739_v9 = vld [vmem:[#allocation8 + $0x230] sm:$0xff] }
 0x1a4   : > { %3042 = vmatpush.bf16.msra.mxu1 %v4739_v9  ;;  %v4722_v9 = vld [vmem:[#allocation8 + $0x1a8] sm:$0xff] }
 0x1a5   : > { %1720 = vmatmul.bf16.gmra.mxu1 %v5695_v10  ;;  %v1770_v44 = vpop.f32.mrf.mxu2  ;;  %2865 = vmatpush.bf16.msra.mxu3 %v4722_v9 }
 0x1a6   : > { %v5698_v13 = vadd.f32 %v1770_v44, %v1681_v6  ;;  %v5700_v18 = vpop.f32.mrf.mxu3  ;;  %v3882_v6 = vld [vmem:[#allocation2 + $0x80] sm:$0xf] }
 0x1a7   : > { %v5720_v19 = vor.u32 %v4587_v8, %v3882_v6 }
 0x1a9   : > { %v5702_v20 = vpop.f32.mrf.mxu0 }
 0x1aa   : > { %v1683_v28 = vpop.f32.mrf.mxu1 }
 0x1ab   : > { %1858 = vmatmul.bf16.gmra.mxu3 %v5704_v21 }
 0x1ac   : > { %2137 = vmatmul.bf16.gmra.mxu0 %v5624_v31 }
 0x1ad   : > { %v1772_v38 = vpop.f32.mrf.mxu2 }
 0x1ae   : > { %v5708_v40 = vadd.f32 %v1772_v38, %v1683_v28  ;;  %v5710_v42 = vpop.f32.mrf.mxu3 }
 0x1b1   : > { %v5712_v50 = vpop.f32.mrf.mxu0 }
 0x1b2   : > { %v1686_v36 = vpop.f32.mrf.mxu1  ;;  %2270 = vmatmul.bf16.vlgmr.msrb.gmra.mxu2 %v4123_v32 }
 0x1b5   : > { %v1775_v1 = vpop.f32.mrf.mxu2  ;;  %2181 = vmatmul.bf16.vlgmr.msrb.gmra.mxu1 %v4119_v51 }
 0x1b6   : > { %v5714_v31 = vadd.f32 %v1775_v1, %v1686_v36  ;;  %v5716_v4 = vpop.f32.mrf.mxu3  ;;  %v3894_v36 = vld [vmem:[#allocation2 + $0x98] sm:$0xf] }
 0x1b9   : > { %v5718_v44 = vpop.f32.mrf.mxu0 }
 0x1ba   : > { %v1688_v41 = vpop.f32.mrf.mxu1 }
 0x1bb   : > { %1863 = vmatmul.bf16.gmra.mxu3 %v5720_v19 }
 0x1bc   : > { %2142 = vmatmul.bf16.gmra.mxu0 %v5646_v11  ;;  %v4590_v11 = vld [vmem:[#allocation2 + $0xa0] sm:$0xf0] }
 0x1bd   : > { %v1777_v28 = vpop.f32.mrf.mxu2 }
 0x1be   : > { %v5724_v30 = vadd.f32 %v1777_v28, %v1688_v41  ;;  %v1815_v62 = vpop.f32.mrf.mxu3 }
 0x1bf   : > { %v5727_v38 = vadd.f32 %v1815_v62, %v5639_v59  ;;  %v5740_v59 = vor.u32 %v4590_v11, %v3894_v36  ;;  %v4730_v62 = vld [vmem:[#allocation8 + $0x1e8] sm:$0xff] }
 0x1c0   : > { %2954 = vmatpush.bf16.msra.mxu0 %v4730_v62  ;;  %v4593_v36 = vld [vmem:[#allocation2 + $0xb8] sm:$0xf0] }
 0x1c1   : > { %6428 = vst [vmem:[#allocation16_spill] sm:$0xff] %v5727_v38  ;;  %v5729_v32 = vpop.f32.mrf.mxu0  ;;  %v4738_v11 = vld [vmem:[#allocation8 + $0x228] sm:$0xff] }
 0x1c2   : > { %v1691_v43 = vpop.f32.mrf.mxu1  ;;  %2275 = vmatmul.bf16.gmra.mxu2 %v5632_v49  ;;  %3043 = vmatpush.bf16.msra.mxu1 %v4738_v11 }
 0x1c5   : > { %v1780_v15 = vpop.f32.mrf.mxu2  ;;  %2186 = vmatmul.bf16.gmra.mxu1 %v5467_v29 }
 0x1c6   : > { %v5733_v48 = vadd.f32 %v1780_v15, %v1691_v43  ;;  %v1817_v51 = vpop.f32.mrf.mxu3 }
 0x1c7   : > { %v5736_v34 = vadd.f32 %v1817_v51, %v5651_v27  ;;  %v3906_v51 = vld [vmem:[#allocation2 + $0xb0] sm:$0xf] }
 0x1c9   : > { %6429 = vst [vmem:[#allocation17_spill] sm:$0xff] %v5736_v34  ;;  %v5738_v1 = vpop.f32.mrf.mxu0 }
 0x1ca   : > { %v1693_v6 = vpop.f32.mrf.mxu1 }
 0x1cb   : > { %1868 = vmatmul.bf16.gmra.mxu3 %v5740_v59 }
 0x1cc   : > { %2147 = vmatmul.bf16.gmra.mxu0 %v5670_v17 }
 0x1cd   : > { %v1782_v49 = vpop.f32.mrf.mxu2 }
 0x1ce   : > { %v5744_v8 = vadd.f32 %v1782_v49, %v1693_v6  ;;  %v1820_v29 = vpop.f32.mrf.mxu3  ;;  %v5758_v6 = vor.u32 %v4593_v36, %v3906_v51  ;;  %v3918_v36 = vld [vmem:[#allocation2 + $0xc8] sm:$0xf] }
 0x1cf   : > { %v5747_v41 = vadd.f32 %v1820_v29, %v5663_v60 }
 0x1d1   : > { %6430 = vst [vmem:[#allocation18_spill] sm:$0xff] %v5747_v41  ;;  %v5749_v27 = vpop.f32.mrf.mxu0 }
 0x1d2   : > { %v1696_v28 = vpop.f32.mrf.mxu1  ;;  %2280 = vmatmul.bf16.gmra.mxu2 %v5656_v45 }
 0x1d5   : > { %v1785_v43 = vpop.f32.mrf.mxu2  ;;  %2191 = vmatmul.bf16.gmra.mxu1 %v5492_v22 }
 0x1d6   : > { %v5753_v17 = vadd.f32 %v1785_v43, %v1696_v28  ;;  %v1822_v15 = vpop.f32.mrf.mxu3 }
 0x1d7   : > { %v5756_v60 = vadd.f32 %v1822_v15, %v5675_v37 }
 0x1d9   : > { %6431 = vst [vmem:[#allocation19_spill] sm:$0xff] %v5756_v60  ;;  %v5760_v49 = vpop.f32.mrf.mxu0  ;;  %v4737_v60 = vld [vmem:[#allocation8 + $0x220] sm:$0xff] }
 0x1da   : > { %v1698_v45 = vpop.f32.mrf.mxu1  ;;  %3044 = vmatpush.bf16.msra.mxu1 %v4737_v60 }
 0x1db   : > { %1873 = vmatmul.bf16.gmra.mxu3 %v5758_v6 }
 0x1dc   : > { %2152 = vmatmul.bf16.gmra.mxu0 %v5695_v10  ;;  %v4596_v10 = vld [vmem:[#allocation2 + $0xd0] sm:$0xf0] }
 0x1dd   : > { %v1787_v22 = vpop.f32.mrf.mxu2 }
 0x1de   : > { %v5764_v29 = vadd.f32 %v1787_v22, %v1698_v45  ;;  %v1825_v9 = vpop.f32.mrf.mxu3  ;;  %v5778_v45 = vor.u32 %v4596_v10, %v3918_v36 }
 0x1df   : > { %v5767_v28 = vadd.f32 %v1825_v9, %v5688_v23  ;;  %v4729_v23 = vld [vmem:[#allocation8 + $0x1e0] sm:$0xff] }
 0x1e0   : > { %2955 = vmatpush.bf16.msra.mxu0 %v4729_v23 }
 0x1e1   : > { %6432 = vst [vmem:[#allocation20_spill] sm:$0xff] %v5767_v28  ;;  %v5770_v37 = vpop.f32.mrf.mxu0  ;;  %v4728_v28 = vld [vmem:[#allocation8 + $0x1d8] sm:$0xff] }
 0x1e2   : > { %v1701_v62 = vpop.f32.mrf.mxu1  ;;  %2285 = vmatmul.bf16.gmra.mxu2 %v5682_v54 }
 0x1e4   : > { %2956 = vmatpush.bf16.msra.mxu0 %v4728_v28 }
 0x1e5   : > { %v1790_v43 = vpop.f32.mrf.mxu2  ;;  %2196 = vmatmul.bf16.gmra.mxu1 %v5518_v14 }
 0x1e6   : > { %v5773_v15 = vadd.f32 %v1790_v43, %v1701_v62  ;;  %v1827_v51 = vpop.f32.mrf.mxu3  ;;  %v4721_v43 = vld [vmem:[#allocation8 + $0x1a0] sm:$0xff] }
 0x1e7   : > { %v5776_v11 = vadd.f32 %v1827_v51, %v5700_v18  ;;  %2866 = vmatpush.bf16.msra.mxu3 %v4721_v43  ;;  %v4727_v51 = vld [vmem:[#allocation8 + $0x1d0] sm:$0xff] }
 0x1e8   : > { %2957 = vmatpush.bf16.msra.mxu0 %v4727_v51 }
 0x1e9   : > { %6433 = vst [vmem:[#allocation21_spill] sm:$0xff] %v5776_v11  ;;  %v5782_v9 = vpop.f32.mrf.mxu0  ;;  %v4726_v11 = vld [vmem:[#allocation8 + $0x1c8] sm:$0xff] }
 0x1ea   : > { %v1703_v22 = vpop.f32.mrf.mxu1 }
 0x1eb   : > { %1878 = vmatmul.bf16.gmra.mxu3 %v5778_v45 }
 0x1ec   : > { %2157 = vmatmul.bf16.gmra.mxu0 %v5482_v63  ;;  %v3930_v63 = vld [vmem:[#allocation2 + $0xe0] sm:$0xf] }
 0x1ed   : > { %v1792_v54 = vpop.f32.mrf.mxu2  ;;  %2958 = vmatpush.bf16.msra.mxu0 %v4726_v11 }
 0x1ee   : > { %v5784_v14 = vadd.f32 %v1792_v54, %v1703_v22  ;;  %v1830_v62 = vpop.f32.mrf.mxu3  ;;  %v4599_v54 = vld [vmem:[#allocation2 + $0xe8] sm:$0xf0] }
 0x1ef   : > { %v5787_v18 = vadd.f32 %v1830_v62, %v5710_v42  ;;  %v5798_v28 = vor.u32 %v4599_v54, %v3930_v63  ;;  %v4602_v54 = vld [vmem:[#allocation2 + $0x100] sm:$0xf0] }
 0x1f1   : > { %6434 = vst [vmem:[#allocation22_spill] sm:$0xff] %v5787_v18  ;;  %v5796_v62 = vpop.f32.mrf.mxu0 }
 0x1f2   : > { %v1706_v36 = vpop.f32.mrf.mxu1  ;;  %2290 = vmatmul.bf16.gmra.mxu2 %v5704_v21  ;;  %v4725_v21 = vld [vmem:[#allocation8 + $0x1c0] sm:$0xff] }
 0x1f3   : > { %2959 = vmatpush.bf16.msra.mxu0 %v4725_v21 }
 0x1f5   : > { %v1795_v10 = vpop.f32.mrf.mxu2  ;;  %2201 = vmatmul.bf16.gmra.mxu1 %v5541_v7 }
 0x1f6   : > { %v5791_v23 = vadd.f32 %v1795_v10, %v1706_v36  ;;  %v1832_v22 = vpop.f32.mrf.mxu3 }
 0x1f7   : > { %v5794_v42 = vadd.f32 %v1832_v22, %v5716_v4 }
 0x1f9   : > { %6435 = vst [vmem:[#allocation23_spill] sm:$0xff] %v5794_v42  ;;  %v5807_v10 = vpop.f32.mrf.mxu0  ;;  %v3954_v42 = vld [vmem:[#allocation2 + $0x110] sm:$0xf] }
 0x1fa   : > { %v1708_v43 = vpop.f32.mrf.mxu1 }
 0x1fb   : > { %1883 = vmatmul.bf16.gmra.mxu3 %v5798_v28 }
 0x1fc   : > { %2162 = vmatmul.bf16.gmra.mxu0 %v5507_v55  ;;  %v3942_v55 = vld [vmem:[#allocation2 + $0xf8] sm:$0xf] }
 0x1fd   : > { %v1797_v7 = vpop.f32.mrf.mxu2 }
 0x1fe   : > { %v5802_v51 = vadd.f32 %v1797_v7, %v1708_v43  ;;  %v1844_v36 = vpop.f32.mrf.mxu3  ;;  %v5816_v43 = vor.u32 %v4602_v54, %v3942_v55 }
 0x1ff   : > { %v5805_v4 = vadd.f32 %v1844_v36, %v5627_v35 }
 0x201   : > { %v5819_v7 = vpop.f32.mrf.mxu0 }
 0x202   : > { %v1711_v11 = vpop.f32.mrf.mxu1  ;;  %2295 = vmatmul.bf16.gmra.mxu2 %v5720_v19 }
 0x205   : > { %v1800_v60 = vpop.f32.mrf.mxu2  ;;  %2206 = vmatmul.bf16.gmra.mxu1 %v5554_v46 }
 0x206   : > { %v5811_v63 = vadd.f32 %v1800_v60, %v1711_v11  ;;  %v1846_v22 = vpop.f32.mrf.mxu3  ;;  %v4720_v11 = vld [vmem:[#allocation8 + $0x198] sm:$0xff] }
 0x207   : > { %v5814_v21 = vadd.f32 %v1846_v22, %v5637_v58  ;;  %2867 = vmatpush.bf16.msra.mxu3 %v4720_v11  ;;  %v4669_v11 = vld [vmem:[#allocation2 + $0x34] sm:$0xf] }
 0x209   : > { %v5829_v55 = vpop.f32.mrf.mxu0 }
 0x20a   : > { %v1713_v35 = vpop.f32.mrf.mxu1 }
 0x20b   : > { %1888 = vmatmul.bf16.gmra.mxu3 %v5816_v43 }
 0x20c   : > { %2167 = vmatmul.bf16.gmra.mxu0 %v5532_v52 }
 0x20d   : > { %v1802_v19 = vpop.f32.mrf.mxu2 }
 0x20e   : > { %v5822_v36 = vadd.f32 %v1802_v19, %v1713_v35  ;;  %v1849_v46 = vpop.f32.mrf.mxu3  ;;  %v4605_v35 = vld [vmem:[#allocation2 + $0x118] sm:$0xf0]  ;;  %v4736_v19 = vld [vmem:[#allocation8 + $0x218] sm:$0xff] }
 0x20f   : > { %v5825_v60 = vadd.f32 %v1849_v46, %v5649_v26  ;;  %v4224_v26 = vld [vmem:[#allocation2 + $0x3c] sm:$0xf0]  ;;  %3045 = vmatpush.bf16.msra.mxu1 %v4736_v19  ;;  %v5836_v46 = vor.u32 %v4605_v35, %v3954_v42  ;;  %v3966_v19 = vld [vmem:[#allocation2 + $0x128] sm:$0xf] }
 0x210   : > { %v4227_v41 = vor.u32 %v4669_v11, %v4224_v26  ;;  %v4748_v26 = vld [vmem:[#allocation9 + $0x38] sm:$0xff] }
 0x211   : > { %v5844_v38 = vpop.f32.mrf.mxu0  ;;  %3314 = vmatpush.bf16.msra.mxu2 %v4748_v26 }
 0x212   : > { %v1716_v58 = vpop.f32.mrf.mxu1  ;;  %2300 = vmatmul.bf16.gmra.mxu2 %v5740_v59  ;;  %6436 = vst [vmem:[#allocation24_spill] sm:$0xff] %v5844_v38 }
 0x215   : > { %v1805_v22 = vpop.f32.mrf.mxu2  ;;  %2211 = vmatmul.bf16.gmra.mxu1 %v5570_v16 }
 0x216   : > { %v5831_v54 = vadd.f32 %v1805_v22, %v1716_v58  ;;  %v1851_v52 = vpop.f32.mrf.mxu3 }
 0x217   : > { %v5834_v18 = vadd.f32 %v1851_v52, %v5661_v56 }
 0x21a   : > { %v1718_v59 = vpop.f32.mrf.mxu1 }
 0x21b   : > { %1893 = vmatmul.bf16.gmra.mxu3 %v5836_v46 }
 0x21c   : > { %2960 = vmatmul.bf16.vlgmr.msra.gmra.mxu0 %v4227_v41  ;;  %v4608_v41 = vld [vmem:[#allocation2 + $0x130] sm:$0xf0] }
 0x21d   : > { %v1807_v16 = vpop.f32.mrf.mxu2 }
 0x21e   : > { %v5839_v58 = vadd.f32 %v1807_v16, %v1718_v59  ;;  %v1854_v22 = vpop.f32.mrf.mxu3  ;;  %v4236_v59 = vld [vmem:[#allocation2 + $0x54] sm:$0xf0]  ;;  %v4672_v16 = vld [vmem:[#allocation2 + $0x4c] sm:$0xf] }
 0x21f   : > { %v5842_v34 = vadd.f32 %v1854_v22, %v5673_v33  ;;  %v5853_v33 = vor.u32 %v4608_v41, %v3966_v19  ;;  %v5855_v22 = vpop.f32.mrf.mxu0  ;;  %v4239_v38 = vor.u32 %v4672_v16, %v4236_v59 }
 0x222   : > { %v1721_v56 = vpop.f32.mrf.mxu1  ;;  %2305 = vmatmul.bf16.gmra.mxu2 %v5758_v6 }
 0x225   : > { %v1810_v42 = vpop.f32.mrf.mxu2  ;;  %2216 = vmatmul.bf16.gmra.mxu1 %v5586_v57 }
 0x226   : > { %v5848_v52 = vadd.f32 %v1810_v42, %v1721_v56  ;;  %v1856_v35 = vpop.f32.mrf.mxu3 }
 0x227   : > { %v5851_v11 = vadd.f32 %v1856_v35, %v5686_v61  ;;  %v2094_v35 = vadd.f32 %v5680_v53, %v5805_v4  ;;  %v5866_v26 = vpop.f32.mrf.mxu0  ;;  %v2096_v53 = vadd.f32 %v5692_v0, %v5814_v21  ;;  %v4675_v4 = vld [vmem:[#allocation2 + $0x64] sm:$0xf]  ;;  %v2099_v0 = vadd.f32 %v5702_v20, %v5825_v60 }
 0x228   : > { %6437 = vst [vmem:[#allocation25_spill] sm:$0xff] %v5848_v52  ;;  %v4719_v52 = vld [vmem:[#allocation8 + $0x190] sm:$0xff]  ;;  %v2101_v20 = vadd.f32 %v5712_v50, %v5834_v18  ;;  %v2104_v50 = vadd.f32 %v5718_v44, %v5842_v34  ;;  %v4717_v44 = vld [vmem:[#allocation8 + $0x180] sm:$0xff] }
 0x229   : > { %2868 = vmatpush.bf16.msra.mxu3 %v4719_v52  ;;  %v2106_v34 = vadd.f32 %v5729_v32, %v5851_v11 }
 0x22a   : > { %v1723_v6 = vpop.f32.mrf.mxu1 }
 0x22b   : > { %1898 = vmatmul.bf16.gmra.mxu3 %v5853_v33 }
 0x22c   : > { %2965 = vmatmul.bf16.gmra.mxu0 %v4239_v38 }
 0x22d   : > { %v1812_v57 = vpop.f32.mrf.mxu2 }
 0x22e   : > { %v5858_v56 = vadd.f32 %v1812_v57, %v1723_v6  ;;  %v1859_v42 = vpop.f32.mrf.mxu3  ;;  %v3978_v6 = vld [vmem:[#allocation2 + $0x140] sm:$0xf]  ;;  %v4611_v57 = vld [vmem:[#allocation2 + $0x148] sm:$0xf0] }
 0x22f   : > { %v5861_v61 = vadd.f32 %v1859_v42, %v5698_v13  ;;  %v4735_v13 = vld [vmem:[#allocation8 + $0x210] sm:$0xff]  ;;  %v4248_v42 = vld [vmem:[#allocation2 + $0x6c] sm:$0xf0] }
 0x230   : > { %3046 = vmatpush.bf16.msra.mxu1 %v4735_v13 }
 0x231   : > { %v2109_v32 = vadd.f32 %v5738_v1, %v5861_v61  ;;  %v4684_v61 = vld [vmem:[#allocation2 + $0xac] sm:$0xf] }
 0x232   : > { %v2182_v19 = vpop.f32.mrf.mxu1  ;;  %2310 = vmatmul.bf16.gmra.mxu2 %v5778_v45  ;;  %v5876_v45 = vor.u32 %v4611_v57, %v3978_v6 }
 0x233   : > { %v2183_v41 = vadd.f32 %v2182_v19, %v2094_v35 }
 0x235   : > { %2221 = vmatmul.bf16.gmra.mxu1 %v5602_v39  ;;  %v2271_v38 = vpop.f32.mrf.mxu2  ;;  %v4251_v39 = vor.u32 %v4675_v4, %v4248_v42  ;;  %v4614_v4 = vld [vmem:[#allocation2 + $0x160] sm:$0xf0] }
 0x236   : > { %v5869_v59 = vadd.f32 %v2271_v38, %v2183_v41  ;;  %v1861_v16 = vpop.f32.mrf.mxu3  ;;  %v5879_v38 = vpop.f32.mrf.mxu0 }
 0x237   : > { %v5872_v52 = vadd.f32 %v1861_v16, %v5708_v40 }
 0x238   : > { %6438 = vst [vmem:[#allocation26_spill] sm:$0xff] %v5869_v59 }
 0x239   : > { %v2111_v1 = vadd.f32 %v5749_v27, %v5872_v52 }
 0x23a   : > { %v2184_v35 = vpop.f32.mrf.mxu1 }
 0x23b   : > { %v2185_v19 = vadd.f32 %v2184_v35, %v2096_v53  ;;  %1903 = vmatmul.bf16.gmra.mxu3 %v5876_v45  ;;  %v3990_v53 = vld [vmem:[#allocation2 + $0x158] sm:$0xf]  ;;  %v4747_v35 = vld [vmem:[#allocation9 + $0x30] sm:$0xff] }
 0x23c   : > { %2970 = vmatmul.bf16.gmra.mxu0 %v4251_v39  ;;  %3315 = vmatpush.bf16.msra.mxu2 %v4747_v35 }
 0x23d   : > { %v2273_v41 = vpop.f32.mrf.mxu2 }
 0x23e   : > { %v5881_v59 = vadd.f32 %v2273_v41, %v2185_v19  ;;  %v1864_v40 = vpop.f32.mrf.mxu3  ;;  %v5895_v19 = vpop.f32.mrf.mxu0 }
 0x23f   : > { %v5884_v16 = vadd.f32 %v1864_v40, %v5714_v31  ;;  %v4260_v31 = vld [vmem:[#allocation2 + $0x84] sm:$0xf0] }
 0x242   : > { %v2187_v21 = vpop.f32.mrf.mxu1  ;;  %2315 = vmatmul.bf16.gmra.mxu2 %v5798_v28  ;;  %v5899_v28 = vor.u32 %v4614_v4, %v3990_v53 }
 0x243   : > { %v2188_v6 = vadd.f32 %v2187_v21, %v2099_v0 }
 0x245   : > { %2226 = vmatmul.bf16.gmra.mxu1 %v5620_v12  ;;  %v2276_v57 = vpop.f32.mrf.mxu2  ;;  %v4678_v12 = vld [vmem:[#allocation2 + $0x7c] sm:$0xf] }
 0x246   : > { %v5890_v13 = vadd.f32 %v2276_v57, %v2188_v6  ;;  %v1866_v42 = vpop.f32.mrf.mxu3  ;;  %v4263_v41 = vor.u32 %v4678_v12, %v4260_v31  ;;  %v4718_v6 = vld [vmem:[#allocation8 + $0x188] sm:$0xff]  ;;  %v5909_v18 = vpop.f32.mrf.mxu0 }
 0x247   : > { %v5893_v39 = vadd.f32 %v1866_v42, %v5724_v30  ;;  %2869 = vmatpush.bf16.msra.mxu3 %v4718_v6  ;;  %v4617_v12 = vld [vmem:[#allocation2 + $0x178] sm:$0xf0] }
 0x24a   : > { %v2189_v60 = vpop.f32.mrf.mxu1 }
 0x24b   : > { %v2190_v40 = vadd.f32 %v2189_v60, %v2101_v20  ;;  %1908 = vmatmul.bf16.gmra.mxu3 %v5899_v28  ;;  %v4002_v20 = vld [vmem:[#allocation2 + $0x170] sm:$0xf] }
 0x24c   : > { %2975 = vmatmul.bf16.gmra.mxu0 %v4263_v41  ;;  %v4272_v41 = vld [vmem:[#allocation2 + $0x9c] sm:$0xf0]  ;;  %2870 = vmatpush.bf16.msra.mxu3 %v4717_v44  ;;  %v4644_v44 = vld [vmem:[#allocation2 + $0x190] sm:$0xf0] }
 0x24d   : > { %v2278_v0 = vpop.f32.mrf.mxu2 }
 0x24e   : > { %v5902_v21 = vadd.f32 %v2278_v0, %v2190_v40  ;;  %v1869_v30 = vpop.f32.mrf.mxu3  ;;  %v4681_v40 = vld [vmem:[#allocation2 + $0x94] sm:$0xf]  ;;  %v5923_v6 = vpop.f32.mrf.mxu0 }
 0x24f   : > { %v5905_v57 = vadd.f32 %v1869_v30, %v5733_v48  ;;  %v4734_v48 = vld [vmem:[#allocation8 + $0x208] sm:$0xff]  ;;  %v4275_v0 = vor.u32 %v4681_v40, %v4272_v41  ;;  %v4014_v41 = vld [vmem:[#allocation2 + $0x188] sm:$0xf] }
 0x250   : > { %3047 = vmatpush.bf16.msra.mxu1 %v4734_v48  ;;  %v4284_v40 = vld [vmem:[#allocation2 + $0xb4] sm:$0xf0] }
 0x252   : > { %v2192_v42 = vpop.f32.mrf.mxu1  ;;  %2320 = vmatmul.bf16.gmra.mxu2 %v5816_v43  ;;  %v5920_v43 = vor.u32 %v4617_v12, %v4002_v20 }
 0x253   : > { %v2193_v53 = vadd.f32 %v2192_v42, %v2104_v50 }
 0x255   : > { %2231 = vmatmul.bf16.gmra.mxu1 %v5642_v2  ;;  %v2281_v4 = vpop.f32.mrf.mxu2 }
 0x256   : > { %v5913_v35 = vadd.f32 %v2281_v4, %v2193_v53  ;;  %v1871_v31 = vpop.f32.mrf.mxu3  ;;  %v5934_v20 = vpop.f32.mrf.mxu0 }
 0x257   : > { %v5916_v60 = vadd.f32 %v1871_v31, %v5744_v8 }
 0x25a   : > { %v2194_v2 = vpop.f32.mrf.mxu1 }
 0x25b   : > { %v2195_v30 = vadd.f32 %v2194_v2, %v2106_v34  ;;  %1913 = vmatmul.bf16.gmra.mxu3 %v5920_v43  ;;  %v4746_v34 = vld [vmem:[#allocation9 + $0x28] sm:$0xff]  ;;  %v4287_v2 = vor.u32 %v4684_v61, %v4284_v40  ;;  %v4222_v40 = vld [vmem:[#allocation2 + $0x30] sm:$0xf] }
 0x25c   : > { %2980 = vmatmul.bf16.gmra.mxu0 %v4275_v0  ;;  %3316 = vmatpush.bf16.msra.mxu2 %v4746_v34  ;;  %v4296_v34 = vld [vmem:[#allocation2 + $0xcc] sm:$0xf0] }
 0x25d   : > { %v2283_v8 = vpop.f32.mrf.mxu2 }
 0x25e   : > { %v5925_v50 = vadd.f32 %v2283_v8, %v2195_v30  ;;  %v1874_v42 = vpop.f32.mrf.mxu3 }
 0x25f   : > { %v5928_v53 = vadd.f32 %v1874_v42, %v5753_v17 }
 0x262   : > { %v2197_v11 = vpop.f32.mrf.mxu1  ;;  %2325 = vmatmul.bf16.gmra.mxu2 %v5836_v46  ;;  %v4015_v46 = vor.u32 %v4644_v44, %v4014_v41  ;;  %v4670_v41 = vld [vmem:[#allocation2 + $0x38] sm:$0xf0]  ;;  %v4733_v44 = vld [vmem:[#allocation8 + $0x200] sm:$0xff] }
 0x263   : > { %v2198_v4 = vadd.f32 %v2197_v11, %v2109_v32  ;;  %v2114_v11 = vadd.f32 %v5760_v49, %v5884_v16  ;;  %3048 = vmatpush.bf16.msra.mxu1 %v4733_v44  ;;  %v2116_v49 = vadd.f32 %v5770_v37, %v5893_v39  ;;  %v4223_v16 = vor.u32 %v4670_v41, %v4222_v40  ;;  %v4234_v41 = vld [vmem:[#allocation2 + $0x48] sm:$0xf] }
 0x265   : > { %2236 = vmatmul.bf16.gmra.mxu1 %v5666_v5  ;;  %v2286_v31 = vpop.f32.mrf.mxu2 }
 0x266   : > { %v5936_v12 = vadd.f32 %v2286_v31, %v2198_v4  ;;  %v1876_v48 = vpop.f32.mrf.mxu3 }
 0x267   : > { %v5939_v17 = vadd.f32 %v1876_v48, %v5764_v29  ;;  %v5948_v29 = vpop.f32.mrf.mxu0 }
 0x26a   : > { %v2199_v5 = vpop.f32.mrf.mxu1 }
 0x26b   : > { %v2200_v0 = vadd.f32 %v2199_v5, %v2111_v1  ;;  %1918 = vmatmul.bf16.gmra.mxu3 %v4015_v46 }
 0x26c   : > { %2985 = vmatmul.bf16.gmra.mxu0 %v4287_v2 }
 0x26d   : > { %v2288_v30 = vpop.f32.mrf.mxu2 }
 0x26e   : > { %v5943_v8 = vadd.f32 %v2288_v30, %v2200_v0  ;;  %v1879_v42 = vpop.f32.mrf.mxu3  ;;  %v2119_v0 = vadd.f32 %v5782_v9, %v5905_v57  ;;  %v2121_v9 = vadd.f32 %v5796_v62, %v5916_v60  ;;  %v4690_v57 = vld [vmem:[#allocation2 + $0xdc] sm:$0xf] }
 0x26f   : > { %v5946_v32 = vadd.f32 %v1879_v42, %v5773_v15  ;;  %v5961_v1 = vpop.f32.mrf.mxu0 }
 0x272   : > { %v2202_v27 = vpop.f32.mrf.mxu1  ;;  %2330 = vmatmul.bf16.gmra.mxu2 %v5853_v33  ;;  %v4687_v33 = vld [vmem:[#allocation2 + $0xc4] sm:$0xf] }
 0x273   : > { %v2203_v52 = vadd.f32 %v2202_v27, %v2114_v11  ;;  %v4299_v46 = vor.u32 %v4687_v33, %v4296_v34  ;;  %v2124_v33 = vadd.f32 %v5807_v10, %v5928_v53  ;;  %v2126_v10 = vadd.f32 %v5819_v7, %v5939_v17 }
 0x275   : > { %2241 = vmatmul.bf16.gmra.mxu1 %v5690_v24  ;;  %v2291_v4 = vpop.f32.mrf.mxu2 }
 0x276   : > { %v5954_v31 = vadd.f32 %v2291_v4, %v2203_v52  ;;  %v1881_v48 = vpop.f32.mrf.mxu3  ;;  %v4673_v52 = vld [vmem:[#allocation2 + $0x50] sm:$0xf0] }
 0x277   : > { %v5957_v15 = vadd.f32 %v1881_v48, %v5784_v14  ;;  %v5973_v30 = vpop.f32.mrf.mxu0  ;;  %v4745_v4 = vld [vmem:[#allocation9 + $0x20] sm:$0xff]  ;;  %v4308_v48 = vld [vmem:[#allocation2 + $0xe4] sm:$0xf0] }
 0x278   : > { %3317 = vmatpush.bf16.msra.mxu2 %v4745_v4  ;;  %v4311_v34 = vor.u32 %v4690_v57, %v4308_v48 }
 0x27a   : > { %v2204_v24 = vpop.f32.mrf.mxu1 }
 0x27b   : > { %v5963_v61 = vadd.f32 %v2204_v24, %v2116_v49  ;;  %2871 = vmatmul.bf16.vlgmr.msra.gmra.mxu3 %v4223_v16 }
 0x27c   : > { %2990 = vmatmul.bf16.gmra.mxu0 %v4299_v46 }
 0x27d   : > { %v5965_v5 = vpop.f32.mrf.mxu2 }
 0x27e   : > { %v1884_v14 = vpop.f32.mrf.mxu3 }
 0x27f   : > { %v5968_v2 = vadd.f32 %v1884_v14, %v5791_v23  ;;  %v5987_v49 = vpop.f32.mrf.mxu0 }
 0x282   : > { %v2207_v37 = vpop.f32.mrf.mxu1  ;;  %2335 = vmatmul.bf16.gmra.mxu2 %v5876_v45  ;;  %v4235_v45 = vor.u32 %v4673_v52, %v4234_v41  ;;  %v2129_v41 = vadd.f32 %v5829_v55, %v5946_v32  ;;  %v6439_v55 = vld [vmem:[#allocation24_spill] sm:$0xff] }
 0x283   : > { %v2208_v39 = vadd.f32 %v2207_v37, %v2119_v0  ;;  %v4676_v0 = vld [vmem:[#allocation2 + $0x68] sm:$0xf0]  ;;  %v2131_v32 = vadd.f32 %v6439_v55, %v5957_v15  ;;  %v2134_v15 = vadd.f32 %v5855_v22, %v5968_v2  ;;  %v4699_v2 = vld [vmem:[#allocation2 + $0x124] sm:$0xf] }
 0x285   : > { %2246 = vmatmul.bf16.gmra.mxu1 %v5564_v3  ;;  %v2296_v42 = vpop.f32.mrf.mxu2 }
 0x286   : > { %v5976_v11 = vadd.f32 %v2296_v42, %v2208_v39  ;;  %v1886_v27 = vpop.f32.mrf.mxu3  ;;  %v4320_v39 = vld [vmem:[#allocation2 + $0xfc] sm:$0xf0] }
 0x287   : > { %v5979_v23 = vadd.f32 %v1886_v27, %v5802_v51  ;;  %v4246_v42 = vld [vmem:[#allocation2 + $0x60] sm:$0xf] }
 0x288   : > { %v4247_v53 = vor.u32 %v4676_v0, %v4246_v42  ;;  %v6440_v42 = vld [vmem:[#allocation25_spill] sm:$0xff] }
 0x28a   : > { %v2209_v44 = vpop.f32.mrf.mxu1 }
 0x28b   : > { %v5983_v3 = vadd.f32 %v2209_v44, %v2121_v9  ;;  %2876 = vmatmul.bf16.gmra.mxu3 %v4235_v45 }
 0x28c   : > { %2995 = vmatmul.bf16.gmra.mxu0 %v4311_v34  ;;  %v4679_v34 = vld [vmem:[#allocation2 + $0x80] sm:$0xf0] }
 0x28d   : > { %v5985_v40 = vpop.f32.mrf.mxu2 }
 0x28e   : > { %v1889_v51 = vpop.f32.mrf.mxu3 }
 0x28f   : > { %v5990_v16 = vadd.f32 %v1889_v51, %v5811_v63  ;;  %v6001_v63 = vpop.f32.mrf.mxu0  ;;  %v4744_v51 = vld [vmem:[#allocation9 + $0x18] sm:$0xff] }
 0x290   : > { %3318 = vmatpush.bf16.msra.mxu2 %v4744_v51  ;;  %v4344_v51 = vld [vmem:[#allocation2 + $0x12c] sm:$0xf0] }
 0x292   : > { %v2212_v62 = vpop.f32.mrf.mxu1  ;;  %2340 = vmatmul.bf16.gmra.mxu2 %v5899_v28  ;;  %v4693_v28 = vld [vmem:[#allocation2 + $0xf4] sm:$0xf] }
 0x293   : > { %v2213_v60 = vadd.f32 %v2212_v62, %v2124_v33  ;;  %v4323_v52 = vor.u32 %v4693_v28, %v4320_v39  ;;  %v4332_v33 = vld [vmem:[#allocation2 + $0x114] sm:$0xf0]  ;;  %v4671_v28 = vld [vmem:[#allocation2 + $0x40] sm:$0xf0] }
 0x294   : > { %v4258_v62 = vld [vmem:[#allocation2 + $0x78] sm:$0xf] }
 0x295   : > { %2251 = vmatmul.bf16.gmra.mxu1 %v5580_v47  ;;  %v2301_v24 = vpop.f32.mrf.mxu2 }
 0x296   : > { %v5996_v46 = vadd.f32 %v2301_v24, %v2213_v60  ;;  %v1891_v14 = vpop.f32.mrf.mxu3  ;;  %v4259_v60 = vor.u32 %v4679_v34, %v4258_v62  ;;  %v2136_v62 = vadd.f32 %v5866_v26, %v5979_v23  ;;  %v2139_v26 = vadd.f32 %v5879_v38, %v5990_v16 }
 0x297   : > { %v5999_v37 = vadd.f32 %v1891_v14, %v5822_v36  ;;  %v6014_v9 = vpop.f32.mrf.mxu0 }
 0x299   : > { %v2141_v38 = vadd.f32 %v5895_v19, %v5999_v37 }
 0x29a   : > { %v2214_v27 = vpop.f32.mrf.mxu1 }
 0x29b   : > { %v6005_v47 = vadd.f32 %v2214_v27, %v2126_v10  ;;  %2881 = vmatmul.bf16.gmra.mxu3 %v4247_v53  ;;  %v4230_v53 = vld [vmem:[#allocation2 + $0x38] sm:$0xf] }
 0x29c   : > { %3000 = vmatmul.bf16.gmra.mxu0 %v4323_v52 }
 0x29d   : > { %v6007_v4 = vpop.f32.mrf.mxu2 }
 0x29e   : > { %v1894_v48 = vpop.f32.mrf.mxu3 }
 0x29f   : > { %v6010_v36 = vadd.f32 %v1894_v48, %v5831_v54  ;;  %v6027_v0 = vpop.f32.mrf.mxu0  ;;  %v4231_v48 = vor.u32 %v4671_v28, %v4230_v53  ;;  %v4674_v53 = vld [vmem:[#allocation2 + $0x58] sm:$0xf0] }
 0x2a1   : > { %v2144_v19 = vadd.f32 %v5909_v18, %v6010_v36 }
 0x2a2   : > { %v2217_v7 = vpop.f32.mrf.mxu1  ;;  %2345 = vmatmul.bf16.gmra.mxu2 %v5920_v43  ;;  %v4696_v43 = vld [vmem:[#allocation2 + $0x10c] sm:$0xf] }
 0x2a3   : > { %v2218_v17 = vadd.f32 %v2217_v7, %v2129_v41  ;;  %v4335_v14 = vor.u32 %v4696_v43, %v4332_v33  ;;  %v4270_v33 = vld [vmem:[#allocation2 + $0x90] sm:$0xf] }
 0x2a5   : > { %2256 = vmatmul.bf16.gmra.mxu1 %v5596_v25  ;;  %v2306_v45 = vpop.f32.mrf.mxu2 }
 0x2a6   : > { %v6018_v57 = vadd.f32 %v2306_v45, %v2218_v17  ;;  %v1896_v44 = vpop.f32.mrf.mxu3 }
 0x2a7   : > { %v6021_v54 = vadd.f32 %v1896_v44, %v5839_v58  ;;  %v6036_v7 = vpop.f32.mrf.mxu0  ;;  %v4682_v44 = vld [vmem:[#allocation2 + $0x98] sm:$0xf0] }
 0x2a8   : > { %v4271_v22 = vor.u32 %v4682_v44, %v4270_v33  ;;  %v6442_v44 = vld [vmem:[#allocation17_spill] sm:$0xff] }
 0x2a9   : > { %v4702_v33 = vld [vmem:[#allocation2 + $0x13c] sm:$0xf]  ;;  %v2146_v18 = vadd.f32 %v5923_v6, %v6021_v54 }
 0x2aa   : > { %v2219_v24 = vpop.f32.mrf.mxu1 }
 0x2ab   : > { %v6025_v25 = vadd.f32 %v2219_v24, %v2131_v32  ;;  %2886 = vmatmul.bf16.gmra.mxu3 %v4259_v60  ;;  %v4347_v32 = vor.u32 %v4699_v2, %v4344_v51 }
 0x2ac   : > { %3005 = vmatmul.bf16.gmra.mxu0 %v4335_v14  ;;  %v6441_v14 = vld [vmem:[#allocation16_spill] sm:$0xff] }
 0x2ad   : > { %v6029_v39 = vpop.f32.mrf.mxu2 }
 0x2ae   : > { %v1899_v58 = vpop.f32.mrf.mxu3 }
 0x2af   : > { %v6032_v10 = vadd.f32 %v1899_v58, %v6440_v42  ;;  %v4242_v42 = vld [vmem:[#allocation2 + $0x50] sm:$0xf] }
 0x2b1   : > { %v2149_v6 = vadd.f32 %v5934_v20, %v6032_v10 }
 0x2b2   : > { %v2222_v27 = vpop.f32.mrf.mxu1 }
 0x2b3   : > { %v2223_v52 = vadd.f32 %v2222_v27, %v2134_v15  ;;  %v4243_v15 = vor.u32 %v4674_v53, %v4242_v42  ;;  %v6443_v53 = vld [vmem:[#allocation18_spill] sm:$0xff] }
 0x2b5   : > { %v2311_v41 = vpop.f32.mrf.mxu2  ;;  %3049 = vmatmul.bf16.vlgmr.msra.gmra.mxu1 %v4231_v48 }
 0x2b6   : > { %v6038_v17 = vadd.f32 %v2311_v41, %v2223_v52  ;;  %v1901_v45 = vpop.f32.mrf.mxu3  ;;  %v4685_v41 = vld [vmem:[#allocation2 + $0xb0] sm:$0xf0] }
 0x2b7   : > { %v6041_v34 = vadd.f32 %v1901_v45, %v5858_v56  ;;  %v6052_v56 = vpop.f32.mrf.mxu0  ;;  %v4743_v45 = vld [vmem:[#allocation9 + $0x10] sm:$0xff] }
 0x2b8   : > { %3319 = vmatpush.bf16.msra.mxu2 %v4743_v45 }
 0x2b9   : > { %v2151_v20 = vadd.f32 %v5948_v29, %v6041_v34 }
 0x2ba   : > { %v2224_v55 = vpop.f32.mrf.mxu1 }
 0x2bb   : > { %v6045_v60 = vadd.f32 %v2224_v55, %v2136_v62  ;;  %2891 = vmatmul.bf16.gmra.mxu3 %v4271_v22  ;;  %v4356_v62 = vld [vmem:[#allocation2 + $0x144] sm:$0xf0] }
 0x2bc   : > { %3010 = vmatmul.bf16.gmra.mxu0 %v4347_v32  ;;  %v4282_v22 = vld [vmem:[#allocation2 + $0xa8] sm:$0xf]  ;;  %v4359_v32 = vor.u32 %v4702_v33, %v4356_v62  ;;  %v4688_v33 = vld [vmem:[#allocation2 + $0xc8] sm:$0xf0] }
 0x2bd   : > { %v6047_v43 = vpop.f32.mrf.mxu2  ;;  %v4283_v16 = vor.u32 %v4685_v41, %v4282_v22  ;;  %v6444_v62 = vld [vmem:[#allocation19_spill] sm:$0xff] }
 0x2be   : > { %v1904_v24 = vpop.f32.mrf.mxu3 }
 0x2bf   : > { %v6050_v58 = vadd.f32 %v1904_v24, %v6441_v14  ;;  %v6063_v2 = vpop.f32.mrf.mxu0 }
 0x2c2   : > { %v2227_v23 = vpop.f32.mrf.mxu1 }
 0x2c3   : > { %v2228_v28 = vadd.f32 %v2227_v23, %v2139_v26  ;;  %v4254_v23 = vld [vmem:[#allocation2 + $0x68] sm:$0xf] }
 0x2c5   : > { %v2316_v27 = vpop.f32.mrf.mxu2  ;;  %3054 = vmatmul.bf16.gmra.mxu1 %v4243_v15 }
 0x2c6   : > { %v6056_v52 = vadd.f32 %v2316_v27, %v2228_v28  ;;  %v1906_v48 = vpop.f32.mrf.mxu3  ;;  %v4677_v28 = vld [vmem:[#allocation2 + $0x70] sm:$0xf0] }
 0x2c7   : > { %v6059_v51 = vadd.f32 %v1906_v48, %v6442_v44  ;;  %v4255_v27 = vor.u32 %v4677_v28, %v4254_v23  ;;  %v6074_v48 = vpop.f32.mrf.mxu0 }
 0x2ca   : > { %v2229_v55 = vpop.f32.mrf.mxu1 }
 0x2cb   : > { %v6065_v24 = vadd.f32 %v2229_v55, %v2141_v38  ;;  %2896 = vmatmul.bf16.gmra.mxu3 %v4283_v16  ;;  %v4705_v38 = vld [vmem:[#allocation2 + $0x154] sm:$0xf]  ;;  %v4368_v16 = vld [vmem:[#allocation2 + $0x15c] sm:$0xf0] }
 0x2cc   : > { %3015 = vmatmul.bf16.gmra.mxu0 %v4359_v32  ;;  %v4294_v55 = vld [vmem:[#allocation2 + $0xc0] sm:$0xf] }
 0x2cd   : > { %v6067_v14 = vpop.f32.mrf.mxu2  ;;  %v4295_v36 = vor.u32 %v4688_v33, %v4294_v55  ;;  %v4691_v55 = vld [vmem:[#allocation2 + $0xe0] sm:$0xf0] }
 0x2ce   : > { %v1909_v42 = vpop.f32.mrf.mxu3 }
 0x2cf   : > { %v6070_v26 = vadd.f32 %v1909_v42, %v6443_v53  ;;  %v4371_v42 = vor.u32 %v4705_v38, %v4368_v16  ;;  %v6087_v28 = vpop.f32.mrf.mxu0 }
 0x2d2   : > { %v2232_v37 = vpop.f32.mrf.mxu1 }
 0x2d3   : > { %v2233_v15 = vadd.f32 %v2232_v37, %v2144_v19  ;;  %v6446_v37 = vld [vmem:[#allocation20_spill] sm:$0xff] }
 0x2d5   : > { %v2321_v41 = vpop.f32.mrf.mxu2  ;;  %3059 = vmatmul.bf16.gmra.mxu1 %v4255_v27  ;;  %v4266_v27 = vld [vmem:[#allocation2 + $0x80] sm:$0xf] }
 0x2d6   : > { %v6076_v45 = vadd.f32 %v2321_v41, %v2233_v15  ;;  %v1911_v44 = vpop.f32.mrf.mxu3  ;;  %v4680_v41 = vld [vmem:[#allocation2 + $0x88] sm:$0xf0] }
 0x2d7   : > { %v6079_v22 = vadd.f32 %v1911_v44, %v6444_v62  ;;  %v4267_v33 = vor.u32 %v4680_v41, %v4266_v27 }
 0x2da   : > { %v2234_v32 = vpop.f32.mrf.mxu1 }
 0x2db   : > { %v6083_v53 = vadd.f32 %v2234_v32, %v2146_v18  ;;  %2901 = vmatmul.bf16.gmra.mxu3 %v4295_v36  ;;  %v4742_v18 = vld [vmem:[#allocation9 + $0x8] sm:$0xff] }
 0x2dc   : > { %3020 = vmatmul.bf16.gmra.mxu0 %v4371_v42  ;;  %v6448_v36 = vld [vmem:[#allocation21_spill] sm:$0xff]  ;;  %v4708_v42 = vld [vmem:[#allocation2 + $0x16c] sm:$0xf]  ;;  %3320 = vmatpush.bf16.msra.mxu2 %v4742_v18  ;;  %v2154_v18 = vadd.f32 %v5961_v1, %v6050_v58  ;;  %v2156_v1 = vadd.f32 %v5973_v30, %v6059_v51 }
 0x2dd   : > { %v6085_v23 = vpop.f32.mrf.mxu2 }
 0x2de   : > { %6445 = vst [vmem:[#allocation24_spill] sm:$0xff] %v6085_v23  ;;  %v1914_v19 = vpop.f32.mrf.mxu3  ;;  %v4306_v23 = vld [vmem:[#allocation2 + $0xd8] sm:$0xf] }
 0x2df   : > { %v6090_v15 = vadd.f32 %v1914_v19, %v6446_v37  ;;  %v4380_v19 = vld [vmem:[#allocation2 + $0x174] sm:$0xf0]  ;;  %v6099_v37 = vpop.f32.mrf.mxu0  ;;  %v4307_v10 = vor.u32 %v4691_v55, %v4306_v23 }
 0x2e0   : > { %v4383_v41 = vor.u32 %v4708_v42, %v4380_v19 }
 0x2e2   : > { %v2237_v54 = vpop.f32.mrf.mxu1 }
 0x2e3   : > { %v2238_v44 = vadd.f32 %v2237_v54, %v2149_v6 }
 0x2e5   : > { %v2326_v62 = vpop.f32.mrf.mxu2  ;;  %3064 = vmatmul.bf16.gmra.mxu1 %v4267_v33  ;;  %v6451_v33 = vld [vmem:[#allocation22_spill] sm:$0xff] }
 0x2e6   : > { %v6094_v38 = vadd.f32 %v2326_v62, %v2238_v44  ;;  %v1916_v16 = vpop.f32.mrf.mxu3 }
 0x2e7   : > { %v6097_v32 = vadd.f32 %v1916_v16, %v6448_v36  ;;  %v4278_v16 = vld [vmem:[#allocation2 + $0x98] sm:$0xf]  ;;  %v4683_v36 = vld [vmem:[#allocation2 + $0xa0] sm:$0xf0] }
 0x2e8   : > { %6447 = vst [vmem:[#allocation25_spill] sm:$0xff] %v6094_v38  ;;  %v6112_v38 = vpop.f32.mrf.mxu0  ;;  %v4279_v23 = vor.u32 %v4683_v36, %v4278_v16 }
 0x2ea   : > { %v2239_v27 = vpop.f32.mrf.mxu1 }
 0x2eb   : > { %v6103_v6 = vadd.f32 %v2239_v27, %v2151_v20  ;;  %2906 = vmatmul.bf16.gmra.mxu3 %v4307_v10  ;;  %v4694_v20 = vld [vmem:[#allocation2 + $0xf8] sm:$0xf0]  ;;  %v6452_v10 = vld [vmem:[#allocation23_spill] sm:$0xff] }
 0x2ec   : > { %3025 = vmatmul.bf16.gmra.mxu0 %v4383_v41  ;;  %v4711_v41 = vld [vmem:[#allocation2 + $0x184] sm:$0xf] }
 0x2ed   : > { %6449 = vst [vmem:[#allocation16_spill] sm:$0xff] %v6103_v6  ;;  %v6105_v54 = vpop.f32.mrf.mxu2 }
 0x2ee   : > { %6450 = vst [vmem:[#allocation17_spill] sm:$0xff] %v6105_v54  ;;  %v1919_v44 = vpop.f32.mrf.mxu3 }
 0x2ef   : > { %v6108_v62 = vadd.f32 %v1919_v44, %v6451_v33  ;;  %v4392_v44 = vld [vmem:[#allocation2 + $0x18c] sm:$0xf0] }
 0x2f0   : > { %v4318_v33 = vld [vmem:[#allocation2 + $0xf0] sm:$0xf]  ;;  %v4395_v6 = vor.u32 %v4711_v41, %v4392_v44  ;;  %v6123_v16 = vpop.f32.mrf.mxu0  ;;  %v4697_v41 = vld [vmem:[#allocation2 + $0x110] sm:$0xf0] }
 0x2f1   : > { %v4319_v58 = vor.u32 %v4694_v20, %v4318_v33  ;;  %v4741_v44 = vld [vmem:[#allocation9] sm:$0xff]  ;;  %v2161_v33 = vadd.f32 %v6001_v63, %v6079_v22 }
 0x2f2   : > { %v2242_v29 = vpop.f32.mrf.mxu1  ;;  %3321 = vmatpush.bf16.msra.mxu2 %v4741_v44  ;;  %v4342_v44 = vld [vmem:[#allocation2 + $0x120] sm:$0xf] }
 0x2f3   : > { %v2243_v34 = vadd.f32 %v2242_v29, %v2154_v18 }
 0x2f5   : > { %v2331_v55 = vpop.f32.mrf.mxu2  ;;  %3069 = vmatmul.bf16.gmra.mxu1 %v4279_v23  ;;  %v4686_v23 = vld [vmem:[#allocation2 + $0xb8] sm:$0xf0] }
 0x2f6   : > { %v6114_v42 = vadd.f32 %v2331_v55, %v2243_v34  ;;  %v1921_v19 = vpop.f32.mrf.mxu3  ;;  %v4290_v34 = vld [vmem:[#allocation2 + $0xb0] sm:$0xf]  ;;  %v2159_v55 = vadd.f32 %v5987_v49, %v6070_v26 }
 0x2f7   : > { %v6117_v27 = vadd.f32 %v1921_v19, %v6452_v10  ;;  %v4291_v51 = vor.u32 %v4686_v23, %v4290_v34  ;;  %v4302_v34 = vld [vmem:[#allocation2 + $0xc8] sm:$0xf]  ;;  %v4689_v23 = vld [vmem:[#allocation2 + $0xd0] sm:$0xf0] }
 0x2fa   : > { %v2244_v54 = vpop.f32.mrf.mxu1 }
 0x2fb   : > { %v6121_v18 = vadd.f32 %v2244_v54, %v2156_v1  ;;  %2911 = vmatmul.bf16.gmra.mxu3 %v4319_v58 }
 0x2fc   : > { %3030 = vmatmul.bf16.gmra.mxu0 %v4395_v6  ;;  %v4330_v6 = vld [vmem:[#allocation2 + $0x108] sm:$0xf] }
 0x2fd   : > { %v6125_v36 = vpop.f32.mrf.mxu2  ;;  %v4331_v1 = vor.u32 %v4697_v41, %v4330_v6  ;;  %v4700_v41 = vld [vmem:[#allocation2 + $0x128] sm:$0xf0]  ;;  %v2166_v6 = vadd.f32 %v6027_v0, %v6097_v32 }
 0x2fe   : > { %6453 = vst [vmem:[#allocation18_spill] sm:$0xff] %v6125_v36  ;;  %v6127_v29 = vpop.f32.mrf.mxu3 }
 0x302   : > { %v2247_v19 = vpop.f32.mrf.mxu1 }
 0x303   : > { %v2248_v30 = vadd.f32 %v2247_v19, %v2159_v55  ;;  %v2164_v55 = vadd.f32 %v6014_v9, %v6090_v15 }
 0x305   : > { %v2336_v20 = vpop.f32.mrf.mxu2  ;;  %3074 = vmatmul.bf16.gmra.mxu1 %v4291_v51  ;;  %v4303_v51 = vor.u32 %v4689_v23, %v4302_v34  ;;  %v4314_v34 = vld [vmem:[#allocation2 + $0xe0] sm:$0xf]  ;;  %v4692_v23 = vld [vmem:[#allocation2 + $0xe8] sm:$0xf0] }
 0x306   : > { %v6131_v54 = vadd.f32 %v2336_v20, %v2248_v30  ;;  %v2874_v10 = vpop.f32.mrf.mxu3 }
 0x30a   : > { %v2249_v58 = vpop.f32.mrf.mxu1 }
 0x30b   : > { %v6135_v36 = vadd.f32 %v2249_v58, %v2161_v33  ;;  %2916 = vmatmul.bf16.gmra.mxu3 %v4331_v1  ;;  %v4343_v33 = vor.u32 %v4700_v41, %v4342_v44  ;;  %v4354_v41 = vld [vmem:[#allocation2 + $0x138] sm:$0xf]  ;;  %v4703_v44 = vld [vmem:[#allocation2 + $0x140] sm:$0xf0] }
 0x30d   : > { %v6137_v49 = vpop.f32.mrf.mxu2 }
 0x30e   : > { %v6139_v26 = vpop.f32.mrf.mxu3 }
 0x312   : > { %v2252_v19 = vpop.f32.mrf.mxu1 }
 0x313   : > { %v2253_v30 = vadd.f32 %v2252_v19, %v2164_v55  ;;  %v2169_v55 = vadd.f32 %v6036_v7, %v6108_v62  ;;  %v6165_v7 = vpop.f32.mrf.mxu0 }
 0x315   : > { %v2341_v20 = vpop.f32.mrf.mxu2  ;;  %3079 = vmatmul.bf16.gmra.mxu1 %v4303_v51  ;;  %v4315_v51 = vor.u32 %v4692_v23, %v4314_v34  ;;  %v4326_v34 = vld [vmem:[#allocation2 + $0xf8] sm:$0xf]  ;;  %v4695_v23 = vld [vmem:[#allocation2 + $0x100] sm:$0xf0] }
 0x316   : > { %v6143_v63 = vadd.f32 %v2341_v20, %v2253_v30  ;;  %v6145_v22 = vpop.f32.mrf.mxu3 }
 0x318   : > { %6454 = vst [vmem:[#allocation19_spill] sm:$0xff] %v6143_v63 }
 0x31a   : > { %v2254_v1 = vpop.f32.mrf.mxu1 }
 0x31b   : > { %v6149_v58 = vadd.f32 %v2254_v1, %v2166_v6  ;;  %2921 = vmatmul.bf16.gmra.mxu3 %v4343_v33  ;;  %v2171_v6 = vadd.f32 %v6052_v56, %v6117_v27  ;;  %v4355_v33 = vor.u32 %v4703_v44, %v4354_v41  ;;  %v4706_v56 = vld [vmem:[#allocation2 + $0x158] sm:$0xf0]  ;;  %v6171_v27 = vpop.f32.mrf.mxu0  ;;  %v2964_v44 = vadd.f32 %v6074_v48, %v2874_v10 }
 0x31d   : > { %6455 = vst [vmem:[#allocation20_spill] sm:$0xff] %v6149_v58  ;;  %v6151_v9 = vpop.f32.mrf.mxu2 }
 0x31e   : > { %6456 = vst [vmem:[#allocation21_spill] sm:$0xff] %v6151_v9  ;;  %v6153_v15 = vpop.f32.mrf.mxu3 }
 0x322   : > { %v2257_v19 = vpop.f32.mrf.mxu1 }
 0x323   : > { %v2258_v30 = vadd.f32 %v2257_v19, %v2169_v55  ;;  %v2962_v19 = vadd.f32 %v6063_v2, %v6127_v29  ;;  %v6185_v48 = vpop.f32.mrf.mxu0 }
 0x325   : > { %v2346_v20 = vpop.f32.mrf.mxu2  ;;  %3084 = vmatmul.bf16.gmra.mxu1 %v4315_v51 }
 0x326   : > { %v6157_v0 = vadd.f32 %v2346_v20, %v2258_v30  ;;  %v6159_v32 = vpop.f32.mrf.mxu3  ;;  %v4327_v30 = vor.u32 %v4695_v23, %v4326_v34  ;;  %v4366_v20 = vld [vmem:[#allocation2 + $0x150] sm:$0xf] }
 0x328   : > { %6457 = vst [vmem:[#allocation22_spill] sm:$0xff] %v6157_v0 }
 0x32a   : > { %v2259_v1 = vpop.f32.mrf.mxu1 }
 0x32b   : > { %v6163_v9 = vadd.f32 %v2259_v1, %v2171_v6  ;;  %2926 = vmatmul.bf16.gmra.mxu3 %v4355_v33  ;;  %v6459_v6 = vld [vmem:[#allocation26_spill] sm:$0xff] }
 0x32c   : > { %v6180_v1 = vld [vmem:[%s6412_s4] ss:$0 sm:$0xff] }
 0x32d   : > { %6458 = vst [vmem:[#allocation23_spill] sm:$0xff] %v6163_v9  ;;  %v4367_v9 = vor.u32 %v4706_v56, %v4366_v20  ;;  %v2967_v20 = vadd.f32 %v6087_v28, %v6139_v26 }
 0x32e   : > { %v6167_v62 = vpop.f32.mrf.mxu3 }
 0x332   : > { %v3050_v55 = vpop.f32.mrf.mxu1 }
 0x333   : > { %v3051_v51 = vadd.f32 %v3050_v55, %v2962_v19  ;;  %v4338_v19 = vld [vmem:[#allocation2 + $0x110] sm:$0xf] }
 0x335   : > { %3089 = vmatmul.bf16.gmra.mxu1 %v4327_v30  ;;  %v3130_v33 = vadd.f32 %v3051_v51, %v6459_v6  ;;  %v4698_v30 = vld [vmem:[#allocation2 + $0x118] sm:$0xf0] }
 0x336   : > { %v6173_v41 = vpop.f32.mrf.mxu3 }
 0x337   : > { %v3166_v34 = vadd.f32 %v6180_v1, %v3130_v33  ;;  %v4709_v33 = vld [vmem:[#allocation2 + $0x170] sm:$0xf0] }
 0x339   : > { %v3198_v10 = vmax.f32 %v3166_v34, 0.0 }
 0x33a   : > { %v3052_v2 = vpop.f32.mrf.mxu1 }
 0x33b   : > { %v3053_v29 = vadd.f32 %v3052_v2, %v2964_v44  ;;  %2931 = vmatmul.bf16.gmra.mxu3 %v4367_v9  ;;  %v4339_v9 = vor.u32 %v4698_v30, %v4338_v19  ;;  %v2969_v2 = vadd.f32 %v6099_v37, %v6145_v22  ;;  %v4350_v19 = vld [vmem:[#allocation2 + $0x128] sm:$0xf]  ;;  %v4701_v30 = vld [vmem:[#allocation2 + $0x130] sm:$0xf0] }
 0x33d   : > { %v3131_v23 = vadd.f32 %v3053_v29, %v5881_v59  ;;  %v4378_v59 = vld [vmem:[#allocation2 + $0x168] sm:$0xf] }
 0x33e   : > { %v6187_v6 = vpop.f32.mrf.mxu3  ;;  %v4379_v34 = vor.u32 %v4709_v33, %v4378_v59  ;;  %v2974_v59 = vadd.f32 %v6123_v16, %v6159_v32 }
 0x33f   : > { %v3167_v55 = vadd.f32 %v6180_v1, %v3131_v23 }
 0x341   : > { %v3199_v51 = vmax.f32 %v3167_v55, 0.0  ;;  %v6194_v55 = vpop.f32.mrf.mxu0 }
 0x342   : > { %v3055_v0 = vpop.f32.mrf.mxu1 }
 0x343   : > { %v3230_v56 = vpack.c.bf16 %v3199_v51, %v3198_v10  ;;  %v3056_v44 = vadd.f32 %v3055_v0, %v2967_v20  ;;  %v4351_v51 = vor.u32 %v4701_v30, %v4350_v19  ;;  %v4704_v19 = vld [vmem:[#allocation2 + $0x148] sm:$0xf0] }
 0x345   : > { %3094 = vmatmul.bf16.gmra.mxu1 %v4339_v9  ;;  %3322 = vmatmul.bf16.vlgmr.msra.gmra.mxu2 %v3230_v56  ;;  %v3132_v29 = vadd.f32 %v3056_v44, %v5890_v13  ;;  %v2972_v13 = vadd.f32 %v6112_v38, %v6153_v15 }
 0x346   : > { %v6196_v63 = vpop.f32.mrf.mxu3 }
 0x347   : > { %v3168_v28 = vadd.f32 %v6180_v1, %v3132_v29 }
 0x349   : > { %v3200_v10 = vmax.f32 %v3168_v28, 0.0  ;;  %v6203_v56 = vpop.f32.mrf.mxu0 }
 0x34a   : > { %v3057_v23 = vpop.f32.mrf.mxu1 }
 0x34b   : > { %v3058_v58 = vadd.f32 %v3057_v23, %v2969_v2  ;;  %2936 = vmatmul.bf16.gmra.mxu3 %v4379_v34 }
 0x34d   : > { %v3133_v26 = vadd.f32 %v3058_v58, %v5902_v21  ;;  %v4390_v21 = vld [vmem:[#allocation2 + $0x180] sm:$0xf]  ;;  %v4712_v58 = vld [vmem:[#allocation2 + $0x188] sm:$0xf0] }
 0x34e   : > { %v6205_v44 = vpop.f32.mrf.mxu3  ;;  %v4391_v2 = vor.u32 %v4712_v58, %v4390_v21 }
 0x34f   : > { %v3169_v0 = vadd.f32 %v6180_v1, %v3133_v26 }
 0x351   : > { %v3201_v37 = vmax.f32 %v3169_v0, 0.0  ;;  %v6212_v23 = vpop.f32.mrf.mxu0  ;;  %v4362_v0 = vld [vmem:[#allocation2 + $0x140] sm:$0xf] }
 0x352   : > { %v3060_v22 = vpop.f32.mrf.mxu1 }
 0x353   : > { %v3231_v20 = vpack.c.bf16 %v3201_v37, %v3200_v10  ;;  %v3061_v9 = vadd.f32 %v3060_v22, %v2972_v13  ;;  %v4363_v10 = vor.u32 %v4704_v19, %v4362_v0  ;;  %v2979_v13 = vadd.f32 %v6171_v27, %v6173_v41  ;;  %v4402_v19 = vld [vmem:[#allocation2 + $0x198] sm:$0xf] }
 0x354   : > { %v2982_v27 = vadd.f32 %v6185_v48, %v6187_v6 }
 0x355   : > { %3099 = vmatmul.bf16.gmra.mxu1 %v4351_v51  ;;  %3327 = vmatmul.bf16.gmra.mxu2 %v3231_v20  ;;  %v3134_v33 = vadd.f32 %v3061_v9, %v5913_v35  ;;  %v2977_v35 = vadd.f32 %v6165_v7, %v6167_v62 }
 0x356   : > { %v6215_v26 = vpop.f32.mrf.mxu3 }
 0x357   : > { %v3170_v38 = vadd.f32 %v6180_v1, %v3134_v33  ;;  %v4707_v33 = vld [vmem:[#allocation2 + $0x160] sm:$0xf0] }
 0x359   : > { %v3202_v30 = vmax.f32 %v3170_v38, 0.0 }
 0x35a   : > { %v3062_v29 = vpop.f32.mrf.mxu1 }
 0x35b   : > { %v3063_v34 = vadd.f32 %v3062_v29, %v2974_v59  ;;  %2941 = vmatmul.bf16.gmra.mxu3 %v4391_v2  ;;  %v4374_v59 = vld [vmem:[#allocation2 + $0x158] sm:$0xf] }
 0x35d   : > { %v3135_v15 = vadd.f32 %v3063_v34, %v5925_v50  ;;  %v6219_v50 = vpop.f32.mrf.mxu0 }
 0x35e   : > { %v6224_v20 = vpop.f32.mrf.mxu3 }
 0x35f   : > { %v3171_v28 = vadd.f32 %v6180_v1, %v3135_v15 }
 0x361   : > { %v3203_v16 = vmax.f32 %v3171_v28, 0.0 }
 0x362   : > { %v3065_v32 = vpop.f32.mrf.mxu1 }
 0x363   : > { %v3232_v37 = vpack.c.bf16 %v3203_v16, %v3202_v30  ;;  %v3066_v22 = vadd.f32 %v3065_v32, %v2977_v35  ;;  %v4715_v30 = vld [vmem:[#allocation2 + $0x1a0] sm:$0xf0]  ;;  %v2294_v35 = vadd.f32 %v5965_v5, %v5963_v61  ;;  %v2987_v61 = vadd.f32 %v6203_v56, %v6205_v44 }
 0x364   : > { %v4403_v32 = vor.u32 %v4715_v30, %v4402_v19 }
 0x365   : > { %3104 = vmatmul.bf16.gmra.mxu1 %v4363_v10  ;;  %3332 = vmatmul.bf16.gmra.mxu2 %v3232_v37  ;;  %v3136_v51 = vadd.f32 %v3066_v22, %v5936_v12  ;;  %v2993_v38 = vpop.f32.mrf.mxu0  ;;  %v4375_v12 = vor.u32 %v4707_v33, %v4374_v59 }
 0x366   : > { %v2904_v15 = vpop.f32.mrf.mxu3 }
 0x367   : > { %v3172_v58 = vadd.f32 %v6180_v1, %v3136_v51  ;;  %v4386_v51 = vld [vmem:[#allocation2 + $0x170] sm:$0xf] }
 0x369   : > { %v3204_v2 = vmax.f32 %v3172_v58, 0.0 }
 0x36a   : > { %v3067_v9 = vpop.f32.mrf.mxu1 }
 0x36b   : > { %v3068_v21 = vadd.f32 %v3067_v9, %v2979_v13  ;;  %2946 = vmatmul.bf16.gmra.mxu3 %v4403_v32  ;;  %v4714_v9 = vld [vmem:[#allocation2 + $0x19c] sm:$0xf] }
 0x36d   : > { %v3137_v7 = vadd.f32 %v3068_v21, %v5943_v8  ;;  %v2984_v8 = vadd.f32 %v6194_v55, %v6196_v63  ;;  %v2996_v48 = vpop.f32.mrf.mxu0  ;;  %v4710_v63 = vld [vmem:[#allocation2 + $0x178] sm:$0xf0]  ;;  %v4404_v21 = vld [vmem:[#allocation2 + $0x1a4] sm:$0xf0] }
 0x36e   : > { %v2907_v22 = vpop.f32.mrf.mxu3  ;;  %v4387_v5 = vor.u32 %v4710_v63, %v4386_v51 }
 0x36f   : > { %v3173_v62 = vadd.f32 %v6180_v1, %v3137_v7  ;;  %v4407_v7 = vor.u32 %v4714_v9, %v4404_v21  ;;  %v4410_v9 = vld [vmem:[#allocation2 + $0x1a0] sm:$0xf] }
 0x371   : > { %v3205_v29 = vmax.f32 %v3173_v62, 0.0  ;;  %3035 = vmatmul.bf16.gmra.mxu0 %v4407_v7 }
 0x372   : > { %v3070_v34 = vpop.f32.mrf.mxu1 }
 0x373   : > { %v3233_v41 = vpack.c.bf16 %v3205_v29, %v3204_v2  ;;  %v3071_v28 = vadd.f32 %v3070_v34, %v2982_v27  ;;  %v2989_v29 = vadd.f32 %v6212_v23, %v6215_v26 }
 0x375   : > { %3109 = vmatmul.bf16.gmra.mxu1 %v4375_v12  ;;  %3337 = vmatmul.bf16.gmra.mxu2 %v3233_v41  ;;  %v3138_v0 = vadd.f32 %v3071_v28, %v5954_v31  ;;  %v2998_v33 = vpop.f32.mrf.mxu0  ;;  %v2299_v12 = vadd.f32 %v5985_v40, %v5983_v3  ;;  %v2994_v3 = vadd.f32 %v2993_v38, %v2904_v15 }
 0x376   : > { %v2909_v2 = vpop.f32.mrf.mxu3  ;;  %v2997_v15 = vadd.f32 %v2996_v48, %v2907_v22 }
 0x377   : > { %v3174_v6 = vadd.f32 %v6180_v1, %v3138_v0  ;;  %v4713_v0 = vld [vmem:[#allocation2 + $0x190] sm:$0xf0] }
 0x379   : > { %v3206_v55 = vmax.f32 %v3174_v6, 0.0 }
 0x37a   : > { %v3072_v16 = vpop.f32.mrf.mxu1 }
 0x37b   : > { %v3073_v10 = vadd.f32 %v3072_v16, %v2984_v8  ;;  %v4398_v8 = vld [vmem:[#allocation2 + $0x188] sm:$0xf] }
 0x37c   : > { %v4399_v23 = vor.u32 %v4713_v0, %v4398_v8 }
 0x37d   : > { %v3139_v37 = vadd.f32 %v3073_v10, %v2294_v35  ;;  %v3001_v19 = vpop.f32.mrf.mxu0 }
 0x37e   : > { %v2912_v32 = vpop.f32.mrf.mxu3 }
 0x37f   : > { %v3175_v13 = vadd.f32 %v6180_v1, %v3139_v37  ;;  %v2304_v37 = vadd.f32 %v6007_v4, %v6005_v47  ;;  %v2999_v4 = vadd.f32 %v2998_v33, %v2909_v2  ;;  %v3002_v8 = vadd.f32 %v3001_v19, %v2912_v32  ;;  %v6264_v19 = vpop.f32.mrf.mxu2 }
 0x381   : > { %v3207_v31 = vmax.f32 %v3175_v13, 0.0 }
 0x382   : > { %v3075_v58 = vpop.f32.mrf.mxu1 }
 0x383   : > { %v3234_v62 = vpack.c.bf16 %v3207_v31, %v3206_v55  ;;  %v3076_v59 = vadd.f32 %v3075_v58, %v2987_v61 }
 0x385   : > { %3114 = vmatmul.bf16.gmra.mxu1 %v4387_v5  ;;  %3342 = vmatmul.bf16.gmra.mxu2 %v3234_v62  ;;  %v3140_v34 = vadd.f32 %v3076_v59, %v5976_v11  ;;  %v2992_v11 = vadd.f32 %v6219_v50, %v6224_v20  ;;  %v3003_v13 = vpop.f32.mrf.mxu0  ;;  %v4716_v50 = vld [vmem:[#allocation2 + $0x1a8] sm:$0xf0] }
 0x386   : > { %v2914_v63 = vpop.f32.mrf.mxu3  ;;  %v4411_v7 = vor.u32 %v4716_v50, %v4410_v9  ;;  %v2319_v9 = vadd.f32 %v6067_v14, %v6065_v24 }
 0x387   : > { %v3176_v56 = vadd.f32 %v6180_v1, %v3140_v34  ;;  %v3004_v2 = vadd.f32 %v3003_v13, %v2914_v63  ;;  %v6270_v63 = vld [vmem:[%s6414_s6] ss:$0 sm:$0xff] }
 0x389   : > { %v3208_v30 = vmax.f32 %v3176_v56, 0.0 }
 0x38a   : > { %v3077_v27 = vpop.f32.mrf.mxu1 }
 0x38b   : > { %v3078_v41 = vadd.f32 %v3077_v27, %v2989_v29  ;;  %v2309_v29 = vadd.f32 %v6029_v39, %v6025_v25 }
 0x38d   : > { %v3141_v44 = vadd.f32 %v3078_v41, %v2299_v12  ;;  %v3006_v61 = vpop.f32.mrf.mxu0 }
 0x38e   : > { %v2917_v47 = vpop.f32.mrf.mxu3 }
 0x38f   : > { %v3177_v28 = vadd.f32 %v6180_v1, %v3141_v44 }
 0x391   : > { %v3209_v16 = vmax.f32 %v3177_v28, 0.0 }
 0x392   : > { %v3080_v35 = vpop.f32.mrf.mxu1 }
 0x393   : > { %v3235_v26 = vpack.c.bf16 %v3209_v16, %v3208_v30  ;;  %v3081_v10 = vadd.f32 %v3080_v35, %v2992_v11  ;;  %v2314_v16 = vadd.f32 %v6047_v43, %v6045_v60 }
 0x395   : > { %3119 = vmatmul.bf16.gmra.mxu1 %v4399_v23  ;;  %3347 = vmatmul.bf16.gmra.mxu2 %v3235_v26  ;;  %v3142_v40 = vadd.f32 %v3081_v10, %v5996_v46  ;;  %v3008_v41 = vpop.f32.mrf.mxu0 }
 0x396   : > { %v2919_v22 = vpop.f32.mrf.mxu3 }
 0x397   : > { %v3178_v55 = vadd.f32 %v6180_v1, %v3142_v40  ;;  %v3009_v60 = vadd.f32 %v3008_v41, %v2919_v22 }
 0x399   : > { %v3210_v21 = vmax.f32 %v3178_v55, 0.0  ;;  %v4751_v55 = vld [vmem:[%s5405_s23] sm:$0xff]  }
 0x39a   : > { %v3082_v6 = vpop.f32.mrf.mxu1 }
 0x39b   : > { %v3083_v51 = vadd.f32 %v3082_v6, %v2994_v3  ;;  %v3007_v6 = vadd.f32 %v3006_v61, %v2917_v47 }
 0x39d   : > { %v3143_v31 = vadd.f32 %v3083_v51, %v2304_v37 }
 0x39e   : > { %v2922_v25 = vpop.f32.mrf.mxu3 }
 0x39f   : > { %v3179_v20 = vadd.f32 %v6180_v1, %v3143_v31 }
 0x3a1   : > { %v3211_v58 = vmax.f32 %v3179_v20, 0.0 }
 0x3a2   : > { %v3085_v38 = vpop.f32.mrf.mxu1 }
 0x3a3   : > { %v3236_v46 = vpack.c.bf16 %v3211_v58, %v3210_v21  ;;  %v3086_v5 = vadd.f32 %v3085_v38, %v2997_v15 }
 0x3a5   : > { %3124 = vmatmul.bf16.gmra.mxu1 %v4411_v7  ;;  %3352 = vmatmul.bf16.gmra.mxu2 %v3236_v46  ;;  %v3144_v62 = vadd.f32 %v3086_v5, %v6018_v57  ;;  %v3011_v57 = vpop.f32.mrf.mxu0  ;;  %v4752_v7 = vunpack.c.l.bf16 %v4751_v55  ;;  %v4753_v46 = vunpack.c.h.bf16 %v4751_v55 }
 0x3a6   : > { %v2924_v37 = vpop.f32.mrf.mxu3  ;;  %v3012_v14 = vadd.f32 %v3011_v57, %v2922_v25 }
 0x3a7   : > { %v3180_v27 = vadd.f32 %v6180_v1, %v3144_v62 }
 0x3a9   : > { %v3212_v56 = vmax.f32 %v3180_v27, 0.0 }
 0x3aa   : > { %v3087_v59 = vpop.f32.mrf.mxu1 }
 0x3ab   : > { %v3088_v34 = vadd.f32 %v3087_v59, %v2999_v4 }
 0x3ad   : > { %v3145_v12 = vadd.f32 %v3088_v34, %v2309_v29  ;;  %v3013_v40 = vpop.f32.mrf.mxu0 }
 0x3ae   : > { %v2927_v15 = vpop.f32.mrf.mxu3 }
 0x3af   : > { %v3181_v48 = vadd.f32 %v6180_v1, %v3145_v12 }
 0x3b1   : > { %v3213_v44 = vmax.f32 %v3181_v48, 0.0 }
 0x3b2   : > { %v3090_v28 = vpop.f32.mrf.mxu1 }
 0x3b3   : > { %v3237_v0 = vpack.c.bf16 %v3213_v44, %v3212_v56  ;;  %v3091_v33 = vadd.f32 %v3090_v28, %v3002_v8  ;;  %v3014_v44 = vadd.f32 %v3013_v40, %v2924_v37  ;;  %v4894_v8 = vld [vmem:[%s5405_s23 + $0x8] sm:$0xff]  }
 0x3b5   : > { %3357 = vmatmul.bf16.gmra.mxu2 %v3237_v0  ;;  %v3146_v30 = vadd.f32 %v3091_v33, %v6038_v17  ;;  %v3016_v20 = vpop.f32.mrf.mxu0  ;;  %v6460_v33 = vld [vmem:[#allocation24_spill] sm:$0xff] }
 0x3b6   : > { %v2929_v22 = vpop.f32.mrf.mxu3  ;;  %v2324_v57 = vadd.f32 %v6460_v33, %v6083_v53 }
 0x3b7   : > { %v3182_v11 = vadd.f32 %v6180_v1, %v3146_v30 }
 0x3b9   : > { %v3214_v32 = vmax.f32 %v3182_v11, 0.0  ;;  %v4757_v11 = vunpack.c.h.bf16 %v4894_v8 }
 0x3ba   : > { %v3092_v39 = vpop.f32.mrf.mxu1 }
 0x3bb   : > { %v3093_v35 = vadd.f32 %v3092_v39, %v3004_v2  ;;  %v4756_v39 = vunpack.c.l.bf16 %v4894_v8 }
 0x3bd   : > { %v3147_v23 = vadd.f32 %v3093_v35, %v2314_v16  ;;  %v3018_v41 = vpop.f32.mrf.mxu0 }
 0x3be   : > { %v2932_v53 = vpop.f32.mrf.mxu3 }
 0x3bf   : > { %v3183_v26 = vadd.f32 %v6180_v1, %v3147_v23 }
 0x3c1   : > { %v3215_v10 = vmax.f32 %v3183_v26, 0.0 }
 0x3c2   : > { %v3095_v3 = vpop.f32.mrf.mxu1 }
 0x3c3   : > { %v3238_v17 = vpack.c.bf16 %v3215_v10, %v3214_v32  ;;  %v3096_v13 = vadd.f32 %v3095_v3, %v3007_v6  ;;  %v3017_v6 = vadd.f32 %v3016_v20, %v2927_v15 }
 0x3c5   : > { %3362 = vmatmul.bf16.gmra.mxu2 %v3238_v17  ;;  %v3148_v43 = vadd.f32 %v3096_v13, %v6056_v52  ;;  %v3021_v26 = vpop.f32.mrf.mxu0 }
 0x3c6   : > { %v2934_v20 = vpop.f32.mrf.mxu3 }
 0x3c7   : > { %v3184_v21 = vadd.f32 %v6180_v1, %v3148_v43 }
 0x3c8   : > { %v3323_v51 = vpop.f32.mrf.mxu2 }
 0x3c9   : > { %v3324_v58 = vadd.f32 %v6270_v63, %v3323_v51  ;;  %v3216_v5 = vmax.f32 %v3184_v21, 0.0  ;;  %v4895_v21 = vld [vmem:[%s5405_s23 + $0x10] sm:$0xff]  }
 0x3ca   : > { %v3097_v31 = vpop.f32.mrf.mxu1 }
 0x3cb   : > { %v3098_v50 = vadd.f32 %v3097_v31, %v3009_v60  ;;  %v3467_v47 = vadd.f32 %v4752_v7, %v3324_v58  ;;  %v3019_v31 = vadd.f32 %v3018_v41, %v2929_v22  ;;  %v6462_v7 = vld [vmem:[#allocation16_spill] sm:$0xff]  ;;  %v3022_v41 = vadd.f32 %v3021_v26, %v2932_v53 }
 0x3cd   : > { %v3149_v38 = vadd.f32 %v3098_v50, %v2319_v9  ;;  %v3499_v34 = vmax.f32 %v3467_v47, 0.0  ;;  %v6461_v9 = vld [vmem:[#allocation25_spill] sm:$0xff]  ;;  %v4760_v47 = vunpack.c.l.bf16 %v4895_v21 }
 0x3cf   : > { %v3185_v52 = vadd.f32 %v6180_v1, %v3149_v38  ;;  %v6463_v38 = vld [vmem:[#allocation17_spill] sm:$0xff] }
 0x3d0   : > { %v3325_v61 = vpop.f32.mrf.mxu2 }
 0x3d1   : > { %v3217_v4 = vmax.f32 %v3185_v52, 0.0  ;;  %v3326_v62 = vadd.f32 %v6270_v63, %v3325_v61  ;;  %v2329_v52 = vadd.f32 %v6463_v38, %v6462_v7 }
 0x3d2   : > { %v3100_v24 = vpop.f32.mrf.mxu1 }
 0x3d3   : > { %v3468_v59 = vadd.f32 %v4753_v46, %v3326_v62  ;;  %v3239_v29 = vpack.c.bf16 %v3217_v4, %v3216_v5  ;;  %v3101_v12 = vadd.f32 %v3100_v24, %v3012_v14  ;;  %v3023_v46 = vpop.f32.mrf.mxu0  ;;  %v4761_v24 = vunpack.c.h.bf16 %v4895_v21 }
 0x3d5   : > { %v3500_v27 = vmax.f32 %v3468_v59, 0.0  ;;  %3367 = vmatmul.bf16.gmra.mxu2 %v3239_v29  ;;  %v3150_v28 = vadd.f32 %v3101_v12, %v6076_v45 }
 0x3d7   : > { %v4817_v48 = vpack.c.bf16 %v3500_v27, %v3499_v34  ;;  %v3186_v30 = vadd.f32 %v6180_v1, %v3150_v28 }
 0x3d8   : > { %v3328_v56 = vpop.f32.mrf.mxu2 }
 0x3d9   : > { %4818 = vst [vmem:[%s6281_s9] sm:$0xff] %v4817_v48   ;;  %v3329_v25 = vadd.f32 %v6270_v63, %v3328_v56  ;;  %v3218_v32 = vmax.f32 %v3186_v30, 0.0 }
 0x3da   : > { %v3102_v0 = vpop.f32.mrf.mxu1 }
 0x3db   : > { %v3103_v2 = vadd.f32 %v3102_v0, %v3014_v44  ;;  %v3469_v45 = vadd.f32 %v4756_v39, %v3329_v25  ;;  %v3026_v56 = vpop.f32.mrf.mxu0  ;;  %v2937_v0 = vpop.f32.mrf.mxu3  ;;  %v4896_v25 = vld [vmem:[%s5405_s23 + $0x18] sm:$0xff]  }
 0x3dc   : > { %v4765_v53 = vunpack.c.h.bf16 %v4896_v25 }
 0x3dd   : > { %v3151_v16 = vadd.f32 %v3103_v2, %v2324_v57  ;;  %v3501_v13 = vmax.f32 %v3469_v45, 0.0  ;;  %v3024_v2 = vadd.f32 %v3023_v46, %v2934_v20  ;;  %v4897_v46 = vld [vmem:[%s5405_s23 + $0x20] sm:$0xff]   ;;  %v2339_v20 = vadd.f32 %v6137_v49, %v6135_v36 }
 0x3df   : > { %v3187_v35 = vadd.f32 %v6180_v1, %v3151_v16  ;;  %v6464_v16 = vld [vmem:[#allocation18_spill] sm:$0xff] }
 0x3e0   : > { %v3330_v23 = vpop.f32.mrf.mxu2 }
 0x3e1   : > { %v3219_v10 = vmax.f32 %v3187_v35, 0.0  ;;  %v3331_v3 = vadd.f32 %v6270_v63, %v3330_v23  ;;  %v2334_v35 = vadd.f32 %v6464_v16, %v6121_v18  ;;  %v6467_v16 = vld [vmem:[#allocation21_spill] sm:$0xff] }
 0x3e2   : > { %v3105_v40 = vpop.f32.mrf.mxu1 }
 0x3e3   : > { %v3470_v17 = vadd.f32 %v4757_v11, %v3331_v3  ;;  %v3240_v37 = vpack.c.bf16 %v3219_v10, %v3218_v32  ;;  %v3106_v60 = vadd.f32 %v3105_v40, %v3017_v6  ;;  %v4764_v32 = vunpack.c.l.bf16 %v4896_v25  ;;  %v3028_v10 = vpop.f32.mrf.mxu0  ;;  %v2939_v40 = vpop.f32.mrf.mxu3 }
 0x3e4   : > { %v3029_v7 = vadd.f32 %v3028_v10, %v2939_v40 }
 0x3e5   : > { %v3502_v51 = vmax.f32 %v3470_v17, 0.0  ;;  %3372 = vmatmul.bf16.gmra.mxu2 %v3240_v37  ;;  %v3152_v50 = vadd.f32 %v3106_v60, %v6461_v9 }
 0x3e7   : > { %v4822_v43 = vpack.c.bf16 %v3502_v51, %v3501_v13  ;;  %v3188_v15 = vadd.f32 %v6180_v1, %v3152_v50  ;;  %v3027_v51 = vadd.f32 %v3026_v56, %v2937_v0 }
 0x3e8   : > { %v3333_v55 = vpop.f32.mrf.mxu2 }
 0x3e9   : > { %4909 = vst [vmem:[%s6281_s9 + $0x8] sm:$0xff] %v4822_v43   ;;  %v3334_v5 = vadd.f32 %v6270_v63, %v3333_v55  ;;  %v3220_v59 = vmax.f32 %v3188_v15, 0.0 }
 0x3ea   : > { %v3107_v58 = vpop.f32.mrf.mxu1 }
 0x3eb   : > { %v3108_v61 = vadd.f32 %v3107_v58, %v3019_v31  ;;  %v3471_v29 = vadd.f32 %v4760_v47, %v3334_v5  ;;  %v3031_v58 = vpop.f32.mrf.mxu0 }
 0x3ed   : > { %v3153_v4 = vadd.f32 %v3108_v61, %v2329_v52  ;;  %v3503_v44 = vmax.f32 %v3471_v29, 0.0  ;;  %v2942_v52 = vpop.f32.mrf.mxu3 }
 0x3ee   : > { %v3032_v36 = vadd.f32 %v3031_v58, %v2942_v52  ;;  %v6468_v52 = vld [vmem:[#allocation22_spill] sm:$0xff] }
 0x3ef   : > { %v3189_v62 = vadd.f32 %v6180_v1, %v3153_v4  ;;  %v4768_v4 = vunpack.c.l.bf16 %v4897_v46 }
 0x3f0   : > { %v3335_v14 = vpop.f32.mrf.mxu2 }
 0x3f1   : > { %v3221_v34 = vmax.f32 %v3189_v62, 0.0  ;;  %v3336_v27 = vadd.f32 %v6270_v63, %v3335_v14  ;;  %v4769_v14 = vunpack.c.h.bf16 %v4897_v46 }
 0x3f2   : > { %v3110_v12 = vpop.f32.mrf.mxu1 }
 0x3f3   : > { %v3472_v48 = vadd.f32 %v4761_v24, %v3336_v27  ;;  %v3241_v22 = vpack.c.bf16 %v3221_v34, %v3220_v59  ;;  %v3111_v8 = vadd.f32 %v3110_v12, %v3022_v41 }
 0x3f5   : > { %v3504_v28 = vmax.f32 %v3472_v48, 0.0  ;;  %3377 = vmatmul.bf16.gmra.mxu2 %v3241_v22  ;;  %v3154_v30 = vadd.f32 %v3111_v8, %v6114_v42  ;;  %v3033_v48 = vpop.f32.mrf.mxu0  ;;  %v2944_v22 = vpop.f32.mrf.mxu3 }
 0x3f7   : > { %v4827_v33 = vpack.c.bf16 %v3504_v28, %v3503_v44  ;;  %v3190_v23 = vadd.f32 %v6180_v1, %v3154_v30  ;;  %v4898_v30 = vld [vmem:[%s5405_s23 + $0x28] sm:$0xff]  }
 0x3f8   : > { %v3338_v57 = vpop.f32.mrf.mxu2  ;;  %v4772_v10 = vunpack.c.l.bf16 %v4898_v30  ;;  %v4773_v40 = vunpack.c.h.bf16 %v4898_v30 }
 0x3f9   : > { %4910 = vst [vmem:[%s6281_s9 + $0x10] sm:$0xff] %v4827_v33   ;;  %v3339_v26 = vadd.f32 %v6270_v63, %v3338_v57  ;;  %v3222_v17 = vmax.f32 %v3190_v23, 0.0  ;;  %v3034_v33 = vadd.f32 %v3033_v48, %v2944_v22  ;;  %v6465_v57 = vld [vmem:[#allocation19_spill] sm:$0xff] }
 0x3fa   : > { %v3112_v39 = vpop.f32.mrf.mxu1 }
 0x3fb   : > { %v3113_v11 = vadd.f32 %v3112_v39, %v3024_v2  ;;  %v3473_v42 = vadd.f32 %v4764_v32, %v3339_v26  ;;  %v6466_v39 = vld [vmem:[#allocation20_spill] sm:$0xff] }
 0x3fd   : > { %v3155_v45 = vadd.f32 %v3113_v11, %v2334_v35  ;;  %v3505_v55 = vmax.f32 %v3473_v42, 0.0  ;;  %v2344_v35 = vadd.f32 %v6467_v16, %v6466_v39  ;;  %v2947_v23 = vpop.f32.mrf.mxu3  ;;  %v3036_v26 = vpop.f32.mrf.mxu0 }
 0x3ff   : > { %v3191_v3 = vadd.f32 %v6180_v1, %v3155_v45 }
 0x400   : > { %v3340_v6 = vpop.f32.mrf.mxu2 }
 0x401   : > { %v3223_v37 = vmax.f32 %v3191_v3, 0.0  ;;  %v3341_v13 = vadd.f32 %v6270_v63, %v3340_v6  ;;  %v3037_v6 = vadd.f32 %v3036_v26, %v2947_v23 }
 0x402   : > { %v3115_v18 = vpop.f32.mrf.mxu1 }
 0x403   : > { %v3474_v60 = vadd.f32 %v4765_v53, %v3341_v13  ;;  %v3242_v43 = vpack.c.bf16 %v3223_v37, %v3222_v17  ;;  %v3116_v9 = vadd.f32 %v3115_v18, %v3027_v51 }
 0x405   : > { %v3506_v31 = vmax.f32 %v3474_v60, 0.0  ;;  %3382 = vmatmul.bf16.gmra.mxu2 %v3242_v43  ;;  %v3156_v38 = vadd.f32 %v3116_v9, %v6131_v54 }
 0x407   : > { %v4832_v50 = vpack.c.bf16 %v3506_v31, %v3505_v55  ;;  %v3192_v5 = vadd.f32 %v6180_v1, %v3156_v38 }
 0x408   : > { %v3343_v21 = vpop.f32.mrf.mxu2 }
 0x409   : > { %4911 = vst [vmem:[%s6281_s9 + $0x18] sm:$0xff] %v4832_v50   ;;  %v3344_v47 = vadd.f32 %v6270_v63, %v3343_v21  ;;  %v3224_v29 = vmax.f32 %v3192_v5, 0.0  ;;  %v2949_v50 = vpop.f32.mrf.mxu3  ;;  %v3038_v21 = vpop.f32.mrf.mxu0 }
 0x40a   : > { %v3117_v61 = vpop.f32.mrf.mxu1  ;;  %v3039_v38 = vadd.f32 %v3038_v21, %v2949_v50 }
 0x40b   : > { %v3118_v15 = vadd.f32 %v3117_v61, %v3029_v7  ;;  %v3475_v34 = vadd.f32 %v4768_v4, %v3344_v47  ;;  %v4899_v61 = vld [vmem:[%s5405_s23 + $0x30] sm:$0xff]  }
 0x40d   : > { %v3157_v62 = vadd.f32 %v3118_v15, %v2339_v20  ;;  %v3507_v56 = vmax.f32 %v3475_v34, 0.0  ;;  %v6469_v15 = vld [vmem:[#allocation23_spill] sm:$0xff] }
 0x40e   : > { %v2349_v5 = vadd.f32 %v6264_v19, %v6469_v15 }
 0x40f   : > { %v3193_v24 = vadd.f32 %v6180_v1, %v3157_v62 }
 0x410   : > { %v3345_v59 = vpop.f32.mrf.mxu2 }
 0x411   : > { %v3225_v54 = vmax.f32 %v3193_v24, 0.0  ;;  %v3346_v27 = vadd.f32 %v6270_v63, %v3345_v59  ;;  %v4776_v24 = vunpack.c.l.bf16 %v4899_v61 }
 0x412   : > { %v3120_v12 = vpop.f32.mrf.mxu1 }
 0x413   : > { %v3476_v49 = vadd.f32 %v4769_v14, %v3346_v27  ;;  %v3243_v41 = vpack.c.bf16 %v3225_v54, %v3224_v29  ;;  %v3121_v28 = vadd.f32 %v3120_v12, %v3032_v36  ;;  %v4777_v29 = vunpack.c.h.bf16 %v4899_v61 }
 0x415   : > { %v3508_v44 = vmax.f32 %v3476_v49, 0.0  ;;  %3387 = vmatmul.bf16.gmra.mxu2 %v3243_v41  ;;  %v3158_v2 = vadd.f32 %v3121_v28, %v6465_v57 }
 0x417   : > { %v4837_v8 = vpack.c.bf16 %v3508_v44, %v3507_v56  ;;  %v3194_v32 = vadd.f32 %v6180_v1, %v3158_v2  ;;  %v4900_v44 = vld [vmem:[%s5405_s23 + $0x38] sm:$0xff]  }
 0x418   : > { %v3348_v0 = vpop.f32.mrf.mxu2  ;;  %v4780_v28 = vunpack.c.l.bf16 %v4900_v44 }
 0x419   : > { %4912 = vst [vmem:[%s6281_s9 + $0x20] sm:$0xff] %v4837_v8   ;;  %v3349_v45 = vadd.f32 %v6270_v63, %v3348_v0  ;;  %v3226_v42 = vmax.f32 %v3194_v32, 0.0  ;;  %v4781_v8 = vunpack.c.h.bf16 %v4900_v44 }
 0x41a   : > { %v3122_v25 = vpop.f32.mrf.mxu1 }
 0x41b   : > { %v3123_v11 = vadd.f32 %v3122_v25, %v3034_v33  ;;  %v3477_v37 = vadd.f32 %v4772_v10, %v3349_v45 }
 0x41d   : > { %v3159_v3 = vadd.f32 %v3123_v11, %v2344_v35  ;;  %v3509_v55 = vmax.f32 %v3477_v37, 0.0  ;;  %v4901_v35 = vld [vmem:[%s5405_s23 + $0x40] sm:$0xff]  }
 0x41e   : > { %v4784_v23 = vunpack.c.l.bf16 %v4901_v35  ;;  %v4785_v26 = vunpack.c.h.bf16 %v4901_v35 }
 0x41f   : > { %v3195_v53 = vadd.f32 %v6180_v1, %v3159_v3 }
 0x420   : > { %v3350_v17 = vpop.f32.mrf.mxu2 }
 0x421   : > { %v3227_v13 = vmax.f32 %v3195_v53, 0.0  ;;  %v3351_v18 = vadd.f32 %v6270_v63, %v3350_v17 }
 0x422   : > { %v3125_v51 = vpop.f32.mrf.mxu1 }
 0x423   : > { %v3478_v60 = vadd.f32 %v4773_v40, %v3351_v18  ;;  %v3244_v43 = vpack.c.bf16 %v3227_v13, %v3226_v42  ;;  %v3126_v9 = vadd.f32 %v3125_v51, %v3037_v6  ;;  %v4902_v42 = vld [vmem:[%s5405_s23 + $0x48] sm:$0xff]  }
 0x424   : > { %v4788_v13 = vunpack.c.l.bf16 %v4902_v42  ;;  %v4789_v18 = vunpack.c.h.bf16 %v4902_v42 }
 0x425   : > { %v3510_v31 = vmax.f32 %v3478_v60, 0.0  ;;  %3392 = vmatmul.bf16.gmra.mxu2 %v3244_v43  ;;  %v3160_v46 = vadd.f32 %v3126_v9, %v6468_v52 }
 0x427   : > { %v4842_v58 = vpack.c.bf16 %v3510_v31, %v3509_v55  ;;  %v3196_v4 = vadd.f32 %v6180_v1, %v3160_v46 }
 0x428   : > { %v3353_v7 = vpop.f32.mrf.mxu2 }
 0x429   : > { %4913 = vst [vmem:[%s6281_s9 + $0x28] sm:$0xff] %v4842_v58   ;;  %v3354_v62 = vadd.f32 %v6270_v63, %v3353_v7  ;;  %v3228_v54 = vmax.f32 %v3196_v4, 0.0  ;;  %v4903_v58 = vld [vmem:[%s5405_s23 + $0x50] sm:$0xff]  }
 0x42a   : > { %v3127_v20 = vpop.f32.mrf.mxu1  ;;  %v4793_v52 = vunpack.c.h.bf16 %v4903_v58 }
 0x42b   : > { %v3128_v47 = vadd.f32 %v3127_v20, %v3039_v38  ;;  %v3479_v27 = vadd.f32 %v4776_v24, %v3354_v62  ;;  %v4792_v38 = vunpack.c.l.bf16 %v4903_v58  ;;  %v4904_v24 = vld [vmem:[%s5405_s23 + $0x58] sm:$0xff]  }
 0x42d   : > { %v3161_v14 = vadd.f32 %v3128_v47, %v2349_v5  ;;  %v3511_v41 = vmax.f32 %v3479_v27, 0.0 }
 0x42f   : > { %v3197_v59 = vadd.f32 %v6180_v1, %v3161_v14 }
 0x430   : > { %v3355_v34 = vpop.f32.mrf.mxu2 }
 0x431   : > { %v3229_v12 = vmax.f32 %v3197_v59, 0.0  ;;  %v3356_v36 = vadd.f32 %v6270_v63, %v3355_v34  ;;  %v4796_v59 = vunpack.c.l.bf16 %v4904_v24 }
 0x433   : > { %v3480_v49 = vadd.f32 %v4777_v29, %v3356_v36  ;;  %v3245_v19 = vpack.c.bf16 %v3229_v12, %v3228_v54  ;;  %v4797_v29 = vunpack.c.h.bf16 %v4904_v24 }
 0x435   : > { %v3512_v48 = vmax.f32 %v3480_v49, 0.0  ;;  %3397 = vmatmul.bf16.gmra.mxu2 %v3245_v19 }
 0x437   : > { %v4847_v22 = vpack.c.bf16 %v3512_v48, %v3511_v41  ;;  %v4905_v48 = vld [vmem:[%s5405_s23 + $0x60] sm:$0xff]  }
 0x438   : > { %v3358_v56 = vpop.f32.mrf.mxu2  ;;  %v4801_v44 = vunpack.c.h.bf16 %v4905_v48 }
 0x439   : > { %4914 = vst [vmem:[%s6281_s9 + $0x30] sm:$0xff] %v4847_v22   ;;  %v3359_v1 = vadd.f32 %v6270_v63, %v3358_v56  ;;  %v4800_v56 = vunpack.c.l.bf16 %v4905_v48 }
 0x43b   : > { %v3481_v33 = vadd.f32 %v4780_v28, %v3359_v1 }
 0x43d   : > { %v3513_v30 = vmax.f32 %v3481_v33, 0.0 }
 0x440   : > { %v3360_v0 = vpop.f32.mrf.mxu2 }
 0x441   : > { %v3361_v57 = vadd.f32 %v6270_v63, %v3360_v0 }
 0x443   : > { %v3482_v2 = vadd.f32 %v4781_v8, %v3361_v57 }
 0x445   : > { %v3514_v25 = vmax.f32 %v3482_v2, 0.0 }
 0x447   : > { %v4852_v39 = vpack.c.bf16 %v3514_v25, %v3513_v30  ;;  %v4906_v25 = vld [vmem:[%s5405_s23 + $0x68] sm:$0xff]  }
 0x448   : > { %v3363_v16 = vpop.f32.mrf.mxu2  ;;  %v4805_v35 = vunpack.c.h.bf16 %v4906_v25 }
 0x449   : > { %4915 = vst [vmem:[%s6281_s9 + $0x38] sm:$0xff] %v4852_v39   ;;  %v3364_v11 = vadd.f32 %v6270_v63, %v3363_v16  ;;  %v4804_v16 = vunpack.c.l.bf16 %v4906_v25 }
 0x44b   : > { %v3483_v45 = vadd.f32 %v4784_v23, %v3364_v11 }
 0x44d   : > { %v3515_v53 = vmax.f32 %v3483_v45, 0.0 }
 0x450   : > { %v3365_v32 = vpop.f32.mrf.mxu2 }
 0x451   : > { %v3366_v10 = vadd.f32 %v6270_v63, %v3365_v32 }
 0x453   : > { %v3484_v3 = vadd.f32 %v4785_v26, %v3366_v10 }
 0x455   : > { %v3516_v40 = vmax.f32 %v3484_v3, 0.0 }
 0x457   : > { %v4857_v6 = vpack.c.bf16 %v3516_v40, %v3515_v53  ;;  %v4907_v40 = vld [vmem:[%s5405_s23 + $0x70] sm:$0xff]  }
 0x458   : > { %v3368_v17 = vpop.f32.mrf.mxu2  ;;  %v4809_v42 = vunpack.c.h.bf16 %v4907_v40 }
 0x459   : > { %4916 = vst [vmem:[%s6281_s9 + $0x40] sm:$0xff] %v4857_v6   ;;  %v3369_v37 = vadd.f32 %v6270_v63, %v3368_v17  ;;  %v4808_v17 = vunpack.c.l.bf16 %v4907_v40 }
 0x45b   : > { %v3485_v60 = vadd.f32 %v4788_v13, %v3369_v37 }
 0x45d   : > { %v3517_v31 = vmax.f32 %v3485_v60, 0.0 }
 0x460   : > { %v3370_v51 = vpop.f32.mrf.mxu2 }
 0x461   : > { %v3371_v43 = vadd.f32 %v6270_v63, %v3370_v51 }
 0x463   : > { %v3486_v55 = vadd.f32 %v4789_v18, %v3371_v43 }
 0x465   : > { %v3518_v9 = vmax.f32 %v3486_v55, 0.0 }
 0x467   : > { %v4862_v50 = vpack.c.bf16 %v3518_v9, %v3517_v31  ;;  %v4908_v9 = vld [vmem:[%s5405_s23 + $0x78] sm:$0xff]   ;;  %s5168_s23 = sshra.s32 %s3611_s12, 4  ;;  %s5169_s23 = int_to_ptr.hbm [resolvable:$true] %s5168_s23 }
 0x468   : > { %v3373_v21 = vpop.f32.mrf.mxu2  ;;  %v4813_v58 = vunpack.c.h.bf16 %v4908_v9  ;;  %s5170_s19 = scalar_lea.hbm %s5169_s23, 128  ;;  %p5175_p11 = scmp.lt.s32.totalorder %s5169_s23, %s6415_s7 }
 0x469   : > { %4917 = vst [vmem:[%s6281_s9 + $0x48] sm:$0xff] %v4862_v50   ;;  %v3374_v7 = vadd.f32 %v6270_v63, %v3373_v21  ;;  %v4812_v21 = vunpack.c.l.bf16 %v4908_v9  ;;  %p5171_p1 = scmp.ne.s32.totalorder %s5169_s23, %s5170_s19  ;;  %p5176_p9 = scmp.lt.s32.totalorder %s5174_s16, %s5170_s19 }
 0x46b   : > { %v3487_v61 = vadd.f32 %v4792_v38, %v3374_v7  ;;  %p5172_p4 = pnand %p5171_p1, %p5369_p3  ;;  %p5177_p2 = por %p5176_p9, %p5175_p11 }
 0x46d   : > { %v3519_v5 = vmax.f32 %v3487_v61, 0.0  ;;  %p5173_p8 = pneg %p5172_p4 }
 0x46f   : > { %p5178_p10 = pnand %p5177_p2, %p5173_p8 }
 0x470   : > { %v3375_v46 = vpop.f32.mrf.mxu2 }
 0x471   : > { %v3376_v20 = vadd.f32 %v6270_v63, %v3375_v46 }
 0x473   : > { %v3488_v15 = vadd.f32 %v4793_v52, %v3376_v20 }
 0x475   : > { %v3520_v47 = vmax.f32 %v3488_v15, 0.0 }
 0x477   : > { %v4867_v4 = vpack.c.bf16 %v3520_v47, %v3519_v5 }
 0x478   : > { %v3378_v62 = vpop.f32.mrf.mxu2 }
 0x479   : > { %4918 = vst [vmem:[%s6281_s9 + $0x50] sm:$0xff] %v4867_v4   ;;  %v3379_v14 = vadd.f32 %v6270_v63, %v3378_v62 }
 0x47b   : > { %v3489_v54 = vadd.f32 %v4796_v59, %v3379_v14 }
 0x47d   : > { %v3521_v36 = vmax.f32 %v3489_v54, 0.0 }
 0x480   : > { %v3380_v34 = vpop.f32.mrf.mxu2 }
 0x481   : > { %v3381_v27 = vadd.f32 %v6270_v63, %v3380_v34 }
 0x483   : > { %v3490_v12 = vadd.f32 %v4797_v29, %v3381_v27 }
 0x485   : > { %v3522_v49 = vmax.f32 %v3490_v12, 0.0 }
 0x487   : > { %v4872_v19 = vpack.c.bf16 %v3522_v49, %v3521_v36 }
 0x488   : > { %v3383_v41 = vpop.f32.mrf.mxu2 }
 0x489   : > { %4919 = vst [vmem:[%s6281_s9 + $0x58] sm:$0xff] %v4872_v19   ;;  %v3384_v22 = vadd.f32 %v6270_v63, %v3383_v41 }
 0x48b   : > { %v3491_v28 = vadd.f32 %v4800_v56, %v3384_v22 }
 0x48d   : > { %v3523_v33 = vmax.f32 %v3491_v28, 0.0 }
 0x490   : > { %v3385_v1 = vpop.f32.mrf.mxu2 }
 0x491   : > { %v3386_v8 = vadd.f32 %v6270_v63, %v3385_v1 }
 0x493   : > { %v3492_v0 = vadd.f32 %v4801_v44, %v3386_v8 }
 0x495   : > { %v3524_v57 = vmax.f32 %v3492_v0, 0.0 }
 0x497   : > { %v4877_v2 = vpack.c.bf16 %v3524_v57, %v3523_v33 }
 0x498   : > { %v3388_v30 = vpop.f32.mrf.mxu2 }
 0x499   : > { %4920 = vst [vmem:[%s6281_s9 + $0x60] sm:$0xff] %v4877_v2   ;;  %v3389_v39 = vadd.f32 %v6270_v63, %v3388_v30 }
 0x49b   : > { %v3493_v23 = vadd.f32 %v4804_v16, %v3389_v39 }
 0x49d   : > { %v3525_v45 = vmax.f32 %v3493_v23, 0.0 }
 0x4a0   : > { %v3390_v11 = vpop.f32.mrf.mxu2 }
 0x4a1   : > { %v3391_v26 = vadd.f32 %v6270_v63, %v3390_v11 }
 0x4a3   : > { %v3494_v32 = vadd.f32 %v4805_v35, %v3391_v26 }
 0x4a5   : > { %v3526_v10 = vmax.f32 %v3494_v32, 0.0 }
 0x4a7   : > { %v4882_v3 = vpack.c.bf16 %v3526_v10, %v3525_v45 }
 0x4a8   : > { %v3393_v53 = vpop.f32.mrf.mxu2 }
 0x4a9   : > { %4921 = vst [vmem:[%s6281_s9 + $0x68] sm:$0xff] %v4882_v3   ;;  %v3394_v6 = vadd.f32 %v6270_v63, %v3393_v53 }
 0x4ab   : > { %v3495_v13 = vadd.f32 %v4808_v17, %v3394_v6 }
 0x4ad   : > { %v3527_v60 = vmax.f32 %v3495_v13, 0.0 }
 0x4b0   : > { %v3395_v37 = vpop.f32.mrf.mxu2 }
 0x4b1   : > { %v3396_v18 = vadd.f32 %v6270_v63, %v3395_v37 }
 0x4b3   : > { %v3496_v51 = vadd.f32 %v4809_v42, %v3396_v18 }
 0x4b5   : > { %v3528_v43 = vmax.f32 %v3496_v51, 0.0 }
 0x4b7   : > { %v4887_v55 = vpack.c.bf16 %v3528_v43, %v3527_v60 }
 0x4b8   : > { %v3398_v31 = vpop.f32.mrf.mxu2 }
 0x4b9   : > { %4922 = vst [vmem:[%s6281_s9 + $0x70] sm:$0xff] %v4887_v55   ;;  %v3399_v50 = vadd.f32 %v6270_v63, %v3398_v31 }
 0x4bb   : > { %v3497_v38 = vadd.f32 %v4812_v21, %v3399_v50 }
 0x4bd   : > { %v3529_v61 = vmax.f32 %v3497_v38, 0.0 }
 0x4c0   : > { %v3400_v7 = vpop.f32.mrf.mxu2 }
 0x4c1   : > { %v3401_v52 = vadd.f32 %v6270_v63, %v3400_v7 }
 0x4c3   : > { %v3498_v46 = vadd.f32 %v4813_v58, %v3401_v52 }
 0x4c5   : > { %v3530_v20 = vmax.f32 %v3498_v46, 0.0 }
 0x4c7   : > { %v4892_v15 = vpack.c.bf16 %v3530_v20, %v3529_v61 }
 0x4c9   : > { %4923 = vst [vmem:[%s6281_s9 + $0x78] sm:$0xff] %v4892_v15  }
 0x4ca   : > { %5181 = shalt.err (!%p5178_p10)
}
 0x4cb   : > { %s5236_s15 = smov 64   ;;  %s5237_s9 = smov 4  }
 0x4cc   : > { %4962 = dma.vmem_to_hbm [thread:$0]  (%p5369_p3), %s3609_s30, 2048, %s3611_s12, %s3596_s28, %s5236_s15, %s5236_s15, %s5237_s9  }
 0x4cd PF: > { %s3625_s21 = sand.u32 1, %s5216_s24   ;;  %p6470_p12 = scmp.ge.s32.totalorder %s5228_s27, 2 }
 0x4ce   : > { %s3626_s11 = scalar_lea.sflag [#allocation5], %s3625_s21 }
 0x4cf   : > { %p4979_p13 = pnand %p6470_p12, %p5313_p6 }
 0x4d1   : > { %p4980_p0 = pneg %p4979_p13 }
 0x4d3   : > { %5211 = dma.done.wait (%p4980_p0), %s3626_s11, 2048  }
 0x4d4   : > { %5213 = vsyncadd (%p4980_p0), %s3626_s11, 4294965248  ;;  %p22_p5 = scmp.ge.s32.totalorder %s5351_s13, 4   ;;  %s6471_s24 = smov %s5220_s25 }
 0x4d5   : > { %s6472_s25 = smov %s5224_s26  ;;  %s6473_s26 = smov %s5365_s17 }
 0x4d6   : > { %s6474_s27 = smov %s5351_s13  ;;  %24 = sbr.rel (!%p22_p5) target bundleno = 9 (0x9), region = 105 }
 0x4db   :  { %3632 = vsyncpa [#allocation4], 1 }
 0x4dc   :  { %3634 = vsyncpa [#allocation4 + $0x1], 1 }
 0x4dd   :  { %3635 = vsyncpa [#allocation7], 1 }
 0x4de   :  { %3636 = vsyncpa [#allocation10], 1 }
 0x4df   :  { %3637 = vsyncpa [#allocation5], 1 }
 0x4e0   :  { %3639 = vsyncpa [#allocation5 + $0x1], 1 }

</bundles_post_ra>
